<compile_context>
chip_gen: v7x
topology: tpu7x:2x2x1
jax: 0.10.0
libtpu: 0.0.40
codegen_flags: <defaults>
</compile_context>

<pallas_src>
import functools

import jax
import jax.numpy as jnp
from jax import lax
from jax.experimental import pallas as pl
from jax.experimental.pallas import tpu as pltpu


# ------------------------------ kernel helpers ------------------------------

_SQRT1_2 = 0.7071067811865476


def _ln(x, g, b, eps):
    # f32 LayerNorm over the feature (lane) axis; timm ViT uses eps=1e-6.
    mu = jnp.mean(x, axis=-1, keepdims=True)
    xc = x - mu
    var = jnp.mean(xc * xc, axis=-1, keepdims=True)
    return xc * lax.rsqrt(var + eps) * g + b


def _erf_poly(x):
    # Abramowitz & Stegun 7.1.26 rational erf approximation (|err| < 1.5e-7),
    # built only from abs/mul/add/div/exp/where so it lowers on every TPU gen.
    a1, a2, a3, a4, a5 = (0.254829592, -0.284496736, 1.421413741,
                          -1.453152027, 1.061405429)
    p = 0.3275911
    ax = jnp.abs(x)
    t = 1.0 / (1.0 + p * ax)
    poly = ((((a5 * t + a4) * t + a3) * t + a2) * t + a1) * t
    y = 1.0 - poly * jnp.exp(-(ax * ax))
    return jnp.where(x < 0.0, -y, y)


def _gelu(x):
    # Exact (erf-based) GELU as used by timm's ViT (via polynomial erf).
    return 0.5 * x * (1.0 + _erf_poly(x * _SQRT1_2))


# ------------------------------ fused ViT kernel ------------------------------

def _vit_kernel(depth, heads, dh, n_real, scale, eps,
                p_ref, pw_ref, add_ref,
                ln1g_ref, ln1b_ref, qkvw_ref, qkvb_ref, projw_ref, projb_ref,
                ln2g_ref, ln2b_ref, fc1w_ref, fc1b_ref, fc2w_ref, fc2b_ref,
                lnfg_ref, lnfb_ref, hw_ref, hb_ref,
                o_ref):
    """Whole ViT forward for one batch element, fully VMEM/vreg resident.

    p_ref:   (1, Npad, C*P*P) bf16 zero-padded patch matrix (row 0 = cls slot,
             tail rows = sequence padding; all-zero rows contribute 0).
    add_ref: (Npad, D) f32: row 0 = cls_token + pos[0]; rows 1..n_patch =
             conv bias + pos[i]; pad rows = 0.
    Stacked per-block weights carry a leading depth axis.
    o_ref:   (1, Npad, NCp) — classifier logits (all rows identical treatment;
             wrapper reads row 0).
    """
    # Patch embedding with conv-bias / cls-token / pos-embed folded into `add`.
    x = jnp.dot(p_ref[0], pw_ref[...],
                preferred_element_type=jnp.float32) + add_ref[...]   # (Npad, D) f32
    npad, d = x.shape

    # Additive softmax bias masking padded key columns (computed once, reused).
    col = lax.broadcasted_iota(jnp.int32, (1, npad), 1)
    key_bias = jnp.where(col < n_real, 0.0, -1e30).astype(jnp.float32)  # (1, Npad)

    for l in range(depth):                               # static unroll over depth
        # ---- attention sub-block ----
        y = _ln(x, ln1g_ref[l], ln1b_ref[l], eps)
        qkv = jnp.dot(y.astype(jnp.bfloat16), qkvw_ref[l],
                      preferred_element_type=jnp.float32) + qkvb_ref[l]  # (Npad, 3D)
        qkv = qkv.astype(jnp.bfloat16)                   # single cast for all heads

        heads_out = []
        for h in range(heads):                           # static unroll over heads
            lo = h * dh
            q = qkv[:, lo:lo + dh]
            k = qkv[:, d + lo:d + lo + dh]
            v = qkv[:, 2 * d + lo:2 * d + lo + dh]
            # q @ k^T without materializing a transpose
            s = lax.dot_general(q, k, (((1,), (1,)), ((), ())),
                                preferred_element_type=jnp.float32) * scale
            s = s + key_bias                             # additive pad-key mask
            s = s - jnp.max(s, axis=-1, keepdims=True)   # f32 softmax stats
            p = jnp.exp(s)
            p = p * pl.reciprocal(jnp.sum(p, axis=-1, keepdims=True), approx=True)
            heads_out.append(jnp.dot(p.astype(jnp.bfloat16), v,
                                     preferred_element_type=jnp.float32))
        o = jnp.concatenate(heads_out, axis=-1)          # (Npad, D) head merge
        attn = jnp.dot(o.astype(jnp.bfloat16), projw_ref[l],
                       preferred_element_type=jnp.float32) + projb_ref[l]
        x = x + attn                                     # residual

        # ---- MLP sub-block ----
        y = _ln(x, ln2g_ref[l], ln2b_ref[l], eps)
        h1 = jnp.dot(y.astype(jnp.bfloat16), fc1w_ref[l],
                     preferred_element_type=jnp.float32) + fc1b_ref[l]
        h1 = _gelu(h1)
        h2 = jnp.dot(h1.astype(jnp.bfloat16), fc2w_ref[l],
                     preferred_element_type=jnp.float32) + fc2b_ref[l]
        x = x + h2                                       # residual

    # ---- final LayerNorm + classifier head (row-wise, so applying it to all
    #      rows is exact; the wrapper keeps only the cls row) ----
    y = _ln(x, lnfg_ref[...], lnfb_ref[...], eps)
    logits = jnp.dot(y.astype(jnp.bfloat16), hw_ref[...],
                     preferred_element_type=jnp.float32) + hb_ref[...]
    o_ref[0] = logits.astype(o_ref.dtype)


# ------------------------------ pallas_call wrapper ------------------------------

def _vit_pallas(patches_bf16, add, params, cfg):
    B, Npad, CPP = patches_bf16.shape
    D, Hm, depth = cfg["dim"], cfg["mlp_hidden"], cfg["depth"]
    NCp = cfg["num_classes_pad"]
    heads = cfg["heads"]
    dh = D // heads

    kernel = functools.partial(_vit_kernel, depth, heads, dh,
                               cfg["num_tokens"], dh ** -0.5, 1e-6)

    def full(shape):
        n = len(shape)
        return pl.BlockSpec(shape, lambda b, n=n: (0,) * n)

    in_specs = [
        pl.BlockSpec((1, Npad, CPP), lambda b: (b, 0, 0)),   # patches (bf16)
        full((CPP, D)),                                      # patch_w (bf16)
        full((Npad, D)),                                     # add (f32)
        full((depth, 1, D)), full((depth, 1, D)),            # ln1_g, ln1_b
        full((depth, D, 3 * D)), full((depth, 1, 3 * D)),    # qkv_w, qkv_b
        full((depth, D, D)), full((depth, 1, D)),            # proj_w, proj_b
        full((depth, 1, D)), full((depth, 1, D)),            # ln2_g, ln2_b
        full((depth, D, Hm)), full((depth, 1, Hm)),          # fc1_w, fc1_b
        full((depth, Hm, D)), full((depth, 1, D)),           # fc2_w, fc2_b
        full((1, D)), full((1, D)),                          # lnf_g, lnf_b
        full((D, NCp)), full((1, NCp)),                      # head_w, head_b
    ]

    return pl.pallas_call(
        kernel,
        out_shape=jax.ShapeDtypeStruct((B, Npad, NCp), jnp.float32),
        grid=(B,),
        in_specs=in_specs,
        out_specs=pl.BlockSpec((1, Npad, NCp), lambda b: (b, 0, 0)),
        compiler_params=pltpu.CompilerParams(dimension_semantics=("parallel",)),
    )(patches_bf16, params["patch_w"], add,
      params["ln1_g"], params["ln1_b"], params["qkv_w"], params["qkv_b"],
      params["proj_w"], params["proj_b"], params["ln2_g"], params["ln2_b"],
      params["fc1_w"], params["fc1_b"], params["fc2_w"], params["fc2_b"],
      params["lnf_g"], params["lnf_b"], params["head_w"], params["head_b"])


# ------------------------------ ViT forward ------------------------------

def vit_forward(x, params, cfg):
    B, C, H, W = x.shape
    P, D = cfg["patch"], cfg["dim"]
    Hp, Wp = H // P, W // P
    n_patches = Hp * Wp
    n_tok = n_patches + 1
    Npad = cfg["seq_pad"]

    # Conv2d(k=P, stride=P) == patch flatten + matmul; patch vector order
    # (c, kh, kw) matches conv weight (out, c, kh, kw). Wrapper-side glue only.
    patches = (x.reshape(B, C, Hp, P, Wp, P)
                .transpose(0, 2, 4, 1, 3, 5)
                .reshape(B, n_patches, C * P * P))
    # zero row 0 (cls slot) + zero tail rows (sequence padding); bf16 in the
    # wrapper to halve the input DMA bytes (accumulation stays f32).
    patches_aug = jnp.pad(patches, ((0, 0), (1, Npad - n_tok), (0, 0))
                          ).astype(jnp.bfloat16)

    # per-row additive term folding conv bias + cls token + pos embedding
    pos = params["pos_embed"]                                    # (n_tok, D)
    add = jnp.concatenate([
        params["cls_token"] + pos[0:1],                          # (1, D)
        params["patch_b"] + pos[1:],                             # (n_patches, D)
        jnp.zeros((Npad - n_tok, D), jnp.float32),               # pad rows
    ], axis=0)                                                   # (Npad, D)

    logits_all = _vit_pallas(patches_aug, add, params, cfg)      # (B, Npad, NCp)
    return logits_all[:, 0, :cfg["num_classes"]]                 # cls row, real classes


# --------------------------- parameter creation ---------------------------

def init_params(key, cfg):
    C, P, D = cfg["in_chans"], cfg["patch"], cfg["dim"]
    Hm, depth = cfg["mlp_hidden"], cfg["depth"]
    n_tok = cfg["num_tokens"]
    nc, ncp = cfg["num_classes"], cfg["num_classes_pad"]

    def nrm(k, shape, std=0.02):
        return std * jax.random.normal(k, shape, dtype=jnp.float32)

    keys = iter(jax.random.split(key, 16))
    head_w = jnp.zeros((D, ncp), jnp.float32).at[:, :nc].set(nrm(next(keys), (D, nc)))
    return {
        # matmul weights stored in bf16 (MXU-native); biases/LN params stay f32
        "patch_w": nrm(next(keys), (C * P * P, D)).astype(jnp.bfloat16),
        "patch_b": nrm(next(keys), (1, D)),
        "cls_token": nrm(next(keys), (1, D)),
        "pos_embed": nrm(next(keys), (n_tok, D)),
        # per-block weights stacked along a leading depth axis (single fused call)
        "ln1_g": jnp.ones((depth, 1, D), jnp.float32),
        "ln1_b": jnp.zeros((depth, 1, D), jnp.float32),
        "qkv_w": nrm(next(keys), (depth, D, 3 * D)).astype(jnp.bfloat16),
        "qkv_b": jnp.zeros((depth, 1, 3 * D), jnp.float32),
        "proj_w": nrm(next(keys), (depth, D, D)).astype(jnp.bfloat16),
        "proj_b": jnp.zeros((depth, 1, D), jnp.float32),
        "ln2_g": jnp.ones((depth, 1, D), jnp.float32),
        "ln2_b": jnp.zeros((depth, 1, D), jnp.float32),
        "fc1_w": nrm(next(keys), (depth, D, Hm)).astype(jnp.bfloat16),
        "fc1_b": jnp.zeros((depth, 1, Hm), jnp.float32),
        "fc2_w": nrm(next(keys), (depth, Hm, D)).astype(jnp.bfloat16),
        "fc2_b": jnp.zeros((depth, 1, D), jnp.float32),
        "lnf_g": jnp.ones((1, D), jnp.float32),
        "lnf_b": jnp.zeros((1, D), jnp.float32),
        "head_w": head_w.astype(jnp.bfloat16),        # lane-padded num_classes -> 128
        "head_b": jnp.zeros((1, ncp), jnp.float32),
    }


# ---------------------------------- main ----------------------------------

if __name__ == "__main__":
    # TODO(synk): num_classes in the original comes from os.listdir(...); fixed here.
    cfg = {
        "in_chans": 3,
        "patch": 16,
        "img": 32,           # 32x32 image, 16x16 patches -> 4 patches
        "dim": 128,          # scaled-down embed dim (vit_base uses 768)
        "heads": 4,
        "depth": 2,          # scaled-down depth (vit_base uses 12)
        "mlp_hidden": 512,   # mlp_ratio = 4
        "num_classes": 10,
    }
    cfg["num_tokens"] = (cfg["img"] // cfg["patch"]) ** 2 + 1    # 5 (incl. cls)
    cfg["seq_pad"] = 8                                           # sublane-aligned sequence
    cfg["num_classes_pad"] = 128                                 # lane-dense head output

    key = jax.random.PRNGKey(0)
    kx, kp = jax.random.split(key)
    x = jax.random.normal(kx, (2, cfg["in_chans"], cfg["img"], cfg["img"]),
                          dtype=jnp.float32)                     # NCHW, like PyTorch
    params = init_params(kp, cfg)

    fwd = jax.jit(functools.partial(vit_forward, cfg=cfg))
    logits = fwd(x, params)
    jax.block_until_ready(logits)
    assert logits.shape == (2, cfg["num_classes"])
    assert bool(jnp.all(jnp.isfinite(logits)))
    print("KERNEL_OK")
</pallas_src>

<mosaic_0001>
module attributes {stable_mosaic.version = 11 : i64} {
  func.func @_vit_kernel(%arg0: i32, %arg1: memref<1x8x768xbf16, #tpu.memory_space<vmem>>, %arg2: memref<768x128xbf16, #tpu.memory_space<vmem>>, %arg3: memref<8x128xf32, #tpu.memory_space<vmem>>, %arg4: memref<2x1x128xf32, #tpu.memory_space<vmem>>, %arg5: memref<2x1x128xf32, #tpu.memory_space<vmem>>, %arg6: memref<2x128x384xbf16, #tpu.memory_space<vmem>>, %arg7: memref<2x1x384xf32, #tpu.memory_space<vmem>>, %arg8: memref<2x128x128xbf16, #tpu.memory_space<vmem>>, %arg9: memref<2x1x128xf32, #tpu.memory_space<vmem>>, %arg10: memref<2x1x128xf32, #tpu.memory_space<vmem>>, %arg11: memref<2x1x128xf32, #tpu.memory_space<vmem>>, %arg12: memref<2x128x512xbf16, #tpu.memory_space<vmem>>, %arg13: memref<2x1x512xf32, #tpu.memory_space<vmem>>, %arg14: memref<2x512x128xbf16, #tpu.memory_space<vmem>>, %arg15: memref<2x1x128xf32, #tpu.memory_space<vmem>>, %arg16: memref<1x128xf32, #tpu.memory_space<vmem>>, %arg17: memref<1x128xf32, #tpu.memory_space<vmem>>, %arg18: memref<128x128xbf16, #tpu.memory_space<vmem>>, %arg19: memref<1x128xf32, #tpu.memory_space<vmem>>, %arg20: memref<1x8x128xf32, #tpu.memory_space<vmem>>) attributes {dimension_semantics = [#tpu.dimension_semantics<parallel>], iteration_bounds = array<i64: 2>, scalar_prefetch = 0 : i64, scratch_operands = 0 : i64, tpu.core_type = #tpu.core_type<tc>, window_params = [{transform_indices = @transform_0, window_bounds = array<i64: 1, 8, 768>}, {pipeline_mode = #tpu.pipeline_mode<synchronous>, transform_indices = @transform_1, window_bounds = array<i64: 768, 128>}, {pipeline_mode = #tpu.pipeline_mode<synchronous>, transform_indices = @transform_2, window_bounds = array<i64: 8, 128>}, {pipeline_mode = #tpu.pipeline_mode<synchronous>, transform_indices = @transform_3, window_bounds = array<i64: 2, 1, 128>}, {pipeline_mode = #tpu.pipeline_mode<synchronous>, transform_indices = @transform_4, window_bounds = array<i64: 2, 1, 128>}, {pipeline_mode = #tpu.pipeline_mode<synchronous>, transform_indices = @transform_5, window_bounds = array<i64: 2, 128, 384>}, {pipeline_mode = #tpu.pipeline_mode<synchronous>, transform_indices = @transform_6, window_bounds = array<i64: 2, 1, 384>}, {pipeline_mode = #tpu.pipeline_mode<synchronous>, transform_indices = @transform_7, window_bounds = array<i64: 2, 128, 128>}, {pipeline_mode = #tpu.pipeline_mode<synchronous>, transform_indices = @transform_8, window_bounds = array<i64: 2, 1, 128>}, {pipeline_mode = #tpu.pipeline_mode<synchronous>, transform_indices = @transform_9, window_bounds = array<i64: 2, 1, 128>}, {pipeline_mode = #tpu.pipeline_mode<synchronous>, transform_indices = @transform_10, window_bounds = array<i64: 2, 1, 128>}, {pipeline_mode = #tpu.pipeline_mode<synchronous>, transform_indices = @transform_11, window_bounds = array<i64: 2, 128, 512>}, {pipeline_mode = #tpu.pipeline_mode<synchronous>, transform_indices = @transform_12, window_bounds = array<i64: 2, 1, 512>}, {pipeline_mode = #tpu.pipeline_mode<synchronous>, transform_indices = @transform_13, window_bounds = array<i64: 2, 512, 128>}, {pipeline_mode = #tpu.pipeline_mode<synchronous>, transform_indices = @transform_14, window_bounds = array<i64: 2, 1, 128>}, {pipeline_mode = #tpu.pipeline_mode<synchronous>, transform_indices = @transform_15, window_bounds = array<i64: 1, 128>}, {pipeline_mode = #tpu.pipeline_mode<synchronous>, transform_indices = @transform_16, window_bounds = array<i64: 1, 128>}, {pipeline_mode = #tpu.pipeline_mode<synchronous>, transform_indices = @transform_17, window_bounds = array<i64: 128, 128>}, {pipeline_mode = #tpu.pipeline_mode<synchronous>, transform_indices = @transform_18, window_bounds = array<i64: 1, 128>}, {transform_indices = @transform_19, window_bounds = array<i64: 1, 8, 128>}]} {
    %c0 = arith.constant 0 : index
    %c0_0 = arith.constant 0 : index
    %c0_1 = arith.constant 0 : index
    %0 = vector.load %arg1[%c0, %c0_0, %c0_1] : memref<1x8x768xbf16, #tpu.memory_space<vmem>>, vector<1x8x768xbf16>
    %1 = vector.shape_cast %0 : vector<1x8x768xbf16> to vector<8x768xbf16>
    %c0_2 = arith.constant 0 : index
    %c0_3 = arith.constant 0 : index
    %2 = vector.load %arg2[%c0_2, %c0_3] : memref<768x128xbf16, #tpu.memory_space<vmem>>, vector<768x128xbf16>
    %cst = arith.constant dense<0.000000e+00> : vector<8x128xf32>
    %3 = tpu.matmul %1, %2, %cst {dimension_numbers = #tpu.dot_dimension_numbers<[1], [0], [0], [1], [0, 0, 1, 1], [], []>} : vector<8x768xbf16>, vector<768x128xbf16>, vector<8x128xf32> -> vector<8x128xf32>
    %c0_4 = arith.constant 0 : index
    %c0_5 = arith.constant 0 : index
    %4 = vector.load %arg3[%c0_4, %c0_5] : memref<8x128xf32, #tpu.memory_space<vmem>>, vector<8x128xf32>
    %5 = arith.addf %3, %4 : vector<8x128xf32>
    %6 = tpu.iota {dimensions = array<i32: 1>} : vector<1x8xi32>
    %c5_i32 = arith.constant 5 : i32
    %7 = vector.broadcast %c5_i32 : i32 to vector<1x8xi32>
    %8 = arith.cmpi slt, %6, %7 : vector<1x8xi32>
    %cst_6 = arith.constant 0.000000e+00 : f32
    %cst_7 = arith.constant -1.000000e+30 : f32
    %9 = vector.broadcast %cst_6 : f32 to vector<1x8xf32>
    %10 = vector.broadcast %cst_7 : f32 to vector<1x8xf32>
    %11 = arith.select %8, %9, %10 : vector<1x8xi1>, vector<1x8xf32>
    %c0_8 = arith.constant 0 : index
    %c0_9 = arith.constant 0 : index
    %c0_10 = arith.constant 0 : index
    %12 = vector.load %arg4[%c0_8, %c0_9, %c0_10] : memref<2x1x128xf32, #tpu.memory_space<vmem>>, vector<1x1x128xf32>
    %13 = vector.shape_cast %12 : vector<1x1x128xf32> to vector<1x128xf32>
    %c0_11 = arith.constant 0 : index
    %c0_12 = arith.constant 0 : index
    %c0_13 = arith.constant 0 : index
    %14 = vector.load %arg5[%c0_11, %c0_12, %c0_13] : memref<2x1x128xf32, #tpu.memory_space<vmem>>, vector<1x1x128xf32>
    %15 = vector.shape_cast %14 : vector<1x1x128xf32> to vector<1x128xf32>
    %cst_14 = arith.constant dense<0.000000e+00> : vector<8xf32>
    %16 = vector.multi_reduction <add>, %5, %cst_14 [1] : vector<8x128xf32> to vector<8xf32>
    %17 = vector.shape_cast %16 : vector<8xf32> to vector<8x1xf32>
    %cst_15 = arith.constant 1.280000e+02 : f32
    %18 = vector.broadcast %cst_15 : f32 to vector<8x1xf32>
    %19 = arith.divf %17, %18 : vector<8x1xf32>
    %20 = vector.broadcast %19 : vector<8x1xf32> to vector<8x128xf32>
    %21 = arith.subf %5, %20 : vector<8x128xf32>
    %22 = arith.mulf %21, %21 : vector<8x128xf32>
    %cst_16 = arith.constant dense<0.000000e+00> : vector<8xf32>
    %23 = vector.multi_reduction <add>, %22, %cst_16 [1] : vector<8x128xf32> to vector<8xf32>
    %24 = vector.shape_cast %23 : vector<8xf32> to vector<8x1xf32>
    %cst_17 = arith.constant 1.280000e+02 : f32
    %25 = vector.broadcast %cst_17 : f32 to vector<8x1xf32>
    %26 = arith.divf %24, %25 : vector<8x1xf32>
    %cst_18 = arith.constant 9.99999997E-7 : f32
    %27 = vector.broadcast %cst_18 : f32 to vector<8x1xf32>
    %28 = arith.addf %26, %27 : vector<8x1xf32>
    %29 = math.rsqrt %28 : vector<8x1xf32>
    %30 = vector.broadcast %29 : vector<8x1xf32> to vector<8x128xf32>
    %31 = arith.mulf %21, %30 : vector<8x128xf32>
    %32 = vector.broadcast %13 : vector<1x128xf32> to vector<8x128xf32>
    %33 = arith.mulf %31, %32 : vector<8x128xf32>
    %34 = vector.broadcast %15 : vector<1x128xf32> to vector<8x128xf32>
    %35 = arith.addf %33, %34 : vector<8x128xf32>
    %36 = arith.truncf %35 : vector<8x128xf32> to vector<8x128xbf16>
    %c0_19 = arith.constant 0 : index
    %c0_20 = arith.constant 0 : index
    %c0_21 = arith.constant 0 : index
    %37 = vector.load %arg6[%c0_19, %c0_20, %c0_21] : memref<2x128x384xbf16, #tpu.memory_space<vmem>>, vector<1x128x384xbf16>
    %38 = vector.shape_cast %37 : vector<1x128x384xbf16> to vector<128x384xbf16>
    %cst_22 = arith.constant dense<0.000000e+00> : vector<8x384xf32>
    %39 = tpu.matmul %36, %38, %cst_22 {dimension_numbers = #tpu.dot_dimension_numbers<[1], [0], [0], [1], [0, 0, 1, 1], [], []>} : vector<8x128xbf16>, vector<128x384xbf16>, vector<8x384xf32> -> vector<8x384xf32>
    %c0_23 = arith.constant 0 : index
    %c0_24 = arith.constant 0 : index
    %c0_25 = arith.constant 0 : index
    %40 = vector.load %arg7[%c0_23, %c0_24, %c0_25] : memref<2x1x384xf32, #tpu.memory_space<vmem>>, vector<1x1x384xf32>
    %41 = vector.shape_cast %40 : vector<1x1x384xf32> to vector<1x384xf32>
    %42 = vector.broadcast %41 : vector<1x384xf32> to vector<8x384xf32>
    %43 = arith.addf %39, %42 : vector<8x384xf32>
    %44 = arith.truncf %43 : vector<8x384xf32> to vector<8x384xbf16>
    %45 = vector.extract_strided_slice %44 {offsets = [0, 0], sizes = [8, 32], strides = [1, 1]} : vector<8x384xbf16> to vector<8x32xbf16>
    %46 = vector.extract_strided_slice %44 {offsets = [0, 128], sizes = [8, 32], strides = [1, 1]} : vector<8x384xbf16> to vector<8x32xbf16>
    %47 = vector.extract_strided_slice %44 {offsets = [0, 256], sizes = [8, 32], strides = [1, 1]} : vector<8x384xbf16> to vector<8x32xbf16>
    %cst_26 = arith.constant dense<0.000000e+00> : vector<8x8xf32>
    %48 = tpu.matmul %45, %46, %cst_26 {dimension_numbers = #tpu.dot_dimension_numbers<[1], [1], [0], [0], [0, 0, 1, 0], [], []>} : vector<8x32xbf16>, vector<8x32xbf16>, vector<8x8xf32> -> vector<8x8xf32>
    %cst_27 = arith.constant 0.176776692 : f32
    %49 = vector.broadcast %cst_27 : f32 to vector<8x8xf32>
    %50 = arith.mulf %48, %49 : vector<8x8xf32>
    %51 = vector.broadcast %11 : vector<1x8xf32> to vector<8x8xf32>
    %52 = arith.addf %50, %51 : vector<8x8xf32>
    %cst_28 = arith.constant dense<0xFF800000> : vector<8xf32>
    %53 = vector.multi_reduction <maximumf>, %52, %cst_28 [1] : vector<8x8xf32> to vector<8xf32>
    %54 = vector.shape_cast %53 : vector<8xf32> to vector<8x1xf32>
    %55 = vector.broadcast %54 : vector<8x1xf32> to vector<8x8xf32>
    %56 = arith.subf %52, %55 : vector<8x8xf32>
    %57 = math.exp %56 : vector<8x8xf32>
    %cst_29 = arith.constant dense<0.000000e+00> : vector<8xf32>
    %58 = vector.multi_reduction <add>, %57, %cst_29 [1] : vector<8x8xf32> to vector<8xf32>
    %59 = vector.shape_cast %58 : vector<8xf32> to vector<8x1xf32>
    %60 = tpu.reciprocal %59 {approx = true} : vector<8x1xf32> -> vector<8x1xf32>
    %61 = vector.broadcast %60 : vector<8x1xf32> to vector<8x8xf32>
    %62 = arith.mulf %57, %61 : vector<8x8xf32>
    %63 = arith.truncf %62 : vector<8x8xf32> to vector<8x8xbf16>
    %cst_30 = arith.constant dense<0.000000e+00> : vector<8x32xf32>
    %64 = tpu.matmul %63, %47, %cst_30 {dimension_numbers = #tpu.dot_dimension_numbers<[1], [0], [0], [1], [0, 0, 1, 1], [], []>} : vector<8x8xbf16>, vector<8x32xbf16>, vector<8x32xf32> -> vector<8x32xf32>
    %65 = vector.extract_strided_slice %44 {offsets = [0, 32], sizes = [8, 32], strides = [1, 1]} : vector<8x384xbf16> to vector<8x32xbf16>
    %66 = vector.extract_strided_slice %44 {offsets = [0, 160], sizes = [8, 32], strides = [1, 1]} : vector<8x384xbf16> to vector<8x32xbf16>
    %67 = vector.extract_strided_slice %44 {offsets = [0, 288], sizes = [8, 32], strides = [1, 1]} : vector<8x384xbf16> to vector<8x32xbf16>
    %cst_31 = arith.constant dense<0.000000e+00> : vector<8x8xf32>
    %68 = tpu.matmul %65, %66, %cst_31 {dimension_numbers = #tpu.dot_dimension_numbers<[1], [1], [0], [0], [0, 0, 1, 0], [], []>} : vector<8x32xbf16>, vector<8x32xbf16>, vector<8x8xf32> -> vector<8x8xf32>
    %cst_32 = arith.constant 0.176776692 : f32
    %69 = vector.broadcast %cst_32 : f32 to vector<8x8xf32>
    %70 = arith.mulf %68, %69 : vector<8x8xf32>
    %71 = vector.broadcast %11 : vector<1x8xf32> to vector<8x8xf32>
    %72 = arith.addf %70, %71 : vector<8x8xf32>
    %cst_33 = arith.constant dense<0xFF800000> : vector<8xf32>
    %73 = vector.multi_reduction <maximumf>, %72, %cst_33 [1] : vector<8x8xf32> to vector<8xf32>
    %74 = vector.shape_cast %73 : vector<8xf32> to vector<8x1xf32>
    %75 = vector.broadcast %74 : vector<8x1xf32> to vector<8x8xf32>
    %76 = arith.subf %72, %75 : vector<8x8xf32>
    %77 = math.exp %76 : vector<8x8xf32>
    %cst_34 = arith.constant dense<0.000000e+00> : vector<8xf32>
    %78 = vector.multi_reduction <add>, %77, %cst_34 [1] : vector<8x8xf32> to vector<8xf32>
    %79 = vector.shape_cast %78 : vector<8xf32> to vector<8x1xf32>
    %80 = tpu.reciprocal %79 {approx = true} : vector<8x1xf32> -> vector<8x1xf32>
    %81 = vector.broadcast %80 : vector<8x1xf32> to vector<8x8xf32>
    %82 = arith.mulf %77, %81 : vector<8x8xf32>
    %83 = arith.truncf %82 : vector<8x8xf32> to vector<8x8xbf16>
    %cst_35 = arith.constant dense<0.000000e+00> : vector<8x32xf32>
    %84 = tpu.matmul %83, %67, %cst_35 {dimension_numbers = #tpu.dot_dimension_numbers<[1], [0], [0], [1], [0, 0, 1, 1], [], []>} : vector<8x8xbf16>, vector<8x32xbf16>, vector<8x32xf32> -> vector<8x32xf32>
    %85 = vector.extract_strided_slice %44 {offsets = [0, 64], sizes = [8, 32], strides = [1, 1]} : vector<8x384xbf16> to vector<8x32xbf16>
    %86 = vector.extract_strided_slice %44 {offsets = [0, 192], sizes = [8, 32], strides = [1, 1]} : vector<8x384xbf16> to vector<8x32xbf16>
    %87 = vector.extract_strided_slice %44 {offsets = [0, 320], sizes = [8, 32], strides = [1, 1]} : vector<8x384xbf16> to vector<8x32xbf16>
    %cst_36 = arith.constant dense<0.000000e+00> : vector<8x8xf32>
    %88 = tpu.matmul %85, %86, %cst_36 {dimension_numbers = #tpu.dot_dimension_numbers<[1], [1], [0], [0], [0, 0, 1, 0], [], []>} : vector<8x32xbf16>, vector<8x32xbf16>, vector<8x8xf32> -> vector<8x8xf32>
    %cst_37 = arith.constant 0.176776692 : f32
    %89 = vector.broadcast %cst_37 : f32 to vector<8x8xf32>
    %90 = arith.mulf %88, %89 : vector<8x8xf32>
    %91 = vector.broadcast %11 : vector<1x8xf32> to vector<8x8xf32>
    %92 = arith.addf %90, %91 : vector<8x8xf32>
    %cst_38 = arith.constant dense<0xFF800000> : vector<8xf32>
    %93 = vector.multi_reduction <maximumf>, %92, %cst_38 [1] : vector<8x8xf32> to vector<8xf32>
    %94 = vector.shape_cast %93 : vector<8xf32> to vector<8x1xf32>
    %95 = vector.broadcast %94 : vector<8x1xf32> to vector<8x8xf32>
    %96 = arith.subf %92, %95 : vector<8x8xf32>
    %97 = math.exp %96 : vector<8x8xf32>
    %cst_39 = arith.constant dense<0.000000e+00> : vector<8xf32>
    %98 = vector.multi_reduction <add>, %97, %cst_39 [1] : vector<8x8xf32> to vector<8xf32>
    %99 = vector.shape_cast %98 : vector<8xf32> to vector<8x1xf32>
    %100 = tpu.reciprocal %99 {approx = true} : vector<8x1xf32> -> vector<8x1xf32>
    %101 = vector.broadcast %100 : vector<8x1xf32> to vector<8x8xf32>
    %102 = arith.mulf %97, %101 : vector<8x8xf32>
    %103 = arith.truncf %102 : vector<8x8xf32> to vector<8x8xbf16>
    %cst_40 = arith.constant dense<0.000000e+00> : vector<8x32xf32>
    %104 = tpu.matmul %103, %87, %cst_40 {dimension_numbers = #tpu.dot_dimension_numbers<[1], [0], [0], [1], [0, 0, 1, 1], [], []>} : vector<8x8xbf16>, vector<8x32xbf16>, vector<8x32xf32> -> vector<8x32xf32>
    %105 = vector.extract_strided_slice %44 {offsets = [0, 96], sizes = [8, 32], strides = [1, 1]} : vector<8x384xbf16> to vector<8x32xbf16>
    %106 = vector.extract_strided_slice %44 {offsets = [0, 224], sizes = [8, 32], strides = [1, 1]} : vector<8x384xbf16> to vector<8x32xbf16>
    %107 = vector.extract_strided_slice %44 {offsets = [0, 352], sizes = [8, 32], strides = [1, 1]} : vector<8x384xbf16> to vector<8x32xbf16>
    %cst_41 = arith.constant dense<0.000000e+00> : vector<8x8xf32>
    %108 = tpu.matmul %105, %106, %cst_41 {dimension_numbers = #tpu.dot_dimension_numbers<[1], [1], [0], [0], [0, 0, 1, 0], [], []>} : vector<8x32xbf16>, vector<8x32xbf16>, vector<8x8xf32> -> vector<8x8xf32>
    %cst_42 = arith.constant 0.176776692 : f32
    %109 = vector.broadcast %cst_42 : f32 to vector<8x8xf32>
    %110 = arith.mulf %108, %109 : vector<8x8xf32>
    %111 = vector.broadcast %11 : vector<1x8xf32> to vector<8x8xf32>
    %112 = arith.addf %110, %111 : vector<8x8xf32>
    %cst_43 = arith.constant dense<0xFF800000> : vector<8xf32>
    %113 = vector.multi_reduction <maximumf>, %112, %cst_43 [1] : vector<8x8xf32> to vector<8xf32>
    %114 = vector.shape_cast %113 : vector<8xf32> to vector<8x1xf32>
    %115 = vector.broadcast %114 : vector<8x1xf32> to vector<8x8xf32>
    %116 = arith.subf %112, %115 : vector<8x8xf32>
    %117 = math.exp %116 : vector<8x8xf32>
    %cst_44 = arith.constant dense<0.000000e+00> : vector<8xf32>
    %118 = vector.multi_reduction <add>, %117, %cst_44 [1] : vector<8x8xf32> to vector<8xf32>
    %119 = vector.shape_cast %118 : vector<8xf32> to vector<8x1xf32>
    %120 = tpu.reciprocal %119 {approx = true} : vector<8x1xf32> -> vector<8x1xf32>
    %121 = vector.broadcast %120 : vector<8x1xf32> to vector<8x8xf32>
    %122 = arith.mulf %117, %121 : vector<8x8xf32>
    %123 = arith.truncf %122 : vector<8x8xf32> to vector<8x8xbf16>
    %cst_45 = arith.constant dense<0.000000e+00> : vector<8x32xf32>
    %124 = tpu.matmul %123, %107, %cst_45 {dimension_numbers = #tpu.dot_dimension_numbers<[1], [0], [0], [1], [0, 0, 1, 1], [], []>} : vector<8x8xbf16>, vector<8x32xbf16>, vector<8x32xf32> -> vector<8x32xf32>
    %125 = tpu.concatenate %64, %84, %104, %124 in 1 : vector<8x32xf32>, vector<8x32xf32>, vector<8x32xf32>, vector<8x32xf32> -> vector<8x128xf32>
    %126 = arith.truncf %125 : vector<8x128xf32> to vector<8x128xbf16>
    %c0_46 = arith.constant 0 : index
    %c0_47 = arith.constant 0 : index
    %c0_48 = arith.constant 0 : index
    %127 = vector.load %arg8[%c0_46, %c0_47, %c0_48] : memref<2x128x128xbf16, #tpu.memory_space<vmem>>, vector<1x128x128xbf16>
    %128 = vector.shape_cast %127 : vector<1x128x128xbf16> to vector<128x128xbf16>
    %cst_49 = arith.constant dense<0.000000e+00> : vector<8x128xf32>
    %129 = tpu.matmul %126, %128, %cst_49 {dimension_numbers = #tpu.dot_dimension_numbers<[1], [0], [0], [1], [0, 0, 1, 1], [], []>} : vector<8x128xbf16>, vector<128x128xbf16>, vector<8x128xf32> -> vector<8x128xf32>
    %c0_50 = arith.constant 0 : index
    %c0_51 = arith.constant 0 : index
    %c0_52 = arith.constant 0 : index
    %130 = vector.load %arg9[%c0_50, %c0_51, %c0_52] : memref<2x1x128xf32, #tpu.memory_space<vmem>>, vector<1x1x128xf32>
    %131 = vector.shape_cast %130 : vector<1x1x128xf32> to vector<1x128xf32>
    %132 = vector.broadcast %131 : vector<1x128xf32> to vector<8x128xf32>
    %133 = arith.addf %129, %132 : vector<8x128xf32>
    %134 = arith.addf %5, %133 : vector<8x128xf32>
    %c0_53 = arith.constant 0 : index
    %c0_54 = arith.constant 0 : index
    %c0_55 = arith.constant 0 : index
    %135 = vector.load %arg10[%c0_53, %c0_54, %c0_55] : memref<2x1x128xf32, #tpu.memory_space<vmem>>, vector<1x1x128xf32>
    %136 = vector.shape_cast %135 : vector<1x1x128xf32> to vector<1x128xf32>
    %c0_56 = arith.constant 0 : index
    %c0_57 = arith.constant 0 : index
    %c0_58 = arith.constant 0 : index
    %137 = vector.load %arg11[%c0_56, %c0_57, %c0_58] : memref<2x1x128xf32, #tpu.memory_space<vmem>>, vector<1x1x128xf32>
    %138 = vector.shape_cast %137 : vector<1x1x128xf32> to vector<1x128xf32>
    %cst_59 = arith.constant dense<0.000000e+00> : vector<8xf32>
    %139 = vector.multi_reduction <add>, %134, %cst_59 [1] : vector<8x128xf32> to vector<8xf32>
    %140 = vector.shape_cast %139 : vector<8xf32> to vector<8x1xf32>
    %cst_60 = arith.constant 1.280000e+02 : f32
    %141 = vector.broadcast %cst_60 : f32 to vector<8x1xf32>
    %142 = arith.divf %140, %141 : vector<8x1xf32>
    %143 = vector.broadcast %142 : vector<8x1xf32> to vector<8x128xf32>
    %144 = arith.subf %134, %143 : vector<8x128xf32>
    %145 = arith.mulf %144, %144 : vector<8x128xf32>
    %cst_61 = arith.constant dense<0.000000e+00> : vector<8xf32>
    %146 = vector.multi_reduction <add>, %145, %cst_61 [1] : vector<8x128xf32> to vector<8xf32>
    %147 = vector.shape_cast %146 : vector<8xf32> to vector<8x1xf32>
    %cst_62 = arith.constant 1.280000e+02 : f32
    %148 = vector.broadcast %cst_62 : f32 to vector<8x1xf32>
    %149 = arith.divf %147, %148 : vector<8x1xf32>
    %cst_63 = arith.constant 9.99999997E-7 : f32
    %150 = vector.broadcast %cst_63 : f32 to vector<8x1xf32>
    %151 = arith.addf %149, %150 : vector<8x1xf32>
    %152 = math.rsqrt %151 : vector<8x1xf32>
    %153 = vector.broadcast %152 : vector<8x1xf32> to vector<8x128xf32>
    %154 = arith.mulf %144, %153 : vector<8x128xf32>
    %155 = vector.broadcast %136 : vector<1x128xf32> to vector<8x128xf32>
    %156 = arith.mulf %154, %155 : vector<8x128xf32>
    %157 = vector.broadcast %138 : vector<1x128xf32> to vector<8x128xf32>
    %158 = arith.addf %156, %157 : vector<8x128xf32>
    %159 = arith.truncf %158 : vector<8x128xf32> to vector<8x128xbf16>
    %c0_64 = arith.constant 0 : index
    %c0_65 = arith.constant 0 : index
    %c0_66 = arith.constant 0 : index
    %160 = vector.load %arg12[%c0_64, %c0_65, %c0_66] : memref<2x128x512xbf16, #tpu.memory_space<vmem>>, vector<1x128x512xbf16>
    %161 = vector.shape_cast %160 : vector<1x128x512xbf16> to vector<128x512xbf16>
    %cst_67 = arith.constant dense<0.000000e+00> : vector<8x512xf32>
    %162 = tpu.matmul %159, %161, %cst_67 {dimension_numbers = #tpu.dot_dimension_numbers<[1], [0], [0], [1], [0, 0, 1, 1], [], []>} : vector<8x128xbf16>, vector<128x512xbf16>, vector<8x512xf32> -> vector<8x512xf32>
    %c0_68 = arith.constant 0 : index
    %c0_69 = arith.constant 0 : index
    %c0_70 = arith.constant 0 : index
    %163 = vector.load %arg13[%c0_68, %c0_69, %c0_70] : memref<2x1x512xf32, #tpu.memory_space<vmem>>, vector<1x1x512xf32>
    %164 = vector.shape_cast %163 : vector<1x1x512xf32> to vector<1x512xf32>
    %165 = vector.broadcast %164 : vector<1x512xf32> to vector<8x512xf32>
    %166 = arith.addf %162, %165 : vector<8x512xf32>
    %cst_71 = arith.constant 5.000000e-01 : f32
    %167 = vector.broadcast %cst_71 : f32 to vector<8x512xf32>
    %168 = arith.mulf %167, %166 : vector<8x512xf32>
    %cst_72 = arith.constant 0.707106769 : f32
    %169 = vector.broadcast %cst_72 : f32 to vector<8x512xf32>
    %170 = arith.mulf %166, %169 : vector<8x512xf32>
    %171 = math.absf %170 : vector<8x512xf32>
    %cst_73 = arith.constant 0.327591091 : f32
    %172 = vector.broadcast %cst_73 : f32 to vector<8x512xf32>
    %173 = arith.mulf %172, %171 : vector<8x512xf32>
    %cst_74 = arith.constant 1.000000e+00 : f32
    %174 = vector.broadcast %cst_74 : f32 to vector<8x512xf32>
    %175 = arith.addf %174, %173 : vector<8x512xf32>
    %cst_75 = arith.constant 1.000000e+00 : f32
    %176 = vector.broadcast %cst_75 : f32 to vector<8x512xf32>
    %177 = arith.divf %176, %175 : vector<8x512xf32>
    %cst_76 = arith.constant 1.06140542 : f32
    %178 = vector.broadcast %cst_76 : f32 to vector<8x512xf32>
    %179 = arith.mulf %178, %177 : vector<8x512xf32>
    %cst_77 = arith.constant -1.45315206 : f32
    %180 = vector.broadcast %cst_77 : f32 to vector<8x512xf32>
    %181 = arith.addf %179, %180 : vector<8x512xf32>
    %182 = arith.mulf %181, %177 : vector<8x512xf32>
    %cst_78 = arith.constant 1.42141378 : f32
    %183 = vector.broadcast %cst_78 : f32 to vector<8x512xf32>
    %184 = arith.addf %182, %183 : vector<8x512xf32>
    %185 = arith.mulf %184, %177 : vector<8x512xf32>
    %cst_79 = arith.constant -0.284496725 : f32
    %186 = vector.broadcast %cst_79 : f32 to vector<8x512xf32>
    %187 = arith.addf %185, %186 : vector<8x512xf32>
    %188 = arith.mulf %187, %177 : vector<8x512xf32>
    %cst_80 = arith.constant 0.254829586 : f32
    %189 = vector.broadcast %cst_80 : f32 to vector<8x512xf32>
    %190 = arith.addf %188, %189 : vector<8x512xf32>
    %191 = arith.mulf %190, %177 : vector<8x512xf32>
    %192 = arith.mulf %171, %171 : vector<8x512xf32>
    %cst_81 = arith.constant 0.000000e+00 : f32
    %193 = vector.broadcast %cst_81 : f32 to vector<8x512xf32>
    %194 = arith.subf %193, %192 : vector<8x512xf32>
    %195 = math.exp %194 : vector<8x512xf32>
    %196 = arith.mulf %191, %195 : vector<8x512xf32>
    %cst_82 = arith.constant 1.000000e+00 : f32
    %197 = vector.broadcast %cst_82 : f32 to vector<8x512xf32>
    %198 = arith.subf %197, %196 : vector<8x512xf32>
    %cst_83 = arith.constant 0.000000e+00 : f32
    %199 = vector.broadcast %cst_83 : f32 to vector<8x512xf32>
    %200 = arith.cmpf olt, %170, %199 : vector<8x512xf32>
    %cst_84 = arith.constant 0.000000e+00 : f32
    %201 = vector.broadcast %cst_84 : f32 to vector<8x512xf32>
    %202 = arith.subf %201, %198 : vector<8x512xf32>
    %203 = arith.select %200, %202, %198 : vector<8x512xi1>, vector<8x512xf32>
    %cst_85 = arith.constant 1.000000e+00 : f32
    %204 = vector.broadcast %cst_85 : f32 to vector<8x512xf32>
    %205 = arith.addf %204, %203 : vector<8x512xf32>
    %206 = arith.mulf %168, %205 : vector<8x512xf32>
    %207 = arith.truncf %206 : vector<8x512xf32> to vector<8x512xbf16>
    %c0_86 = arith.constant 0 : index
    %c0_87 = arith.constant 0 : index
    %c0_88 = arith.constant 0 : index
    %208 = vector.load %arg14[%c0_86, %c0_87, %c0_88] : memref<2x512x128xbf16, #tpu.memory_space<vmem>>, vector<1x512x128xbf16>
    %209 = vector.shape_cast %208 : vector<1x512x128xbf16> to vector<512x128xbf16>
    %cst_89 = arith.constant dense<0.000000e+00> : vector<8x128xf32>
    %210 = tpu.matmul %207, %209, %cst_89 {dimension_numbers = #tpu.dot_dimension_numbers<[1], [0], [0], [1], [0, 0, 1, 1], [], []>} : vector<8x512xbf16>, vector<512x128xbf16>, vector<8x128xf32> -> vector<8x128xf32>
    %c0_90 = arith.constant 0 : index
    %c0_91 = arith.constant 0 : index
    %c0_92 = arith.constant 0 : index
    %211 = vector.load %arg15[%c0_90, %c0_91, %c0_92] : memref<2x1x128xf32, #tpu.memory_space<vmem>>, vector<1x1x128xf32>
    %212 = vector.shape_cast %211 : vector<1x1x128xf32> to vector<1x128xf32>
    %213 = vector.broadcast %212 : vector<1x128xf32> to vector<8x128xf32>
    %214 = arith.addf %210, %213 : vector<8x128xf32>
    %215 = arith.addf %134, %214 : vector<8x128xf32>
    %c1 = arith.constant 1 : index
    %c0_93 = arith.constant 0 : index
    %c0_94 = arith.constant 0 : index
    %216 = vector.load %arg4[%c1, %c0_93, %c0_94] : memref<2x1x128xf32, #tpu.memory_space<vmem>>, vector<1x1x128xf32>
    %217 = vector.shape_cast %216 : vector<1x1x128xf32> to vector<1x128xf32>
    %c1_95 = arith.constant 1 : index
    %c0_96 = arith.constant 0 : index
    %c0_97 = arith.constant 0 : index
    %218 = vector.load %arg5[%c1_95, %c0_96, %c0_97] : memref<2x1x128xf32, #tpu.memory_space<vmem>>, vector<1x1x128xf32>
    %219 = vector.shape_cast %218 : vector<1x1x128xf32> to vector<1x128xf32>
    %cst_98 = arith.constant dense<0.000000e+00> : vector<8xf32>
    %220 = vector.multi_reduction <add>, %215, %cst_98 [1] : vector<8x128xf32> to vector<8xf32>
    %221 = vector.shape_cast %220 : vector<8xf32> to vector<8x1xf32>
    %cst_99 = arith.constant 1.280000e+02 : f32
    %222 = vector.broadcast %cst_99 : f32 to vector<8x1xf32>
    %223 = arith.divf %221, %222 : vector<8x1xf32>
    %224 = vector.broadcast %223 : vector<8x1xf32> to vector<8x128xf32>
    %225 = arith.subf %215, %224 : vector<8x128xf32>
    %226 = arith.mulf %225, %225 : vector<8x128xf32>
    %cst_100 = arith.constant dense<0.000000e+00> : vector<8xf32>
    %227 = vector.multi_reduction <add>, %226, %cst_100 [1] : vector<8x128xf32> to vector<8xf32>
    %228 = vector.shape_cast %227 : vector<8xf32> to vector<8x1xf32>
    %cst_101 = arith.constant 1.280000e+02 : f32
    %229 = vector.broadcast %cst_101 : f32 to vector<8x1xf32>
    %230 = arith.divf %228, %229 : vector<8x1xf32>
    %cst_102 = arith.constant 9.99999997E-7 : f32
    %231 = vector.broadcast %cst_102 : f32 to vector<8x1xf32>
    %232 = arith.addf %230, %231 : vector<8x1xf32>
    %233 = math.rsqrt %232 : vector<8x1xf32>
    %234 = vector.broadcast %233 : vector<8x1xf32> to vector<8x128xf32>
    %235 = arith.mulf %225, %234 : vector<8x128xf32>
    %236 = vector.broadcast %217 : vector<1x128xf32> to vector<8x128xf32>
    %237 = arith.mulf %235, %236 : vector<8x128xf32>
    %238 = vector.broadcast %219 : vector<1x128xf32> to vector<8x128xf32>
    %239 = arith.addf %237, %238 : vector<8x128xf32>
    %240 = arith.truncf %239 : vector<8x128xf32> to vector<8x128xbf16>
    %c1_103 = arith.constant 1 : index
    %c0_104 = arith.constant 0 : index
    %c0_105 = arith.constant 0 : index
    %241 = vector.load %arg6[%c1_103, %c0_104, %c0_105] : memref<2x128x384xbf16, #tpu.memory_space<vmem>>, vector<1x128x384xbf16>
    %242 = vector.shape_cast %241 : vector<1x128x384xbf16> to vector<128x384xbf16>
    %cst_106 = arith.constant dense<0.000000e+00> : vector<8x384xf32>
    %243 = tpu.matmul %240, %242, %cst_106 {dimension_numbers = #tpu.dot_dimension_numbers<[1], [0], [0], [1], [0, 0, 1, 1], [], []>} : vector<8x128xbf16>, vector<128x384xbf16>, vector<8x384xf32> -> vector<8x384xf32>
    %c1_107 = arith.constant 1 : index
    %c0_108 = arith.constant 0 : index
    %c0_109 = arith.constant 0 : index
    %244 = vector.load %arg7[%c1_107, %c0_108, %c0_109] : memref<2x1x384xf32, #tpu.memory_space<vmem>>, vector<1x1x384xf32>
    %245 = vector.shape_cast %244 : vector<1x1x384xf32> to vector<1x384xf32>
    %246 = vector.broadcast %245 : vector<1x384xf32> to vector<8x384xf32>
    %247 = arith.addf %243, %246 : vector<8x384xf32>
    %248 = arith.truncf %247 : vector<8x384xf32> to vector<8x384xbf16>
    %249 = vector.extract_strided_slice %248 {offsets = [0, 0], sizes = [8, 32], strides = [1, 1]} : vector<8x384xbf16> to vector<8x32xbf16>
    %250 = vector.extract_strided_slice %248 {offsets = [0, 128], sizes = [8, 32], strides = [1, 1]} : vector<8x384xbf16> to vector<8x32xbf16>
    %251 = vector.extract_strided_slice %248 {offsets = [0, 256], sizes = [8, 32], strides = [1, 1]} : vector<8x384xbf16> to vector<8x32xbf16>
    %cst_110 = arith.constant dense<0.000000e+00> : vector<8x8xf32>
    %252 = tpu.matmul %249, %250, %cst_110 {dimension_numbers = #tpu.dot_dimension_numbers<[1], [1], [0], [0], [0, 0, 1, 0], [], []>} : vector<8x32xbf16>, vector<8x32xbf16>, vector<8x8xf32> -> vector<8x8xf32>
    %cst_111 = arith.constant 0.176776692 : f32
    %253 = vector.broadcast %cst_111 : f32 to vector<8x8xf32>
    %254 = arith.mulf %252, %253 : vector<8x8xf32>
    %255 = vector.broadcast %11 : vector<1x8xf32> to vector<8x8xf32>
    %256 = arith.addf %254, %255 : vector<8x8xf32>
    %cst_112 = arith.constant dense<0xFF800000> : vector<8xf32>
    %257 = vector.multi_reduction <maximumf>, %256, %cst_112 [1] : vector<8x8xf32> to vector<8xf32>
    %258 = vector.shape_cast %257 : vector<8xf32> to vector<8x1xf32>
    %259 = vector.broadcast %258 : vector<8x1xf32> to vector<8x8xf32>
    %260 = arith.subf %256, %259 : vector<8x8xf32>
    %261 = math.exp %260 : vector<8x8xf32>
    %cst_113 = arith.constant dense<0.000000e+00> : vector<8xf32>
    %262 = vector.multi_reduction <add>, %261, %cst_113 [1] : vector<8x8xf32> to vector<8xf32>
    %263 = vector.shape_cast %262 : vector<8xf32> to vector<8x1xf32>
    %264 = tpu.reciprocal %263 {approx = true} : vector<8x1xf32> -> vector<8x1xf32>
    %265 = vector.broadcast %264 : vector<8x1xf32> to vector<8x8xf32>
    %266 = arith.mulf %261, %265 : vector<8x8xf32>
    %267 = arith.truncf %266 : vector<8x8xf32> to vector<8x8xbf16>
    %cst_114 = arith.constant dense<0.000000e+00> : vector<8x32xf32>
    %268 = tpu.matmul %267, %251, %cst_114 {dimension_numbers = #tpu.dot_dimension_numbers<[1], [0], [0], [1], [0, 0, 1, 1], [], []>} : vector<8x8xbf16>, vector<8x32xbf16>, vector<8x32xf32> -> vector<8x32xf32>
    %269 = vector.extract_strided_slice %248 {offsets = [0, 32], sizes = [8, 32], strides = [1, 1]} : vector<8x384xbf16> to vector<8x32xbf16>
    %270 = vector.extract_strided_slice %248 {offsets = [0, 160], sizes = [8, 32], strides = [1, 1]} : vector<8x384xbf16> to vector<8x32xbf16>
    %271 = vector.extract_strided_slice %248 {offsets = [0, 288], sizes = [8, 32], strides = [1, 1]} : vector<8x384xbf16> to vector<8x32xbf16>
    %cst_115 = arith.constant dense<0.000000e+00> : vector<8x8xf32>
    %272 = tpu.matmul %269, %270, %cst_115 {dimension_numbers = #tpu.dot_dimension_numbers<[1], [1], [0], [0], [0, 0, 1, 0], [], []>} : vector<8x32xbf16>, vector<8x32xbf16>, vector<8x8xf32> -> vector<8x8xf32>
    %cst_116 = arith.constant 0.176776692 : f32
    %273 = vector.broadcast %cst_116 : f32 to vector<8x8xf32>
    %274 = arith.mulf %272, %273 : vector<8x8xf32>
    %275 = vector.broadcast %11 : vector<1x8xf32> to vector<8x8xf32>
    %276 = arith.addf %274, %275 : vector<8x8xf32>
    %cst_117 = arith.constant dense<0xFF800000> : vector<8xf32>
    %277 = vector.multi_reduction <maximumf>, %276, %cst_117 [1] : vector<8x8xf32> to vector<8xf32>
    %278 = vector.shape_cast %277 : vector<8xf32> to vector<8x1xf32>
    %279 = vector.broadcast %278 : vector<8x1xf32> to vector<8x8xf32>
    %280 = arith.subf %276, %279 : vector<8x8xf32>
    %281 = math.exp %280 : vector<8x8xf32>
    %cst_118 = arith.constant dense<0.000000e+00> : vector<8xf32>
    %282 = vector.multi_reduction <add>, %281, %cst_118 [1] : vector<8x8xf32> to vector<8xf32>
    %283 = vector.shape_cast %282 : vector<8xf32> to vector<8x1xf32>
    %284 = tpu.reciprocal %283 {approx = true} : vector<8x1xf32> -> vector<8x1xf32>
    %285 = vector.broadcast %284 : vector<8x1xf32> to vector<8x8xf32>
    %286 = arith.mulf %281, %285 : vector<8x8xf32>
    %287 = arith.truncf %286 : vector<8x8xf32> to vector<8x8xbf16>
    %cst_119 = arith.constant dense<0.000000e+00> : vector<8x32xf32>
    %288 = tpu.matmul %287, %271, %cst_119 {dimension_numbers = #tpu.dot_dimension_numbers<[1], [0], [0], [1], [0, 0, 1, 1], [], []>} : vector<8x8xbf16>, vector<8x32xbf16>, vector<8x32xf32> -> vector<8x32xf32>
    %289 = vector.extract_strided_slice %248 {offsets = [0, 64], sizes = [8, 32], strides = [1, 1]} : vector<8x384xbf16> to vector<8x32xbf16>
    %290 = vector.extract_strided_slice %248 {offsets = [0, 192], sizes = [8, 32], strides = [1, 1]} : vector<8x384xbf16> to vector<8x32xbf16>
    %291 = vector.extract_strided_slice %248 {offsets = [0, 320], sizes = [8, 32], strides = [1, 1]} : vector<8x384xbf16> to vector<8x32xbf16>
    %cst_120 = arith.constant dense<0.000000e+00> : vector<8x8xf32>
    %292 = tpu.matmul %289, %290, %cst_120 {dimension_numbers = #tpu.dot_dimension_numbers<[1], [1], [0], [0], [0, 0, 1, 0], [], []>} : vector<8x32xbf16>, vector<8x32xbf16>, vector<8x8xf32> -> vector<8x8xf32>
    %cst_121 = arith.constant 0.176776692 : f32
    %293 = vector.broadcast %cst_121 : f32 to vector<8x8xf32>
    %294 = arith.mulf %292, %293 : vector<8x8xf32>
    %295 = vector.broadcast %11 : vector<1x8xf32> to vector<8x8xf32>
    %296 = arith.addf %294, %295 : vector<8x8xf32>
    %cst_122 = arith.constant dense<0xFF800000> : vector<8xf32>
    %297 = vector.multi_reduction <maximumf>, %296, %cst_122 [1] : vector<8x8xf32> to vector<8xf32>
    %298 = vector.shape_cast %297 : vector<8xf32> to vector<8x1xf32>
    %299 = vector.broadcast %298 : vector<8x1xf32> to vector<8x8xf32>
    %300 = arith.subf %296, %299 : vector<8x8xf32>
    %301 = math.exp %300 : vector<8x8xf32>
    %cst_123 = arith.constant dense<0.000000e+00> : vector<8xf32>
    %302 = vector.multi_reduction <add>, %301, %cst_123 [1] : vector<8x8xf32> to vector<8xf32>
    %303 = vector.shape_cast %302 : vector<8xf32> to vector<8x1xf32>
    %304 = tpu.reciprocal %303 {approx = true} : vector<8x1xf32> -> vector<8x1xf32>
    %305 = vector.broadcast %304 : vector<8x1xf32> to vector<8x8xf32>
    %306 = arith.mulf %301, %305 : vector<8x8xf32>
    %307 = arith.truncf %306 : vector<8x8xf32> to vector<8x8xbf16>
    %cst_124 = arith.constant dense<0.000000e+00> : vector<8x32xf32>
    %308 = tpu.matmul %307, %291, %cst_124 {dimension_numbers = #tpu.dot_dimension_numbers<[1], [0], [0], [1], [0, 0, 1, 1], [], []>} : vector<8x8xbf16>, vector<8x32xbf16>, vector<8x32xf32> -> vector<8x32xf32>
    %309 = vector.extract_strided_slice %248 {offsets = [0, 96], sizes = [8, 32], strides = [1, 1]} : vector<8x384xbf16> to vector<8x32xbf16>
    %310 = vector.extract_strided_slice %248 {offsets = [0, 224], sizes = [8, 32], strides = [1, 1]} : vector<8x384xbf16> to vector<8x32xbf16>
    %311 = vector.extract_strided_slice %248 {offsets = [0, 352], sizes = [8, 32], strides = [1, 1]} : vector<8x384xbf16> to vector<8x32xbf16>
    %cst_125 = arith.constant dense<0.000000e+00> : vector<8x8xf32>
    %312 = tpu.matmul %309, %310, %cst_125 {dimension_numbers = #tpu.dot_dimension_numbers<[1], [1], [0], [0], [0, 0, 1, 0], [], []>} : vector<8x32xbf16>, vector<8x32xbf16>, vector<8x8xf32> -> vector<8x8xf32>
    %cst_126 = arith.constant 0.176776692 : f32
    %313 = vector.broadcast %cst_126 : f32 to vector<8x8xf32>
    %314 = arith.mulf %312, %313 : vector<8x8xf32>
    %315 = vector.broadcast %11 : vector<1x8xf32> to vector<8x8xf32>
    %316 = arith.addf %314, %315 : vector<8x8xf32>
    %cst_127 = arith.constant dense<0xFF800000> : vector<8xf32>
    %317 = vector.multi_reduction <maximumf>, %316, %cst_127 [1] : vector<8x8xf32> to vector<8xf32>
    %318 = vector.shape_cast %317 : vector<8xf32> to vector<8x1xf32>
    %319 = vector.broadcast %318 : vector<8x1xf32> to vector<8x8xf32>
    %320 = arith.subf %316, %319 : vector<8x8xf32>
    %321 = math.exp %320 : vector<8x8xf32>
    %cst_128 = arith.constant dense<0.000000e+00> : vector<8xf32>
    %322 = vector.multi_reduction <add>, %321, %cst_128 [1] : vector<8x8xf32> to vector<8xf32>
    %323 = vector.shape_cast %322 : vector<8xf32> to vector<8x1xf32>
    %324 = tpu.reciprocal %323 {approx = true} : vector<8x1xf32> -> vector<8x1xf32>
    %325 = vector.broadcast %324 : vector<8x1xf32> to vector<8x8xf32>
    %326 = arith.mulf %321, %325 : vector<8x8xf32>
    %327 = arith.truncf %326 : vector<8x8xf32> to vector<8x8xbf16>
    %cst_129 = arith.constant dense<0.000000e+00> : vector<8x32xf32>
    %328 = tpu.matmul %327, %311, %cst_129 {dimension_numbers = #tpu.dot_dimension_numbers<[1], [0], [0], [1], [0, 0, 1, 1], [], []>} : vector<8x8xbf16>, vector<8x32xbf16>, vector<8x32xf32> -> vector<8x32xf32>
    %329 = tpu.concatenate %268, %288, %308, %328 in 1 : vector<8x32xf32>, vector<8x32xf32>, vector<8x32xf32>, vector<8x32xf32> -> vector<8x128xf32>
    %330 = arith.truncf %329 : vector<8x128xf32> to vector<8x128xbf16>
    %c1_130 = arith.constant 1 : index
    %c0_131 = arith.constant 0 : index
    %c0_132 = arith.constant 0 : index
    %331 = vector.load %arg8[%c1_130, %c0_131, %c0_132] : memref<2x128x128xbf16, #tpu.memory_space<vmem>>, vector<1x128x128xbf16>
    %332 = vector.shape_cast %331 : vector<1x128x128xbf16> to vector<128x128xbf16>
    %cst_133 = arith.constant dense<0.000000e+00> : vector<8x128xf32>
    %333 = tpu.matmul %330, %332, %cst_133 {dimension_numbers = #tpu.dot_dimension_numbers<[1], [0], [0], [1], [0, 0, 1, 1], [], []>} : vector<8x128xbf16>, vector<128x128xbf16>, vector<8x128xf32> -> vector<8x128xf32>
    %c1_134 = arith.constant 1 : index
    %c0_135 = arith.constant 0 : index
    %c0_136 = arith.constant 0 : index
    %334 = vector.load %arg9[%c1_134, %c0_135, %c0_136] : memref<2x1x128xf32, #tpu.memory_space<vmem>>, vector<1x1x128xf32>
    %335 = vector.shape_cast %334 : vector<1x1x128xf32> to vector<1x128xf32>
    %336 = vector.broadcast %335 : vector<1x128xf32> to vector<8x128xf32>
    %337 = arith.addf %333, %336 : vector<8x128xf32>
    %338 = arith.addf %215, %337 : vector<8x128xf32>
    %c1_137 = arith.constant 1 : index
    %c0_138 = arith.constant 0 : index
    %c0_139 = arith.constant 0 : index
    %339 = vector.load %arg10[%c1_137, %c0_138, %c0_139] : memref<2x1x128xf32, #tpu.memory_space<vmem>>, vector<1x1x128xf32>
    %340 = vector.shape_cast %339 : vector<1x1x128xf32> to vector<1x128xf32>
    %c1_140 = arith.constant 1 : index
    %c0_141 = arith.constant 0 : index
    %c0_142 = arith.constant 0 : index
    %341 = vector.load %arg11[%c1_140, %c0_141, %c0_142] : memref<2x1x128xf32, #tpu.memory_space<vmem>>, vector<1x1x128xf32>
    %342 = vector.shape_cast %341 : vector<1x1x128xf32> to vector<1x128xf32>
    %cst_143 = arith.constant dense<0.000000e+00> : vector<8xf32>
    %343 = vector.multi_reduction <add>, %338, %cst_143 [1] : vector<8x128xf32> to vector<8xf32>
    %344 = vector.shape_cast %343 : vector<8xf32> to vector<8x1xf32>
    %cst_144 = arith.constant 1.280000e+02 : f32
    %345 = vector.broadcast %cst_144 : f32 to vector<8x1xf32>
    %346 = arith.divf %344, %345 : vector<8x1xf32>
    %347 = vector.broadcast %346 : vector<8x1xf32> to vector<8x128xf32>
    %348 = arith.subf %338, %347 : vector<8x128xf32>
    %349 = arith.mulf %348, %348 : vector<8x128xf32>
    %cst_145 = arith.constant dense<0.000000e+00> : vector<8xf32>
    %350 = vector.multi_reduction <add>, %349, %cst_145 [1] : vector<8x128xf32> to vector<8xf32>
    %351 = vector.shape_cast %350 : vector<8xf32> to vector<8x1xf32>
    %cst_146 = arith.constant 1.280000e+02 : f32
    %352 = vector.broadcast %cst_146 : f32 to vector<8x1xf32>
    %353 = arith.divf %351, %352 : vector<8x1xf32>
    %cst_147 = arith.constant 9.99999997E-7 : f32
    %354 = vector.broadcast %cst_147 : f32 to vector<8x1xf32>
    %355 = arith.addf %353, %354 : vector<8x1xf32>
    %356 = math.rsqrt %355 : vector<8x1xf32>
    %357 = vector.broadcast %356 : vector<8x1xf32> to vector<8x128xf32>
    %358 = arith.mulf %348, %357 : vector<8x128xf32>
    %359 = vector.broadcast %340 : vector<1x128xf32> to vector<8x128xf32>
    %360 = arith.mulf %358, %359 : vector<8x128xf32>
    %361 = vector.broadcast %342 : vector<1x128xf32> to vector<8x128xf32>
    %362 = arith.addf %360, %361 : vector<8x128xf32>
    %363 = arith.truncf %362 : vector<8x128xf32> to vector<8x128xbf16>
    %c1_148 = arith.constant 1 : index
    %c0_149 = arith.constant 0 : index
    %c0_150 = arith.constant 0 : index
    %364 = vector.load %arg12[%c1_148, %c0_149, %c0_150] : memref<2x128x512xbf16, #tpu.memory_space<vmem>>, vector<1x128x512xbf16>
    %365 = vector.shape_cast %364 : vector<1x128x512xbf16> to vector<128x512xbf16>
    %cst_151 = arith.constant dense<0.000000e+00> : vector<8x512xf32>
    %366 = tpu.matmul %363, %365, %cst_151 {dimension_numbers = #tpu.dot_dimension_numbers<[1], [0], [0], [1], [0, 0, 1, 1], [], []>} : vector<8x128xbf16>, vector<128x512xbf16>, vector<8x512xf32> -> vector<8x512xf32>
    %c1_152 = arith.constant 1 : index
    %c0_153 = arith.constant 0 : index
    %c0_154 = arith.constant 0 : index
    %367 = vector.load %arg13[%c1_152, %c0_153, %c0_154] : memref<2x1x512xf32, #tpu.memory_space<vmem>>, vector<1x1x512xf32>
    %368 = vector.shape_cast %367 : vector<1x1x512xf32> to vector<1x512xf32>
    %369 = vector.broadcast %368 : vector<1x512xf32> to vector<8x512xf32>
    %370 = arith.addf %366, %369 : vector<8x512xf32>
    %cst_155 = arith.constant 5.000000e-01 : f32
    %371 = vector.broadcast %cst_155 : f32 to vector<8x512xf32>
    %372 = arith.mulf %371, %370 : vector<8x512xf32>
    %cst_156 = arith.constant 0.707106769 : f32
    %373 = vector.broadcast %cst_156 : f32 to vector<8x512xf32>
    %374 = arith.mulf %370, %373 : vector<8x512xf32>
    %375 = math.absf %374 : vector<8x512xf32>
    %cst_157 = arith.constant 0.327591091 : f32
    %376 = vector.broadcast %cst_157 : f32 to vector<8x512xf32>
    %377 = arith.mulf %376, %375 : vector<8x512xf32>
    %cst_158 = arith.constant 1.000000e+00 : f32
    %378 = vector.broadcast %cst_158 : f32 to vector<8x512xf32>
    %379 = arith.addf %378, %377 : vector<8x512xf32>
    %cst_159 = arith.constant 1.000000e+00 : f32
    %380 = vector.broadcast %cst_159 : f32 to vector<8x512xf32>
    %381 = arith.divf %380, %379 : vector<8x512xf32>
    %cst_160 = arith.constant 1.06140542 : f32
    %382 = vector.broadcast %cst_160 : f32 to vector<8x512xf32>
    %383 = arith.mulf %382, %381 : vector<8x512xf32>
    %cst_161 = arith.constant -1.45315206 : f32
    %384 = vector.broadcast %cst_161 : f32 to vector<8x512xf32>
    %385 = arith.addf %383, %384 : vector<8x512xf32>
    %386 = arith.mulf %385, %381 : vector<8x512xf32>
    %cst_162 = arith.constant 1.42141378 : f32
    %387 = vector.broadcast %cst_162 : f32 to vector<8x512xf32>
    %388 = arith.addf %386, %387 : vector<8x512xf32>
    %389 = arith.mulf %388, %381 : vector<8x512xf32>
    %cst_163 = arith.constant -0.284496725 : f32
    %390 = vector.broadcast %cst_163 : f32 to vector<8x512xf32>
    %391 = arith.addf %389, %390 : vector<8x512xf32>
    %392 = arith.mulf %391, %381 : vector<8x512xf32>
    %cst_164 = arith.constant 0.254829586 : f32
    %393 = vector.broadcast %cst_164 : f32 to vector<8x512xf32>
    %394 = arith.addf %392, %393 : vector<8x512xf32>
    %395 = arith.mulf %394, %381 : vector<8x512xf32>
    %396 = arith.mulf %375, %375 : vector<8x512xf32>
    %cst_165 = arith.constant 0.000000e+00 : f32
    %397 = vector.broadcast %cst_165 : f32 to vector<8x512xf32>
    %398 = arith.subf %397, %396 : vector<8x512xf32>
    %399 = math.exp %398 : vector<8x512xf32>
    %400 = arith.mulf %395, %399 : vector<8x512xf32>
    %cst_166 = arith.constant 1.000000e+00 : f32
    %401 = vector.broadcast %cst_166 : f32 to vector<8x512xf32>
    %402 = arith.subf %401, %400 : vector<8x512xf32>
    %cst_167 = arith.constant 0.000000e+00 : f32
    %403 = vector.broadcast %cst_167 : f32 to vector<8x512xf32>
    %404 = arith.cmpf olt, %374, %403 : vector<8x512xf32>
    %cst_168 = arith.constant 0.000000e+00 : f32
    %405 = vector.broadcast %cst_168 : f32 to vector<8x512xf32>
    %406 = arith.subf %405, %402 : vector<8x512xf32>
    %407 = arith.select %404, %406, %402 : vector<8x512xi1>, vector<8x512xf32>
    %cst_169 = arith.constant 1.000000e+00 : f32
    %408 = vector.broadcast %cst_169 : f32 to vector<8x512xf32>
    %409 = arith.addf %408, %407 : vector<8x512xf32>
    %410 = arith.mulf %372, %409 : vector<8x512xf32>
    %411 = arith.truncf %410 : vector<8x512xf32> to vector<8x512xbf16>
    %c1_170 = arith.constant 1 : index
    %c0_171 = arith.constant 0 : index
    %c0_172 = arith.constant 0 : index
    %412 = vector.load %arg14[%c1_170, %c0_171, %c0_172] : memref<2x512x128xbf16, #tpu.memory_space<vmem>>, vector<1x512x128xbf16>
    %413 = vector.shape_cast %412 : vector<1x512x128xbf16> to vector<512x128xbf16>
    %cst_173 = arith.constant dense<0.000000e+00> : vector<8x128xf32>
    %414 = tpu.matmul %411, %413, %cst_173 {dimension_numbers = #tpu.dot_dimension_numbers<[1], [0], [0], [1], [0, 0, 1, 1], [], []>} : vector<8x512xbf16>, vector<512x128xbf16>, vector<8x128xf32> -> vector<8x128xf32>
    %c1_174 = arith.constant 1 : index
    %c0_175 = arith.constant 0 : index
    %c0_176 = arith.constant 0 : index
    %415 = vector.load %arg15[%c1_174, %c0_175, %c0_176] : memref<2x1x128xf32, #tpu.memory_space<vmem>>, vector<1x1x128xf32>
    %416 = vector.shape_cast %415 : vector<1x1x128xf32> to vector<1x128xf32>
    %417 = vector.broadcast %416 : vector<1x128xf32> to vector<8x128xf32>
    %418 = arith.addf %414, %417 : vector<8x128xf32>
    %419 = arith.addf %338, %418 : vector<8x128xf32>
    %c0_177 = arith.constant 0 : index
    %c0_178 = arith.constant 0 : index
    %420 = vector.load %arg16[%c0_177, %c0_178] : memref<1x128xf32, #tpu.memory_space<vmem>>, vector<1x128xf32>
    %c0_179 = arith.constant 0 : index
    %c0_180 = arith.constant 0 : index
    %421 = vector.load %arg17[%c0_179, %c0_180] : memref<1x128xf32, #tpu.memory_space<vmem>>, vector<1x128xf32>
    %cst_181 = arith.constant dense<0.000000e+00> : vector<8xf32>
    %422 = vector.multi_reduction <add>, %419, %cst_181 [1] : vector<8x128xf32> to vector<8xf32>
    %423 = vector.shape_cast %422 : vector<8xf32> to vector<8x1xf32>
    %cst_182 = arith.constant 1.280000e+02 : f32
    %424 = vector.broadcast %cst_182 : f32 to vector<8x1xf32>
    %425 = arith.divf %423, %424 : vector<8x1xf32>
    %426 = vector.broadcast %425 : vector<8x1xf32> to vector<8x128xf32>
    %427 = arith.subf %419, %426 : vector<8x128xf32>
    %428 = arith.mulf %427, %427 : vector<8x128xf32>
    %cst_183 = arith.constant dense<0.000000e+00> : vector<8xf32>
    %429 = vector.multi_reduction <add>, %428, %cst_183 [1] : vector<8x128xf32> to vector<8xf32>
    %430 = vector.shape_cast %429 : vector<8xf32> to vector<8x1xf32>
    %cst_184 = arith.constant 1.280000e+02 : f32
    %431 = vector.broadcast %cst_184 : f32 to vector<8x1xf32>
    %432 = arith.divf %430, %431 : vector<8x1xf32>
    %cst_185 = arith.constant 9.99999997E-7 : f32
    %433 = vector.broadcast %cst_185 : f32 to vector<8x1xf32>
    %434 = arith.addf %432, %433 : vector<8x1xf32>
    %435 = math.rsqrt %434 : vector<8x1xf32>
    %436 = vector.broadcast %435 : vector<8x1xf32> to vector<8x128xf32>
    %437 = arith.mulf %427, %436 : vector<8x128xf32>
    %438 = vector.broadcast %420 : vector<1x128xf32> to vector<8x128xf32>
    %439 = arith.mulf %437, %438 : vector<8x128xf32>
    %440 = vector.broadcast %421 : vector<1x128xf32> to vector<8x128xf32>
    %441 = arith.addf %439, %440 : vector<8x128xf32>
    %442 = arith.truncf %441 : vector<8x128xf32> to vector<8x128xbf16>
    %c0_186 = arith.constant 0 : index
    %c0_187 = arith.constant 0 : index
    %443 = vector.load %arg18[%c0_186, %c0_187] : memref<128x128xbf16, #tpu.memory_space<vmem>>, vector<128x128xbf16>
    %cst_188 = arith.constant dense<0.000000e+00> : vector<8x128xf32>
    %444 = tpu.matmul %442, %443, %cst_188 {dimension_numbers = #tpu.dot_dimension_numbers<[1], [0], [0], [1], [0, 0, 1, 1], [], []>} : vector<8x128xbf16>, vector<128x128xbf16>, vector<8x128xf32> -> vector<8x128xf32>
    %c0_189 = arith.constant 0 : index
    %c0_190 = arith.constant 0 : index
    %445 = vector.load %arg19[%c0_189, %c0_190] : memref<1x128xf32, #tpu.memory_space<vmem>>, vector<1x128xf32>
    %446 = vector.broadcast %445 : vector<1x128xf32> to vector<8x128xf32>
    %447 = arith.addf %444, %446 : vector<8x128xf32>
    %c0_191 = arith.constant 0 : index
    %c0_192 = arith.constant 0 : index
    %c0_193 = arith.constant 0 : index
    %448 = vector.load %arg20[%c0_191, %c0_192, %c0_193] : memref<1x8x128xf32, #tpu.memory_space<vmem>>, vector<1x8x128xf32>
    %449 = vector.shape_cast %448 : vector<1x8x128xf32> to vector<8x128xf32>
    %450 = vector.shape_cast %447 : vector<8x128xf32> to vector<1x8x128xf32>
    tpu.vector_store %arg20[%c0_191, %c0_192, %c0_193], %450 {strides = array<i32>} : memref<1x8x128xf32, #tpu.memory_space<vmem>>, vector<1x8x128xf32>,
    return
  }
  func.func @transform_0(%arg0: i32) -> (i32, i32, i32) {
    %c0_i32 = arith.constant 0 : i32
    %c0_i32_0 = arith.constant 0 : i32
    %c0_i32_1 = arith.constant 0 : i32
    return %arg0, %c0_i32, %c0_i32_0 : i32, i32, i32
  }
  func.func @transform_1(%arg0: i32) -> (i32, i32) {
    %c0_i32 = arith.constant 0 : i32
    %c0_i32_0 = arith.constant 0 : i32
    %c0_i32_1 = arith.constant 0 : i32
    return %c0_i32, %c0_i32_0 : i32, i32
  }
  func.func @transform_2(%arg0: i32) -> (i32, i32) {
    %c0_i32 = arith.constant 0 : i32
    %c0_i32_0 = arith.constant 0 : i32
    %c0_i32_1 = arith.constant 0 : i32
    return %c0_i32, %c0_i32_0 : i32, i32
  }
  func.func @transform_3(%arg0: i32) -> (i32, i32, i32) {
    %c0_i32 = arith.constant 0 : i32
    %c0_i32_0 = arith.constant 0 : i32
    %c0_i32_1 = arith.constant 0 : i32
    %c0_i32_2 = arith.constant 0 : i32
    return %c0_i32, %c0_i32_0, %c0_i32_1 : i32, i32, i32
  }
  func.func @transform_4(%arg0: i32) -> (i32, i32, i32) {
    %c0_i32 = arith.constant 0 : i32
    %c0_i32_0 = arith.constant 0 : i32
    %c0_i32_1 = arith.constant 0 : i32
    %c0_i32_2 = arith.constant 0 : i32
    return %c0_i32, %c0_i32_0, %c0_i32_1 : i32, i32, i32
  }
  func.func @transform_5(%arg0: i32) -> (i32, i32, i32) {
    %c0_i32 = arith.constant 0 : i32
    %c0_i32_0 = arith.constant 0 : i32
    %c0_i32_1 = arith.constant 0 : i32
    %c0_i32_2 = arith.constant 0 : i32
    return %c0_i32, %c0_i32_0, %c0_i32_1 : i32, i32, i32
  }
  func.func @transform_6(%arg0: i32) -> (i32, i32, i32) {
    %c0_i32 = arith.constant 0 : i32
    %c0_i32_0 = arith.constant 0 : i32
    %c0_i32_1 = arith.constant 0 : i32
    %c0_i32_2 = arith.constant 0 : i32
    return %c0_i32, %c0_i32_0, %c0_i32_1 : i32, i32, i32
  }
  func.func @transform_7(%arg0: i32) -> (i32, i32, i32) {
    %c0_i32 = arith.constant 0 : i32
    %c0_i32_0 = arith.constant 0 : i32
    %c0_i32_1 = arith.constant 0 : i32
    %c0_i32_2 = arith.constant 0 : i32
    return %c0_i32, %c0_i32_0, %c0_i32_1 : i32, i32, i32
  }
  func.func @transform_8(%arg0: i32) -> (i32, i32, i32) {
    %c0_i32 = arith.constant 0 : i32
    %c0_i32_0 = arith.constant 0 : i32
    %c0_i32_1 = arith.constant 0 : i32
    %c0_i32_2 = arith.constant 0 : i32
    return %c0_i32, %c0_i32_0, %c0_i32_1 : i32, i32, i32
  }
  func.func @transform_9(%arg0: i32) -> (i32, i32, i32) {
    %c0_i32 = arith.constant 0 : i32
    %c0_i32_0 = arith.constant 0 : i32
    %c0_i32_1 = arith.constant 0 : i32
    %c0_i32_2 = arith.constant 0 : i32
    return %c0_i32, %c0_i32_0, %c0_i32_1 : i32, i32, i32
  }
  func.func @transform_10(%arg0: i32) -> (i32, i32, i32) {
    %c0_i32 = arith.constant 0 : i32
    %c0_i32_0 = arith.constant 0 : i32
    %c0_i32_1 = arith.constant 0 : i32
    %c0_i32_2 = arith.constant 0 : i32
    return %c0_i32, %c0_i32_0, %c0_i32_1 : i32, i32, i32
  }
  func.func @transform_11(%arg0: i32) -> (i32, i32, i32) {
    %c0_i32 = arith.constant 0 : i32
    %c0_i32_0 = arith.constant 0 : i32
    %c0_i32_1 = arith.constant 0 : i32
    %c0_i32_2 = arith.constant 0 : i32
    return %c0_i32, %c0_i32_0, %c0_i32_1 : i32, i32, i32
  }
  func.func @transform_12(%arg0: i32) -> (i32, i32, i32) {
    %c0_i32 = arith.constant 0 : i32
    %c0_i32_0 = arith.constant 0 : i32
    %c0_i32_1 = arith.constant 0 : i32
    %c0_i32_2 = arith.constant 0 : i32
    return %c0_i32, %c0_i32_0, %c0_i32_1 : i32, i32, i32
  }
  func.func @transform_13(%arg0: i32) -> (i32, i32, i32) {
    %c0_i32 = arith.constant 0 : i32
    %c0_i32_0 = arith.constant 0 : i32
    %c0_i32_1 = arith.constant 0 : i32
    %c0_i32_2 = arith.constant 0 : i32
    return %c0_i32, %c0_i32_0, %c0_i32_1 : i32, i32, i32
  }
  func.func @transform_14(%arg0: i32) -> (i32, i32, i32) {
    %c0_i32 = arith.constant 0 : i32
    %c0_i32_0 = arith.constant 0 : i32
    %c0_i32_1 = arith.constant 0 : i32
    %c0_i32_2 = arith.constant 0 : i32
    return %c0_i32, %c0_i32_0, %c0_i32_1 : i32, i32, i32
  }
  func.func @transform_15(%arg0: i32) -> (i32, i32) {
    %c0_i32 = arith.constant 0 : i32
    %c0_i32_0 = arith.constant 0 : i32
    %c0_i32_1 = arith.constant 0 : i32
    return %c0_i32, %c0_i32_0 : i32, i32
  }
  func.func @transform_16(%arg0: i32) -> (i32, i32) {
    %c0_i32 = arith.constant 0 : i32
    %c0_i32_0 = arith.constant 0 : i32
    %c0_i32_1 = arith.constant 0 : i32
    return %c0_i32, %c0_i32_0 : i32, i32
  }
  func.func @transform_17(%arg0: i32) -> (i32, i32) {
    %c0_i32 = arith.constant 0 : i32
    %c0_i32_0 = arith.constant 0 : i32
    %c0_i32_1 = arith.constant 0 : i32
    return %c0_i32, %c0_i32_0 : i32, i32
  }
  func.func @transform_18(%arg0: i32) -> (i32, i32) {
    %c0_i32 = arith.constant 0 : i32
    %c0_i32_0 = arith.constant 0 : i32
    %c0_i32_1 = arith.constant 0 : i32
    return %c0_i32, %c0_i32_0 : i32, i32
  }
  func.func @transform_19(%arg0: i32) -> (i32, i32, i32) {
    %c0_i32 = arith.constant 0 : i32
    %c0_i32_0 = arith.constant 0 : i32
    %c0_i32_1 = arith.constant 0 : i32
    return %arg0, %c0_i32, %c0_i32_0 : i32, i32, i32
  }
}

</mosaic_0001>

<bundles_post_ra>
// kernel: vit_forward.1
= control target key start
LH: loop header
LB: loop body
LE: loop exit
PB: predicated region body
PF: predicated region fallthrough
CT: control target
= control target key end

     0   :  { %s7069_s0 = inlined_call_operand.vmem [shape: bf16[2,8,768], index: 0, kind: input, shape index: {}]   ;;  %s7070_s1 = inlined_call_operand.hbm [shape: bf16[768,128], index: 1, kind: input, shape index: {}]   ;;  %s7071_s2 = inlined_call_operand.vmem [shape: f32[8,128], index: 2, kind: input, shape index: {}]   ;;  %s7072_s3 = inlined_call_operand.vmem [shape: f32[2,1,128], index: 3, kind: input, shape index: {}]   ;;  %s7073_s4 = inlined_call_operand.vmem [shape: f32[2,1,128], index: 4, kind: input, shape index: {}]   ;;  %s7074_s5 = inlined_call_operand.hbm [shape: bf16[2,128,384], index: 5, kind: input, shape index: {}]   ;;  %s7075_s6 = inlined_call_operand.vmem [shape: f32[2,1,384], index: 6, kind: input, shape index: {}]   ;;  %s7076_s7 = inlined_call_operand.vmem [shape: bf16[2,128,128], index: 7, kind: input, shape index: {}]   ;;  %s7077_s8 = inlined_call_operand.vmem [shape: f32[2,1,128], index: 8, kind: input, shape index: {}]   ;;  %s7078_s9 = inlined_call_operand.vmem [shape: f32[2,1,128], index: 9, kind: input, shape index: {}]   ;;  %s7079_s10 = inlined_call_operand.vmem [shape: f32[2,1,128], index: 10, kind: input, shape index: {}]   ;;  %s7080_s11 = inlined_call_operand.vmem [shape: bf16[2,128,512], index: 11, kind: input, shape index: {}]   ;;  %s7081_s12 = inlined_call_operand.vmem [shape: f32[2,1,512], index: 12, kind: input, shape index: {}]   ;;  %s7082_s13 = inlined_call_operand.vmem [shape: bf16[2,512,128], index: 13, kind: input, shape index: {}]   ;;  %s7083_s14 = inlined_call_operand.vmem [shape: f32[2,1,128], index: 14, kind: input, shape index: {}]   ;;  %s7084_s15 = inlined_call_operand.vmem [shape: f32[1,128], index: 15, kind: input, shape index: {}]   ;;  %s7085_s16 = inlined_call_operand.vmem [shape: f32[1,128], index: 16, kind: input, shape index: {}]   ;;  %s7086_s17 = inlined_call_operand.vmem [shape: bf16[128,128], index: 17, kind: input, shape index: {}]   ;;  %s7087_s18 = inlined_call_operand.vmem [shape: f32[1,128], index: 18, kind: input, shape index: {}]   ;;  %s7088_s19 = inlined_call_operand.vmem [shape: f32[2,8,128], index: 19, kind: output, shape index: {}]  }
   0x1   :  { %7094 = sst [smem:[#allocation9_spill]] %s7069_s0 }
   0x2   :  { %7095 = sst [smem:[#allocation10_spill]] %s7070_s1 }
   0x3   :  { %7096 = sst [smem:[#allocation11_spill]] %s7071_s2 }
   0x4   :  { %7097 = sst [smem:[#allocation12_spill]] %s7072_s3 }
   0x5   :  { %7098 = sst [smem:[#allocation13_spill]] %s7087_s18 }
   0x6   :  { %7099 = sst [smem:[#allocation14_spill]] %s7088_s19 }
   0x7   :  { %24 = vsyncpa [#allocation3], 0 }
   0x8   :  { %25 = vsyncpa [#allocation5], 0  ;;  %s6129_s0 = smov 0  }
   0x9 LB: > { %7100 = sst [smem:[#allocation8_spill]] %s6014_s0  ;;  %s6016_s30 = smov [#allocation2]   ;;  %s6014_s0 = sphi %s6129_s0, %s31_s0  }
   0xa   : > { %s478_s20 = sshll.u32 %s6016_s30, 4  ;;  %s6135_s21 = sadd.s32 4294967295, %s6014_s0   ;;  %s479_s20 = int_to_ptr.vmem [resolvable:$true] %s478_s20 }
   0xb   : > { %p4684_p0 = scmp.ge.s32.totalorder %s6014_s0, 1  ;;  %p466_p1 = scmp.lt.s32.totalorder %s6014_s0, 3 }
   0xc   : > { %p7091_p3 = scmp.eq.s32.totalorder %s6135_s21, 0  ;;  %s6017_s22 = smov [#allocation4]  }
   0xd   : > { %p6139_p2 = pnand %p4684_p0, %p466_p1  ;;  %s500_s2 = sshll.u32 %s6017_s22, 4  ;;  %s6152_s2 = int_to_ptr.vmem [resolvable:$true] %s500_s2 }
   0xe   : > { %s7103_s3 = sld [smem:[#allocation10_spill]] }
   0xf   : > { %s7101_s1 = scalar_select %p6139_p2, 1, 0 }
  0x10   : > { %p5536_p4 = pneg %p6139_p2 }
  0x12   : > { %p6148_p5 = pnand %p7091_p3, %p5536_p4 }
  0x14   : > { %s5944_s26 = scalar_lea.hbm %s7103_s3, 6144  ;;  %p5946_p7 = pneg %p6148_p5 }
  0x15   : > { %p5945_p6 = scmp.ne.s32.totalorder %s7103_s3, %s5944_s26  ;;  %p5951_p10 = scmp.lt.u32.totalorder %s5944_s26, %s7103_s3 }
  0x17   : > { %p5947_p8 = pnand %p5946_p7, %p5945_p6 }
  0x19   : > { %p5948_p9 = pneg %p5947_p8 }
  0x1b   : > { %p5953_p11 = pnand %p5951_p10, %p5948_p9 }
  0x1d   : > { %5956 = shalt.err (!%p5953_p11)
}
  0x1e   : > { %s5957_s22 = scalar_lea.vmem %s479_s20, 6144  ;;  %p5965_p1 = scmp.lt.s32.totalorder %s479_s20, %s479_s20 }
  0x1f   : > { %p5958_p12 = scmp.ne.s32.totalorder %s479_s20, %s5957_s22  ;;  %p5966_p4 = scmp.lt.s32.totalorder %s5957_s22, %s5957_s22 }
  0x21   : > { %p5960_p13 = pnand %p5958_p12, %p5946_p7  ;;  %p5967_p3 = por %p5966_p4, %p5965_p1 }
  0x23   : > { %p5961_p0 = pneg %p5960_p13 }
  0x25   : > { %p5968_p2 = pnand %p5967_p3, %p5961_p0 }
  0x27   : > { %5971 = shalt.err (!%p5968_p2)
}
  0x28   : > { %s6018_s24 = smov 64   ;;  %s6019_s25 = smov 4  }
  0x29   : > { %5539 = dma.hbm_to_vmem [thread:$0]  (!%p6148_p5), %s7103_s3, 6144, %s479_s20, [#allocation3], %s6018_s24, %s6018_s24, %s6019_s25  }
  0x2a   : > { %s5972_s30 = scalar_lea.hbm %s7074_s5, 6144 }
  0x2b   : > { %p5973_p6 = scmp.ne.s32.totalorder %s7074_s5, %s5972_s30  ;;  %p5979_p8 = scmp.lt.u32.totalorder %s5972_s30, %s7074_s5 }
  0x2d   : > { %p5975_p2 = pnand %p5973_p6, %p5946_p7 }
  0x2f   : > { %p5976_p3 = pneg %p5975_p2 }
  0x31   : > { %p5981_p9 = pnand %p5979_p8, %p5976_p3 }
  0x33   : > { %5984 = shalt.err (!%p5981_p9)
}
  0x34   : > { %s5985_s20 = scalar_lea.vmem %s6152_s2, 6144  ;;  %p5993_p13 = scmp.lt.s32.totalorder %s6152_s2, %s6152_s2 }
  0x35   : > { %p5986_p10 = scmp.ne.s32.totalorder %s6152_s2, %s5985_s20  ;;  %p5994_p0 = scmp.lt.s32.totalorder %s5985_s20, %s5985_s20 }
  0x37   : > { %p5988_p11 = pnand %p5986_p10, %p5946_p7  ;;  %p5995_p1 = por %p5994_p0, %p5993_p13 }
  0x39   : > { %p5989_p12 = pneg %p5988_p11 }
  0x3b   : > { %p5996_p4 = pnand %p5995_p1, %p5989_p12 }
  0x3d   : > { %5999 = shalt.err (!%p5996_p4)
}
  0x3e   : > { %s6020_s18 = smov 192   ;;  %s6021_s19 = smov 12  }
  0x3f   : > { %5542 = dma.hbm_to_vmem [thread:$0]  (!%p6148_p5), %s7074_s5, 6144, %s6152_s2, [#allocation5], %s6020_s18, %s6020_s18, %s6021_s19  }
  0x40   : > { %p7104_p6 = scmp.ne.s32.totalorder %s7101_s1, 0 }
  0x41   : > { %p7105_p7 = scmp.eq.s32.totalorder (!%p7104_p6), %s6135_s21, 0 }
  0x42   : > { %563 = sbr.rel (%p7104_p6) target bundleno = 6834 (0x1ab2), region = 96 }
  0x49   : > { %6005 = dma.done.wait (%p7105_p7), [#allocation3], 6144   ;;  %p7106_p2 = pmov %p7105_p7 }
  0x4b   : > { %6007 = vsyncadd (%p7106_p2), [#allocation3], 4294961152  ;;  %p7107_p3 = pmov %p7106_p2 }
  0x4c   : > { %p7108_p8 = pmov %p7106_p2 }
  0x4d   : > { %6009 = dma.done.wait (%p7107_p3), [#allocation5], 6144  }
  0x4e   : > { %6011 = vsyncadd (%p7108_p8), [#allocation5], 4294961152  ;;  %v5568_v0 = vld [vmem:[#allocation2 + $0x40] sm:$0xff]   ;;  %v5572_v4 = vld [vmem:[#allocation2 + $0x48] sm:$0xff]   ;;  %p622_p5 = scmp.lt.s32.totalorder %s6135_s21, 1  ;;  %s7109_s25 = sld [smem:[#allocation9_spill]] }
  0x4f   : > { %v5569_v1 = vld [vmem:[#allocation2] sm:$0xff]   ;;  %5100 = vmatprep.subr.bf16.mxu0 %v5568_v0  ;;  %v5573_v5 = vld [vmem:[#allocation2 + $0x8] sm:$0xff]   ;;  %v5576_v8 = vld [vmem:[#allocation2 + $0x50] sm:$0xff]   ;;  %s7110_s29 = sld [smem:[#allocation11_spill]]  ;;  %vm6024_vm0 = vmmov 0   ;;  %s7111_s20 = sld [smem:[#allocation12_spill]] }
  0x50   : > { %v5570_v2 = vld [vmem:[#allocation2 + $0xc0] sm:$0xff]   ;;  %5101 = vmatpush3.bf16.msra.mxu0 %v5569_v1  ;;  %v5574_v6 = vld [vmem:[#allocation2 + $0xc8] sm:$0xff]   ;;  %v5577_v9 = vld [vmem:[#allocation2 + $0x10] sm:$0xff]   ;;  %s7116_s21 = smov (!%p622_p5, %s6135_s21), 1  ;;  %vm1455_vm1 = vcmask 261120   ;;  %s6026_s2 = smov 32  }
  0x51   : > { %v5571_v3 = vld [vmem:[#allocation2 + $0x80] sm:$0xff]   ;;  %5122 = vmatprep.subr.bf16.mxu1 %v5570_v2  ;;  %5102 = vmatprep.subr.bf16.mxu0 %v5572_v4  ;;  %v5575_v7 = vld [vmem:[#allocation2 + $0x88] sm:$0xff]   ;;  %v5578_v10 = vld [vmem:[#allocation2 + $0xd0] sm:$0xff]   ;;  %s5527_s1 = smul.u32 24, %s7116_s21  ;;  %vm1520_vm2 = vcmask 1043456   ;;  %vm1504_vm4 = vcmask 64512  }
  0x52   : > { %5123 = vmatpush3.bf16.msra.mxu1 %v5571_v3  ;;  %v5579_v11 = vld [vmem:[#allocation2 + $0x90] sm:$0xff]   ;;  %v5580_v12 = vld [vmem:[#allocation2 + $0x58] sm:$0xff]   ;;  %v5584_v16 = vld [vmem:[#allocation2 + $0x60] sm:$0xff]   ;;  %s6028_s23 = smov 64   ;;  %vm1916_vm5 = vcmask 523264   ;;  %vm1918_vm6 = vcmask 785408  }
  0x53   : > { %5124 = vmatprep.subr.bf16.mxu1 %v5574_v6  ;;  %v5581_v13 = vld [vmem:[#allocation2 + $0x18] sm:$0xff]   ;;  %v5585_v17 = vld [vmem:[#allocation2 + $0x20] sm:$0xff]   ;;  %v5588_v20 = vld [vmem:[#allocation2 + $0x68] sm:$0xff]   ;;  %s7113_s18 = sld [smem:[#allocation14_spill]] }
  0x54   : > { %5103 = vmatpush3.bf16.msra.mxu0 %v5573_v5  ;;  %v5582_v14 = vld [vmem:[#allocation2 + $0xd8] sm:$0xff]   ;;  %v5586_v18 = vld [vmem:[#allocation2 + $0xe0] sm:$0xff]   ;;  %v5589_v21 = vld [vmem:[#allocation2 + $0x28] sm:$0xff]   ;;  %s6219_s26 = scalar_lea.vmem %s7109_s25, %s5527_s1  ;;  %s6025_s1 = smov 96  }
  0x55   : > { %5104 = vmatprep.subr.bf16.mxu0 %v5576_v8  ;;  %v5583_v15 = vld [vmem:[#allocation2 + $0x98] sm:$0xff]   ;;  %v5587_v19 = vld [vmem:[#allocation2 + $0xa0] sm:$0xff]   ;;  %v5590_v22 = vld [vmem:[#allocation2 + $0xe8] sm:$0xff]  }
  0x56   : > { %5125 = vmatpush3.bf16.msra.mxu1 %v5575_v7  ;;  %v5591_v23 = vld [vmem:[#allocation2 + $0xa8] sm:$0xff]   ;;  %v5592_v24 = vld [vmem:[#allocation2 + $0x70] sm:$0xff]   ;;  %v5596_v28 = vld [vmem:[#allocation2 + $0x78] sm:$0xff]  }
  0x57   : > { %5126 = vmatprep.subr.bf16.mxu1 %v5578_v10  ;;  %v5593_v25 = vld [vmem:[#allocation2 + $0x30] sm:$0xff]   ;;  %v5597_v29 = vld [vmem:[#allocation2 + $0x38] sm:$0xff]   ;;  %v632_v31 = vld [vmem:[%s6219_s26] sm:$0xff] }
  0x58   : > { %5105 = vmatpush3.bf16.msra.mxu0 %v5577_v9  ;;  %v5594_v26 = vld [vmem:[#allocation2 + $0xf0] sm:$0xff]   ;;  %v5598_v30 = vld [vmem:[#allocation2 + $0xf8] sm:$0xff]   ;;  %v4693_v32 = vcombine.low %v632_v31, %v632_v31  ;;  %v4694_v33 = vcombine.high %v632_v31, %v632_v31  ;;  %v5602_v35 = vld [vmem:[#allocation2 + $0x140] sm:$0xff]  }
  0x59   : > { %5106 = vmatprep.subr.bf16.mxu0 %v5580_v12  ;;  %v5595_v27 = vld [vmem:[#allocation2 + $0xb0] sm:$0xff]   ;;  %v5601_v34 = vld [vmem:[#allocation2 + $0xb8] sm:$0xff]   ;;  %v633_v36 = vld [vmem:[%s6219_s26 + $0x8] sm:$0xff] }
  0x5a   : > { %5127 = vmatpush3.bf16.msra.mxu1 %v5579_v11  ;;  %1073 = vmatprep.mubr.bf16.mxu0 %v4694_v33  ;;  %v4695_v37 = vcombine.low %v633_v36, %v633_v36  ;;  %v4696_v38 = vcombine.high %v633_v36, %v633_v36  ;;  %v5605_v39 = vld [vmem:[#allocation2 + $0x100] sm:$0xff]   ;;  %v5606_v40 = vld [vmem:[#allocation2 + $0x148] sm:$0xff]   ;;  %v5608_v42 = vld [vmem:[#allocation2 + $0x150] sm:$0xff]   ;;  %v6023_v36 = vmov 0  }
  0x5b   : > { %5128 = vmatprep.subr.bf16.mxu1 %v5582_v14  ;;  %v5607_v41 = vld [vmem:[#allocation2 + $0x108] sm:$0xff]   ;;  %v5609_v43 = vld [vmem:[#allocation2 + $0x110] sm:$0xff]   ;;  %v5610_v44 = vld [vmem:[#allocation2 + $0x158] sm:$0xff]   ;;  %v6022_v14 = vmov 0.0  }
  0x5c   : > { %5107 = vmatpush3.bf16.msra.mxu0 %v5581_v13  ;;  %1113 = vmatprep.mubr.bf16.mxu1 %v4696_v38  ;;  %v5611_v45 = vld [vmem:[#allocation2 + $0x118] sm:$0xff]   ;;  %v5612_v46 = vld [vmem:[#allocation2 + $0x160] sm:$0xff]   ;;  %v5614_v48 = vld [vmem:[#allocation2 + $0x168] sm:$0xff]  }
  0x5d   : > { %5108 = vmatprep.subr.bf16.mxu0 %v5584_v16  ;;  %v5613_v47 = vld [vmem:[#allocation2 + $0x120] sm:$0xff]   ;;  %v634_v49 = vld [vmem:[%s6219_s26 + $0x10] sm:$0xff]  ;;  %v5615_v51 = vld [vmem:[#allocation2 + $0x128] sm:$0xff]   ;;  %s4692_s26 = sshll.u32 %s7116_s21, 3 }
  0x5e   : > { %5129 = vmatpush3.bf16.msra.mxu1 %v5583_v15  ;;  %v4698_v50 = vcombine.high %v634_v49, %v634_v49  ;;  %v5616_v52 = vld [vmem:[#allocation2 + $0x170] sm:$0xff]   ;;  %v5618_v54 = vld [vmem:[#allocation2 + $0x178] sm:$0xff]   ;;  %v4697_v56 = vcombine.low %v634_v49, %v634_v49  ;;  %v731_v58 = vld [vmem:[%s7110_s29] sm:$0xff]  ;;  %s7112_s29 = sld [smem:[#allocation13_spill]]  ;;  %s630_s19 = scalar_lea.vmem %s7113_s18, %s4692_s26 }
  0x5f   : > { %5130 = vmatprep.subr.bf16.mxu1 %v5586_v18  ;;  %v5617_v53 = vld [vmem:[#allocation2 + $0x130] sm:$0xff]   ;;  %v5619_v55 = vld [vmem:[#allocation2 + $0x138] sm:$0xff]   ;;  %v5622_v12 = vld [vmem:[#allocation4] ss:$12 sps:$4 sm:$0xff]  }
  0x60   : > { %5109 = vmatpush3.bf16.msra.mxu0 %v5585_v17  ;;  %v5624_v13 = vld [vmem:[#allocation4 + $0x4] ss:$12 sps:$4 sm:$0xff]   ;;  %v5625_v15 = vld [vmem:[#allocation4 + $0x8] ss:$12 sps:$4 sm:$0xff]   ;;  %v5629_v18 = vld [vmem:[#allocation4 + $0x20] ss:$12 sps:$4 sm:$0xff]  }
  0x61   : > { %5110 = vmatprep.subr.bf16.mxu0 %v5588_v20  ;;  %v5628_v16 = vld [vmem:[#allocation4 + $0x1c] ss:$12 sps:$4 sm:$0xff]   ;;  %v5626_v17 = vld [vmem:[#allocation4 + $0x18] ss:$12 sps:$4 sm:$0xff]  }
  0x62   : > { %5131 = vmatpush3.bf16.msra.mxu1 %v5587_v19  ;;  %v5632_v19 = vld [vmem:[#allocation4 + $0x34] ss:$12 sps:$4 sm:$0xff]   ;;  %v5630_v20 = vld [vmem:[#allocation4 + $0x30] ss:$12 sps:$4 sm:$0xff]   ;;  %v5642_v33 = vld [vmem:[#allocation4 + $0x78] ss:$12 sps:$4 sm:$0xff]  }
  0x63   : > { %5132 = vmatprep.subr.bf16.mxu1 %v5590_v22  ;;  %v5641_v31 = vld [vmem:[#allocation4 + $0x68] ss:$12 sps:$4 sm:$0xff]   ;;  %v5649_v38 = vld [vmem:[#allocation4 + $0x98] ss:$12 sps:$4 sm:$0xff]  }
  0x64   : > { %5111 = vmatpush3.bf16.msra.mxu0 %v5589_v21 }
  0x65   : > { %5112 = vmatprep.subr.bf16.mxu0 %v5592_v24 }
  0x66   : > { %5133 = vmatpush3.bf16.msra.mxu1 %v5591_v23 }
  0x67   : > { %5134 = vmatprep.subr.bf16.mxu1 %v5594_v26  ;;  %v5636_v26 = vld [vmem:[#allocation4 + $0x4c] ss:$12 sps:$4 sm:$0xff]  }
  0x68   : > { %5113 = vmatpush3.bf16.msra.mxu0 %v5593_v25  ;;  %v5633_v25 = vld [vmem:[#allocation4 + $0x38] ss:$12 sps:$4 sm:$0xff]  }
  0x69   : > { %5114 = vmatprep.subr.bf16.mxu0 %v5596_v28  ;;  %v5637_v28 = vld [vmem:[#allocation4 + $0x50] ss:$12 sps:$4 sm:$0xff]  }
  0x6a   : > { %5135 = vmatpush3.bf16.msra.mxu1 %v5595_v27  ;;  %v5634_v27 = vld [vmem:[#allocation4 + $0x48] ss:$12 sps:$4 sm:$0xff]  }
  0x6b   : > { %5136 = vmatprep.subr.bf16.mxu1 %v5598_v30  ;;  %v5640_v30 = vld [vmem:[#allocation4 + $0x64] ss:$12 sps:$4 sm:$0xff]  }
  0x6c   : > { %5115 = vmatpush3.bf16.msra.mxu0 %v5597_v29  ;;  %v5638_v29 = vld [vmem:[#allocation4 + $0x60] ss:$12 sps:$4 sm:$0xff]  }
  0x6d   : > { %5144 = vmatprep.subr.bf16.mxu0 %v5602_v35  ;;  %v5648_v35 = vld [vmem:[#allocation4 + $0x94] ss:$12 sps:$4 sm:$0xff]  }
  0x6e   : > { %5137 = vmatpush3.bf16.msra.mxu1 %v5601_v34  ;;  %v5645_v34 = vld [vmem:[#allocation4 + $0x80] ss:$12 sps:$4 sm:$0xff]  }
  0x6f   : > { %1074 = vmatmul.mubr.bf16.vlgmr.msra.gmra.mrb[0].mxu0 %v4693_v32  ;;  %1371 = vmatprep.subr.bf16.mxu1 %v5624_v13  ;;  %v5644_v32 = vld [vmem:[#allocation4 + $0x7c] ss:$12 sps:$4 sm:$0xff]  }
  0x70   : > { %5145 = vmatpush3.bf16.msra.mxu0 %v5605_v39  ;;  %1153 = vmatprep.mubr.bf16.mxu0 %v4698_v50  ;;  %v5652_v39 = vld [vmem:[#allocation4 + $0xac] ss:$12 sps:$4 sm:$0xff]  }
  0x71   : > { %1114 = vmatmul.mubr.bf16.vlgmr.msra.gmra.mrb[0].mxu1 %v4695_v37  ;;  %5146 = vmatprep.subr.bf16.mxu0 %v5606_v40  ;;  %v5646_v37 = vld [vmem:[#allocation4 + $0x90] ss:$12 sps:$4 sm:$0xff]   ;;  %v5650_v40 = vld [vmem:[#allocation4 + $0xa8] ss:$12 sps:$4 sm:$0xff]  }
  0x72   : > { %1372 = vmatpush1.bf16.msra.mxu1 %v5622_v12  ;;  %1403 = vmatprep.mubr.bf16.mxu1 %v6023_v36 }
  0x73   : > { %1373 = vmatprep.subr.bf16.mxu1 %v5628_v16 }
  0x74   : > { %5147 = vmatpush3.bf16.msra.mxu0 %v5607_v41  ;;  %v5653_v41 = vld [vmem:[#allocation4 + $0xb0] ss:$12 sps:$4 sm:$0xff]  }
  0x75   : > { %5148 = vmatprep.subr.bf16.mxu0 %v5608_v42 }
  0x76   : > { %1374 = vmatpush1.bf16.msra.mxu1 %v5626_v17  ;;  %v6027_v17 = vmov -1e+30  }
  0x77   : > { %1375 = vmatprep.subr.bf16.mxu1 %v5632_v19 }
  0x78   : > { %5149 = vmatpush3.bf16.msra.mxu0 %v5609_v43 }
  0x79   : > { %5150 = vmatprep.subr.bf16.mxu0 %v5610_v44 }
  0x7a   : > { %1376 = vmatpush1.bf16.msra.mxu1 %v5630_v20 }
  0x7b   : > { %1377 = vmatprep.subr.bf16.mxu1 %v5636_v26 }
  0x7c   : > { %5151 = vmatpush3.bf16.msra.mxu0 %v5611_v45 }
  0x7d   : > { %5152 = vmatprep.subr.bf16.mxu0 %v5612_v46  ;;  %v4747_v46 = vld [vmem:[%s7111_s20] ss:$0 sm:$0xff] }
  0x7e   : > { %1378 = vmatpush1.bf16.msra.mxu1 %v5634_v27 }
  0x7f   : > { %1379 = vmatprep.subr.bf16.mxu1 %v5640_v30 }
  0x80   : > { %5153 = vmatpush3.bf16.msra.mxu0 %v5613_v47 }
  0x81   : > { %5154 = vmatprep.subr.bf16.mxu0 %v5614_v48  ;;  %v4748_v48 = vld [vmem:[%s7073_s4] ss:$0 sm:$0xff] }
  0x82   : > { %1380 = vmatpush1.bf16.msra.mxu1 %v5638_v29 }
  0x83   : > { %1381 = vmatprep.subr.bf16.mxu1 %v5644_v32 }
  0x84   : > { %5155 = vmatpush3.bf16.msra.mxu0 %v5615_v51 }
  0x85   : > { %5156 = vmatprep.subr.bf16.mxu0 %v5616_v52  ;;  %v1161_v52 = vlaneseq }
  0x86   : > { %1382 = vmatpush1.bf16.msra.mxu1 %v5642_v33 }
  0x87   : > { %1383 = vmatprep.subr.bf16.mxu1 %v5648_v35 }
  0x88   : > { %5157 = vmatpush3.bf16.msra.mxu0 %v5617_v53  ;;  %v6254_v53 = vshrl.u32 %v1161_v52, 7 }
  0x89   : > { %5158 = vmatprep.subr.bf16.mxu0 %v5618_v54 }
  0x8a   : > { %1384 = vmatpush1.bf16.msra.mxu1 %v5646_v37  ;;  %v6257_v54 = vsub.s32 1, %v6254_v53 }
  0x8b   : > { %1385 = vmatprep.subr.bf16.mxu1 %v5652_v39 }
  0x8c   : > { %5159 = vmatpush3.bf16.msra.mxu0 %v5619_v55  ;;  %v1226_v55 = vld [vmem:[%s7075_s6] sm:$0x7] }
  0x8d   : > { %5331 = vmatprep.subr.bf16.mxu0 %v6022_v14 }
  0x8e   : > { %1386 = vmatpush1.bf16.msra.mxu1 %v5650_v40 }
  0x8f   : > { %1154 = vmatmul.mubr.bf16.vlgmr.msra.gmra.mrb[4].mxu0 %v4697_v56  ;;  %5351 = vmatprep.subr.bf16.mxu1 %v6022_v14  ;;  %v6263_v56 = vsub.s32 2, %v6254_v53 }
  0x90   : > { %5332 = vmatpush3.bf16.msra.mxu0 %v5625_v15  ;;  %5347 = vmatprep.mubr.msk.bf16.mxu0 %vm6024_vm0, %v6022_v14  ;;  %v1162_v15 = vand.u32 127, %v1161_v52 }
  0x91   : > { %5333 = vmatprep.subr.bf16.mxu0 %v6022_v14 }
  0x92   : > { %vm1163_vm3 = vcmp.lt.s32.totalorder %v1162_v15, 5 }
  0x94   : > { %5334 = vmatpush3.bf16.msra.mxu0 %v5629_v18  ;;  %v6283_v18 = vsel %vm1163_vm3, 0.0, %v6027_v17 }
  0x95   : > { %5335 = vmatprep.subr.bf16.mxu0 %v6022_v14 }
  0x98   : > { %5336 = vmatpush3.bf16.msra.mxu0 %v5633_v25 }
  0x99   : > { %5337 = vmatprep.subr.bf16.mxu0 %v6022_v14 }
  0x9c   : > { %5338 = vmatpush3.bf16.msra.mxu0 %v5637_v28 }
  0x9d   : > { %5339 = vmatprep.subr.bf16.mxu0 %v6022_v14 }
  0xa0   : > { %5340 = vmatpush3.bf16.msra.mxu0 %v5641_v31 }
  0xa1   : > { %5341 = vmatprep.subr.bf16.mxu0 %v6022_v14 }
  0xa4   : > { %5342 = vmatpush3.bf16.msra.mxu0 %v5645_v34 }
  0xa5   : > { %5343 = vmatprep.subr.bf16.mxu0 %v6022_v14 }
  0xa8   : > { %5344 = vmatpush3.bf16.msra.mxu0 %v5649_v38 }
  0xa9   : > { %5345 = vmatprep.subr.bf16.mxu0 %v6022_v14 }
  0xac   : > { %5346 = vmatpush3.bf16.msra.mxu0 %v5653_v41 }
  0xad   : > { %5375 = vmatprep.subr.bf16.mxu0 %v6022_v14 }
 0x142   : > { %v5116_v57 = vpop.f32.mrb[0].mxu0 }
 0x143   : > { %v5117_v59 = vpop.f32.mrb[1].mxu0 }
 0x144   : > { %v5118_v60 = vadd.f32 %v5117_v59, %v5116_v57  ;;  %v5119_v61 = vpop.f32.mrb[2].mxu0  ;;  %v5138_v62 = vpop.f32.mrb[0].mxu1  ;;  %v1235_v57 = vrot.slane %v1226_v55, %v6257_v54 }
 0x145   : > { %v5120_v63 = vpop.f32.mrb[3].mxu0  ;;  %v5139_v0 = vpop.f32.mrb[1].mxu1 }
 0x146   : > { %v1076_v1 = vadd.f32 %v5118_v60, %v731_v58  ;;  %v5140_v2 = vadd.f32 %v5139_v0, %v5138_v62  ;;  %v5141_v3 = vpop.f32.mrb[2].mxu1  ;;  %v6267_v58 = vsub.s32 0, %v6254_v53  ;;  %v1239_v63 = vrot.slane %v1226_v55, %v6263_v56 }
 0x147   : > { %v5142_v4 = vpop.f32.mrb[3].mxu1 }
 0x148   : > { %v1116_v5 = vadd.f32 %v5140_v2, %v1076_v1 }
 0x162   : > { %v5160_v6 = vpop.f32.mrb[4].mxu0 }
 0x163   : > { %v5161_v7 = vpop.f32.mrb[5].mxu0 }
 0x164   : > { %v5162_v8 = vadd.f32 %v5161_v7, %v5160_v6  ;;  %v5163_v9 = vpop.f32.mrb[6].mxu0 }
 0x165   : > { %v5164_v10 = vpop.f32.mrb[7].mxu0 }
 0x166   : > { %v6227_v11 = vadd.f32 %v5162_v8, %v1116_v5  ;;  %v1231_v5 = vrot.slane %v1226_v55, %v6267_v58 }
 0x168   : > { %1167 = vadd.xlane.f32.xlu0 %v6227_v11 }
 0x1f5   : > { %v1168_v21 = vpop.xlane.xlu0 %1167 }
 0x1f6   : > { %v1170_v22 = vmul.f32 0.0078125, %v1168_v21 }
 0x1f8   : > { %v1171_v23 = vsub.f32 %v6227_v11, %v1170_v22 }
 0x1fa   : > { %v1172_v24 = vmul.f32 %v1171_v23, %v1171_v23 }
 0x1fc   : > { %1173 = vadd.xlane.f32.xlu0 %v1172_v24 }
 0x289   : > { %v1174_v42 = vpop.xlane.xlu0 %1173 }
 0x28a   : > { %v1175_v43 = vmul.f32 0.0078125, %v1174_v42 }
 0x28c   : > { %v1176_v44 = vadd.f32 1e-06, %v1175_v43 }
 0x28e   : > { %5870 = vrsqrt.f32 %v1176_v44 }
 0x298   : > { %v5871_v45 = vpop.eup %5870 }
 0x299   : > { %v1178_v47 = vmul.f32 %v5871_v45, %v1171_v23 }
 0x29b   : > { %v1185_v49 = vmul.f32 %v4747_v46, %v1178_v47 }
 0x29d   : > { %v1192_v50 = vadd.f32 %v4748_v48, %v1185_v49 }
 0x29f   : > { %v1193_v51 = vpack.c.bf16 %v1192_v50, %v1192_v50 }
 0x2a1   : > { %1404 = vmatmul.mubr.bf16.vlgmr.msra.gmra.mrb[4].mxu1 %v1193_v51  ;;  %5348 = vmatmul.mubr.bf16.vlgmr.msra.gmra.mrb[8].mxu0 %v1193_v51 }
 0x2a2   : > { %5353 = vmatprep.mubr.msk.bf16.mxu1 %vm6024_vm0, %v6022_v14  ;;  %5377 = vmatprep.mubr.msk.bf16.mxu0 %vm6024_vm0, %v6022_v14 }
 0x374   : > { %v1405_v59 = vpop.f32.mrb[4].mxu1  ;;  %v1446_v60 = vpop.f32.mrb[8].mxu0 }
 0x375   : > { %v1407_v61 = vpop.f32.mrb[5].mxu1  ;;  %v5349_v62 = vpop.f32.mrb[9].mxu0  ;;  %v1447_v7 = vadd.f32 %v1446_v60, %v1239_v63  ;;  %v1406_v9 = vadd.f32 %v1405_v59, %v1231_v5 }
 0x376   : > { %v1408_v0 = vadd.f32 %v1407_v61, %v1235_v57  ;;  %v1409_v1 = vpop.f32.mrb[6].mxu1  ;;  %v1449_v2 = vpop.f32.mrb[10].mxu0 }
 0x377   : > { %v1410_v3 = vpop.f32.mrb[7].mxu1  ;;  %v5350_v4 = vpop.f32.mrb[11].mxu0  ;;  %v6274_v10 = vpack.c.bf16 %v1447_v7, %v1447_v7  ;;  %v1452_v12 = vpack.c.bf16 %v1406_v9, %v1406_v9 }
 0x378   : > { %v1453_v6 = vpack.c.bf16 %v1408_v0, %v1408_v0 }
 0x379   : > { %v1522_v13 = vsel %vm1520_vm2, %v6274_v10, 0 }
 0x37a   : > { %1568 = vrot.lane.b32.xlu0 %v1453_v6, %s6025_s1  ;;  %v1460_v8 = vsel %vm1455_vm1, %v1453_v6, 0 }
 0x37b   : > { %5352 = vmatpush3.bf16.xpose.msra.mxu1 %v1460_v8 }
 0x37c   : > { %5357 = vmatprep.subr.bf16.mxu1 %v6022_v14 }
 0x37e   : > { %1793 = vrot.lane.b32.xlu0 %v1453_v6, %s6026_s2 }
 0x382   : > { %5354 = vmatmul.mubr.msk.bf16.vlgmr.msra.gmra.mrb[8].mxu1 %vm1455_vm1, %v1452_v12 }
 0x383   : > { %5358 = vmatpush3.bf16.msra.mxu1 %v1522_v13  ;;  %5359 = vmatprep.mubr.msk.bf16.mxu1 %vm6024_vm0, %v6022_v14 }
 0x384   : > { %5363 = vmatprep.subr.bf16.mxu1 %v6022_v14 }
 0x3ec   : > { %v1569_v32 = vpop.permute.xlu0 %1568 }
 0x3ed   : > { %v1574_v40 = vsel %vm1455_vm1, %v1569_v32, 0 }
 0x3f0   : > { %v1794_v38 = vpop.permute.xlu0 %1793 }
 0x3f1   : > { %v1799_v42 = vsel %vm1455_vm1, %v1794_v38, 0 }
 0x455   : > { %v1496_v16 = vpop.f32.mrb[8].mxu1 }
 0x456   : > { %v1502_v19 = vmul.f32 0.17677669, %v1496_v16  ;;  %v5355_v20 = vpop.f32.mrb[9].mxu1 }
 0x457   : > { %v1499_v21 = vpop.f32.mrb[10].mxu1 }
 0x458   : > { %v5356_v22 = vpop.f32.mrb[11].mxu1  ;;  %v1503_v23 = vadd.f32 %v1502_v19, %v6283_v18 }
 0x45a   : > { %v1505_v24 = vsel %vm1504_vm4, %v1503_v23, -inf }
 0x45b   : > { %1506 = vmax.xlane.f32.xlu1 %v1505_v24 }
 0x4e8   : > { %v1507_v25 = vpop.xlane.xlu1 %1506 }
 0x4e9   : > { %v1508_v26 = vsub.f32 %v1503_v23, %v1507_v25 }
 0x4eb   : > { %v1509_v27 = vmul.f32 1.442695, %v1508_v26 }
 0x4ed   : > { %5872 = vpow2.f32 %v1509_v27 }
 0x4f7   : > { %v5873_v28 = vpop.eup %5872 }
 0x4f8   : > { %v1511_v29 = vsel %vm1504_vm4, %v5873_v28, 0.0 }
 0x4f9   : > { %1512 = vadd.xlane.f32.xlu1 %v1511_v29 }
 0x50a   : > { %1565 = vrot.lane.b32.xlu1 %v1452_v12, %s6025_s1 }
 0x50e   : > { %1681 = vrot.lane.b32.xlu1 %v1453_v6, %s6028_s23 }
 0x512   : > { %1679 = vrot.lane.b32.xlu1 %v1452_v12, %s6028_s23 }
 0x516   : > { %1791 = vrot.lane.b32.xlu1 %v1452_v12, %s6026_s2 }
 0x586   : > { %v1513_v30 = vpop.xlane.xlu1 %1512 }
 0x587   : > { %5874 = vrcp.f32 %v1513_v30 }
 0x58a   : > { %v1566_v31 = vpop.permute.xlu1 %1565 }
 0x58e   : > { %v1682_v33 = vpop.permute.xlu1 %1681 }
 0x58f   : > { %v1687_v34 = vsel %vm1455_vm1, %v1682_v33, 0 }
 0x590   : > { %5376 = vmatpush3.bf16.xpose.msra.mxu0 %v1687_v34 }
 0x591   : > { %v5875_v35 = vpop.eup %5874  ;;  %5387 = vmatprep.subr.bf16.mxu0 %v6022_v14 }
 0x592   : > { %v1515_v37 = vmul.f32 %v5875_v35, %v5873_v28  ;;  %v1680_v41 = vpop.permute.xlu1 %1679 }
 0x594   : > { %v1516_v39 = vpack.c.bf16 %v1515_v37, %v1515_v37 }
 0x596   : > { %5360 = vmatmul.mubr.msk.bf16.vlgmr.msra.gmra.mrb[12].mxu1 %vm1504_vm4, %v1516_v39  ;;  %v1792_v43 = vpop.permute.xlu1 %1791 }
 0x597   : > { %5364 = vmatpush3.bf16.xpose.msra.mxu1 %v1574_v40  ;;  %5378 = vmatmul.mubr.msk.bf16.vlgmr.msra.gmra.mrb[12].mxu0 %vm1455_vm1, %v1680_v41 }
 0x598   : > { %5388 = vmatpush3.bf16.xpose.msra.mxu0 %v1799_v42  ;;  %5365 = vmatprep.mubr.msk.bf16.mxu1 %vm6024_vm0, %v6022_v14 }
 0x599   : > { %5389 = vmatprep.mubr.msk.bf16.mxu0 %vm6024_vm0, %v6022_v14  ;;  %5369 = vmatprep.subr.bf16.mxu1 %v6022_v14 }
 0x59a   : > { %5399 = vmatprep.subr.bf16.mxu0 %v6022_v14 }
 0x59e   : > { %5366 = vmatmul.mubr.msk.bf16.vlgmr.msra.gmra.mrb[16].mxu1 %vm1455_vm1, %v1566_v31 }
 0x59f   : > { %5390 = vmatmul.mubr.msk.bf16.vlgmr.msra.gmra.mrb[16].mxu0 %vm1455_vm1, %v1792_v43  ;;  %5371 = vmatprep.mubr.msk.bf16.mxu1 %vm6024_vm0, %v6022_v14 }
 0x5a0   : > { %5415 = vmatprep.mubr.msk.bf16.mxu0 %vm6024_vm0, %v6022_v14 }
 0x669   : > { %v6310_v44 = vpop.f32.mrb[12].mxu1 }
 0x66a   : > { %v5361_v45 = vpop.f32.mrb[13].mxu1  ;;  %v1723_v46 = vpop.f32.mrb[12].mxu0 }
 0x66b   : > { %v1729_v47 = vmul.f32 0.17677669, %v1723_v46  ;;  %v1561_v48 = vpop.f32.mrb[14].mxu1  ;;  %v5379_v49 = vpop.f32.mrb[13].mxu0 }
 0x66c   : > { %v5362_v50 = vpop.f32.mrb[15].mxu1  ;;  %v1726_v51 = vpop.f32.mrb[14].mxu0  ;;  %v5655_v48 = vld [vmem:[%s7076_s7 + $0x8] sm:$0xff]   ;;  %v5656_v49 = vld [vmem:[%s7076_s7 + $0x10] sm:$0xff]  }
 0x66d   : > { %v5380_v52 = vpop.f32.mrb[15].mxu0  ;;  %v1730_v55 = vadd.f32 %v1729_v47, %v6283_v18  ;;  %v5654_v47 = vld [vmem:[%s7076_s7] sm:$0xff]   ;;  %v5657_v50 = vld [vmem:[%s7076_s7 + $0x18] sm:$0xff]  }
 0x66e   : > { %5400 = vmatpush3.bf16.msra.mxu0 %v5654_v47  ;;  %v5658_v51 = vld [vmem:[%s7076_s7 + $0x20] sm:$0xff]   ;;  %v5659_v52 = vld [vmem:[%s7076_s7 + $0x28] sm:$0xff]  }
 0x66f   : > { %v1731_v57 = vsel %vm1504_vm4, %v1730_v55, -inf  ;;  %5401 = vmatprep.subr.bf16.mxu0 %v6022_v14  ;;  %v5691_v47 = vld [vmem:[%s7080_s11 + $0x8c] ss:$16 sps:$4 sm:$0xff]  }
 0x670   : > { %1732 = vmax.xlane.f32.xlu1 %v1731_v57 }
 0x671   : > { %v1610_v59 = vpop.f32.mrb[16].mxu1 }
 0x672   : > { %v1616_v60 = vmul.f32 0.17677669, %v1610_v59  ;;  %v5367_v61 = vpop.f32.mrb[17].mxu1  ;;  %v1835_v62 = vpop.f32.mrb[16].mxu0  ;;  %5402 = vmatpush3.bf16.msra.mxu0 %v5655_v48  ;;  %v5694_v48 = vld [vmem:[%s7080_s11 + $0xa4] ss:$16 sps:$4 sm:$0xff]  }
 0x673   : > { %v1841_v63 = vmul.f32 0.17677669, %v1835_v62  ;;  %v1613_v0 = vpop.f32.mrb[18].mxu1  ;;  %v5391_v1 = vpop.f32.mrb[17].mxu0  ;;  %5403 = vmatprep.subr.bf16.mxu0 %v6022_v14  ;;  %v5661_v62 = vld [vmem:[%s7076_s7 + $0x38] sm:$0xff]  }
 0x674   : > { %v5368_v2 = vpop.f32.mrb[19].mxu1  ;;  %v1838_v3 = vpop.f32.mrb[18].mxu0  ;;  %v1617_v4 = vadd.f32 %v1616_v60, %v6283_v18 }
 0x675   : > { %v5392_v5 = vpop.f32.mrb[19].mxu0  ;;  %v1842_v7 = vadd.f32 %v1841_v63, %v6283_v18 }
 0x676   : > { %v1618_v6 = vsel %vm1504_vm4, %v1617_v4, -inf  ;;  %5404 = vmatpush3.bf16.msra.mxu0 %v5656_v49  ;;  %v5697_v49 = vld [vmem:[%s7080_s11 + $0xac] ss:$16 sps:$4 sm:$0xff]  }
 0x677   : > { %1619 = vmax.xlane.f32.xlu0 %v1618_v6  ;;  %v1843_v8 = vsel %vm1504_vm4, %v1842_v7, -inf  ;;  %5405 = vmatprep.subr.bf16.mxu0 %v6022_v14 }
 0x67a   : > { %5406 = vmatpush3.bf16.msra.mxu0 %v5657_v50  ;;  %v5692_v50 = vld [vmem:[%s7080_s11 + $0xa0] ss:$16 sps:$4 sm:$0xff]  }
 0x67b   : > { %1844 = vmax.xlane.f32.xlu0 %v1843_v8  ;;  %5407 = vmatprep.subr.bf16.mxu0 %v6022_v14 }
 0x67e   : > { %5408 = vmatpush3.bf16.msra.mxu0 %v5658_v51  ;;  %v5695_v51 = vld [vmem:[%s7080_s11 + $0xa8] ss:$16 sps:$4 sm:$0xff]  }
 0x67f   : > { %5409 = vmatprep.subr.bf16.mxu0 %v6022_v14 }
 0x682   : > { %5410 = vmatpush3.bf16.msra.mxu0 %v5659_v52  ;;  %v5700_v52 = vld [vmem:[%s7080_s11 + $0xc4] ss:$16 sps:$4 sm:$0xff]  }
 0x683   : > { %5411 = vmatprep.subr.bf16.mxu0 %v6022_v14 }
 0x6fd   : > { %v1733_v9 = vpop.xlane.xlu1 %1732 }
 0x6fe   : > { %v1734_v12 = vsub.f32 %v1730_v55, %v1733_v9  ;;  %v5660_v55 = vld [vmem:[%s7076_s7 + $0x30] sm:$0xff]  }
 0x6ff   : > { %5412 = vmatpush3.bf16.msra.mxu0 %v5660_v55  ;;  %v5703_v55 = vld [vmem:[%s7080_s11 + $0xcc] ss:$16 sps:$4 sm:$0xff]  }
 0x700   : > { %v1735_v13 = vmul.f32 1.442695, %v1734_v12  ;;  %5413 = vmatprep.subr.bf16.mxu0 %v6022_v14 }
 0x702   : > { %5876 = vpow2.f32 %v1735_v13 }
 0x703   : > { %5414 = vmatpush3.bf16.msra.mxu0 %v5661_v62  ;;  %v5704_v62 = vld [vmem:[%s7080_s11 + $0xe0] ss:$16 sps:$4 sm:$0xff]  }
 0x704   : > { %v1620_v15 = vpop.xlane.xlu0 %1619 }
 0x705   : > { %v1621_v16 = vsub.f32 %v1617_v4, %v1620_v15 }
 0x707   : > { %v1622_v17 = vmul.f32 1.442695, %v1621_v16 }
 0x708   : > { %v1845_v19 = vpop.xlane.xlu0 %1844 }
 0x709   : > { %5878 = vpow2.f32 %v1622_v17  ;;  %v1846_v20 = vsub.f32 %v1842_v7, %v1845_v19  ;;  %v4781_v17 = vld [vmem:[%s7077_s8] ss:$0 sm:$0xff] }
 0x70b   : > { %v1847_v21 = vmul.f32 1.442695, %v1846_v20 }
 0x70c   : > { %v5877_v22 = vpop.eup %5876 }
 0x70d   : > { %5880 = vpow2.f32 %v1847_v21  ;;  %v1737_v23 = vsel %vm1504_vm4, %v5877_v22, 0.0 }
 0x70e   : > { %1738 = vadd.xlane.f32.xlu0 %v1737_v23 }
 0x713   : > { %v5879_v24 = vpop.eup %5878 }
 0x714   : > { %v1624_v25 = vsel %vm1504_vm4, %v5879_v24, 0.0 }
 0x715   : > { %1625 = vadd.xlane.f32.xlu0 %v1624_v25  ;;  %v5664_v25 = vld [vmem:[%s7080_s11 + $0x4] ss:$16 sps:$4 sm:$0xff]  }
 0x717   : > { %v5881_v26 = vpop.eup %5880 }
 0x718   : > { %v1849_v27 = vsel %vm1504_vm4, %v5881_v26, 0.0 }
 0x719   : > { %1850 = vadd.xlane.f32.xlu1 %v1849_v27  ;;  %v5670_v27 = vld [vmem:[%s7080_s11 + $0x24] ss:$16 sps:$4 sm:$0xff]  }
 0x72a   : > { %1743 = vrot.lane.b32.xlu1 %v6274_v10, %s6028_s23 }
 0x72b   : > { %1631 = vrot.lane.b32.xlu0 %v6274_v10, %s6025_s1 }
 0x72e   : > { %1855 = vrot.lane.b32.xlu1 %v6274_v10, %s6026_s2 }
 0x79b   : > { %v1739_v28 = vpop.xlane.xlu0 %1738 }
 0x7a2   : > { %v1626_v29 = vpop.xlane.xlu0 %1625 }
 0x7a3   : > { %5882 = vrcp.f32 %v1626_v29  ;;  %v5668_v29 = vld [vmem:[%s7080_s11 + $0x20] ss:$16 sps:$4 sm:$0xff]  }
 0x7a4   : > { %5884 = vrcp.f32 %v1739_v28  ;;  %v5673_v28 = vld [vmem:[%s7080_s11 + $0x2c] ss:$16 sps:$4 sm:$0xff]  }
 0x7a6   : > { %v1632_v30 = vpop.permute.xlu0 %1631  ;;  %v1851_v32 = vpop.xlane.xlu1 %1850 }
 0x7a7   : > { %v1637_v31 = vsel %vm1520_vm2, %v1632_v30, 0  ;;  %5886 = vrcp.f32 %v1851_v32  ;;  %v5671_v30 = vld [vmem:[%s7080_s11 + $0x28] ss:$16 sps:$4 sm:$0xff]   ;;  %v5679_v32 = vld [vmem:[%s7080_s11 + $0x4c] ss:$16 sps:$4 sm:$0xff]  }
 0x7a8   : > { %5370 = vmatpush3.bf16.msra.mxu1 %v1637_v31  ;;  %v5676_v31 = vld [vmem:[%s7080_s11 + $0x44] ss:$16 sps:$4 sm:$0xff]  }
 0x7a9   : > { %5381 = vmatprep.subr.bf16.mxu1 %v6022_v14 }
 0x7aa   : > { %v1744_v35 = vpop.permute.xlu1 %1743 }
 0x7ab   : > { %v1749_v39 = vsel %vm1520_vm2, %v1744_v35, 0 }
 0x7ad   : > { %v5883_v33 = vpop.eup %5882 }
 0x7ae   : > { %v1628_v34 = vmul.f32 %v5883_v33, %v5879_v24  ;;  %v5885_v38 = vpop.eup %5884  ;;  %v1856_v40 = vpop.permute.xlu1 %1855  ;;  %v5662_v24 = vld [vmem:[%s7080_s11] ss:$16 sps:$4 sm:$0xff]  }
 0x7af   : > { %v1741_v10 = vmul.f32 %v5885_v38, %v5877_v22  ;;  %v1861_v43 = vsel %vm1520_vm2, %v1856_v40, 0  ;;  %v5674_v33 = vld [vmem:[%s7080_s11 + $0x40] ss:$16 sps:$4 sm:$0xff]   ;;  %v5685_v40 = vld [vmem:[%s7080_s11 + $0x6c] ss:$16 sps:$4 sm:$0xff]  }
 0x7b0   : > { %v1629_v37 = vpack.c.bf16 %v1628_v34, %v1628_v34  ;;  %v5677_v34 = vld [vmem:[%s7080_s11 + $0x48] ss:$16 sps:$4 sm:$0xff]  }
 0x7b1   : > { %v1742_v41 = vpack.c.bf16 %v1741_v10, %v1741_v10  ;;  %v5887_v42 = vpop.eup %5886  ;;  %v5682_v10 = vld [vmem:[%s7080_s11 + $0x64] ss:$16 sps:$4 sm:$0xff]  }
 0x7b2   : > { %5372 = vmatmul.mubr.msk.bf16.vlgmr.msra.gmra.mrb[20].mxu1 %vm1504_vm4, %v1629_v37  ;;  %v1853_v45 = vmul.f32 %v5887_v42, %v5881_v26  ;;  %v5665_v26 = vld [vmem:[%s7080_s11 + $0x8] ss:$16 sps:$4 sm:$0xff]  }
 0x7b3   : > { %5382 = vmatpush3.bf16.msra.mxu1 %v1749_v39  ;;  %5383 = vmatprep.mubr.msk.bf16.mxu1 %vm6024_vm0, %v6022_v14  ;;  %v5683_v42 = vld [vmem:[%s7080_s11 + $0x68] ss:$16 sps:$4 sm:$0xff]  }
 0x7b4   : > { %5393 = vmatprep.subr.bf16.mxu1 %v6022_v14  ;;  %v1854_v46 = vpack.c.bf16 %v1853_v45, %v1853_v45  ;;  %v5686_v45 = vld [vmem:[%s7080_s11 + $0x80] ss:$16 sps:$4 sm:$0xff]  }
 0x7ba   : > { %5384 = vmatmul.mubr.msk.bf16.vlgmr.msra.gmra.mrb[24].mxu1 %vm1504_vm4, %v1742_v41  ;;  %v5680_v41 = vld [vmem:[%s7080_s11 + $0x60] ss:$16 sps:$4 sm:$0xff]  }
 0x7bb   : > { %5394 = vmatpush3.bf16.msra.mxu1 %v1861_v43  ;;  %5395 = vmatprep.mubr.msk.bf16.mxu1 %vm6024_vm0, %v6022_v14  ;;  %v5688_v43 = vld [vmem:[%s7080_s11 + $0x84] ss:$16 sps:$4 sm:$0xff]  }
 0x7bc   : > { %2275 = vmatprep.subr.bf16.mxu1 %v5664_v25  ;;  %v5721_v25 = vld [vmem:[%s7082_s13 + $0x90] sm:$0xff]  }
 0x7c2   : > { %5396 = vmatmul.mubr.msk.bf16.vlgmr.msra.gmra.mrb[28].mxu1 %vm1504_vm4, %v1854_v46  ;;  %v5689_v46 = vld [vmem:[%s7080_s11 + $0x88] ss:$16 sps:$4 sm:$0xff]  }
 0x7c3   : > { %2307 = vmatprep.mubr.bf16.mxu1 %v6023_v36  ;;  %2276 = vmatpush1.bf16.msra.mxu1 %v5662_v24  ;;  %v5720_v24 = vld [vmem:[%s7082_s13 + $0x10] sm:$0xff]  }
 0x7c4   : > { %2277 = vmatprep.subr.bf16.mxu1 %v5670_v27  ;;  %v5724_v27 = vld [vmem:[%s7082_s13 + $0x18] sm:$0xff]  }
 0x7c7   : > { %2278 = vmatpush1.bf16.msra.mxu1 %v5668_v29  ;;  %v5726_v29 = vld [vmem:[%s7082_s13 + $0x60] sm:$0xff]  }
 0x7c8   : > { %2279 = vmatprep.subr.bf16.mxu1 %v5676_v31  ;;  %v5728_v31 = vld [vmem:[%s7082_s13 + $0x20] sm:$0xff]  }
 0x7cb   : > { %2280 = vmatpush1.bf16.msra.mxu1 %v5674_v33  ;;  %v5730_v33 = vld [vmem:[%s7082_s13 + $0x68] sm:$0xff]  }
 0x7cc   : > { %2281 = vmatprep.subr.bf16.mxu1 %v5682_v10  ;;  %v5736_v10 = vld [vmem:[%s7082_s13 + $0x30] sm:$0xff]  }
 0x7cf   : > { %2282 = vmatpush1.bf16.msra.mxu1 %v5680_v41  ;;  %v5738_v41 = vld [vmem:[%s7082_s13 + $0x78] sm:$0xff]  }
 0x7d0   : > { %2283 = vmatprep.subr.bf16.mxu1 %v5688_v43  ;;  %v5740_v43 = vld [vmem:[%s7082_s13 + $0x38] sm:$0xff]  }
 0x7d3   : > { %2284 = vmatpush1.bf16.msra.mxu1 %v5686_v45  ;;  %v5741_v45 = vld [vmem:[%s7082_s13 + $0xb8] sm:$0xff]  }
 0x7d4   : > { %2285 = vmatprep.subr.bf16.mxu1 %v5694_v48 }
 0x7d7   : > { %2286 = vmatpush1.bf16.msra.mxu1 %v5692_v50 }
 0x7d8   : > { %2287 = vmatprep.subr.bf16.mxu1 %v5700_v52 }
 0x885   : > { %v1673_v57 = vpop.f32.mrb[20].mxu1 }
 0x886   : > { %1904 = vrot.lane.b32.xlu1 %v1673_v57, %s6026_s2  ;;  %v5373_v59 = vpop.f32.mrb[21].mxu1  ;;  %v5698_v57 = vld [vmem:[%s7080_s11 + $0xc0] ss:$16 sps:$4 sm:$0xff]  }
 0x887   : > { %v1676_v60 = vpop.f32.mrb[22].mxu1  ;;  %v5701_v59 = vld [vmem:[%s7080_s11 + $0xc8] ss:$16 sps:$4 sm:$0xff]   ;;  %2288 = vmatpush1.bf16.msra.mxu1 %v5698_v57 }
 0x888   : > { %v5374_v61 = vpop.f32.mrb[23].mxu1  ;;  %v5706_v60 = vld [vmem:[%s7080_s11 + $0xe4] ss:$16 sps:$4 sm:$0xff]  }
 0x889   : > { %v5709_v61 = vld [vmem:[%s7080_s11 + $0xec] ss:$16 sps:$4 sm:$0xff]   ;;  %2289 = vmatprep.subr.bf16.mxu1 %v5706_v60 }
 0x88b   : > { %2290 = vmatpush1.bf16.msra.mxu1 %v5704_v62 }
 0x88d   : > { %v1785_v63 = vpop.f32.mrb[24].mxu1 }
 0x88e   : > { %1908 = vrot.lane.b32.xlu0 %v1785_v63, %s6028_s23  ;;  %v5385_v0 = vpop.f32.mrb[25].mxu1  ;;  %v5707_v63 = vld [vmem:[%s7080_s11 + $0xe8] ss:$16 sps:$4 sm:$0xff]  }
 0x88f   : > { %v1788_v1 = vpop.f32.mrb[26].mxu1 }
 0x890   : > { %v5386_v2 = vpop.f32.mrb[27].mxu1 }
 0x895   : > { %v1897_v3 = vpop.f32.mrb[28].mxu1 }
 0x896   : > { %1912 = vrot.lane.b32.xlu1 %v1897_v3, %s6025_s1  ;;  %v5397_v4 = vpop.f32.mrb[29].mxu1 }
 0x897   : > { %v1900_v5 = vpop.f32.mrb[30].mxu1  ;;  %v4790_v4 = vld [vmem:[%s7078_s9] ss:$0 sm:$0xff] }
 0x898   : > { %v5398_v6 = vpop.f32.mrb[31].mxu1 }
 0x899   : > { %v4791_v6 = vld [vmem:[%s7079_s10] ss:$0 sm:$0xff] }
 0x8f8   : > { %v1905_v7 = vpop.permute.xlu1 %1904 }
 0x8f9   : > { %v1915_v9 = vsel %vm1455_vm1, %v6310_v44, %v1905_v7 }
 0x900   : > { %v1909_v8 = vpop.permute.xlu0 %1908 }
 0x901   : > { %v1917_v12 = vsel %vm1916_vm5, %v1915_v9, %v1909_v8 }
 0x908   : > { %v1913_v13 = vpop.permute.xlu1 %1912 }
 0x909   : > { %v1919_v15 = vsel %vm1918_vm6, %v1917_v12, %v1913_v13  ;;  %v5710_v12 = vld [vmem:[%s7082_s13 + $0x40] sm:$0xff]  }
 0x90a   : > { %v1920_v16 = vpack.c.bf16 %v1919_v15, %v1919_v15  ;;  %v5711_v13 = vld [vmem:[%s7082_s13 + $0xc0] sm:$0xff]   ;;  %5200 = vmatprep.subr.bf16.mxu1 %v5710_v12 }
 0x90b   : > { %v5712_v15 = vld [vmem:[%s7082_s13] sm:$0xff]  }
 0x90c   : > { %5416 = vmatmul.mubr.bf16.vlgmr.msra.gmra.mrb[20].mxu0 %v1920_v16  ;;  %v5713_v16 = vld [vmem:[%s7082_s13 + $0x80] sm:$0xff]  }
 0x90d   : > { %2348 = vmatprep.mubr.bf16.mxu0 %v6023_v36 }
 0x9df   : > { %v2026_v19 = vpop.f32.mrb[20].mxu0 }
 0x9e0   : > { %v2027_v20 = vadd.f32 %v4781_v17, %v2026_v19  ;;  %v5417_v21 = vpop.f32.mrb[21].mxu0  ;;  %v5714_v17 = vld [vmem:[%s7082_s13 + $0x48] sm:$0xff]  }
 0x9e1   : > { %v2029_v22 = vpop.f32.mrb[22].mxu0  ;;  %v5715_v19 = vld [vmem:[%s7082_s13 + $0xc8] sm:$0xff]  }
 0x9e2   : > { %v6383_v23 = vadd.f32 %v2027_v20, %v6227_v11  ;;  %v5418_v44 = vpop.f32.mrb[23].mxu0  ;;  %v5667_v11 = vld [vmem:[%s7080_s11 + $0xc] ss:$16 sps:$4 sm:$0xff]   ;;  %v5718_v22 = vld [vmem:[%s7082_s13 + $0x50] sm:$0xff]  }
 0x9e3   : > { %2316 = vmatprep.subr.bf16.mxu0 %v5667_v11  ;;  %v5716_v20 = vld [vmem:[%s7082_s13 + $0x8] sm:$0xff]   ;;  %v5719_v44 = vld [vmem:[%s7082_s13 + $0xd0] sm:$0xff]   ;;  %v5723_v11 = vld [vmem:[%s7082_s13 + $0xd8] sm:$0xff]  }
 0x9e4   : > { %2035 = vadd.xlane.f32.xlu0 %v6383_v23  ;;  %2317 = vmatpush1.bf16.msra.mxu0 %v5665_v26  ;;  %v5717_v21 = vld [vmem:[%s7082_s13 + $0x88] sm:$0xff]   ;;  %v5722_v26 = vld [vmem:[%s7082_s13 + $0x58] sm:$0xff]  }
 0x9e5   : > { %2318 = vmatprep.subr.bf16.mxu0 %v5673_v28  ;;  %v5725_v28 = vld [vmem:[%s7082_s13 + $0x98] sm:$0xff]  }
 0x9e8   : > { %2319 = vmatpush1.bf16.msra.mxu0 %v5671_v30  ;;  %v5727_v30 = vld [vmem:[%s7082_s13 + $0xe0] sm:$0xff]  }
 0x9e9   : > { %2320 = vmatprep.subr.bf16.mxu0 %v5679_v32  ;;  %v5729_v32 = vld [vmem:[%s7082_s13 + $0xa0] sm:$0xff]  }
 0x9ec   : > { %2321 = vmatpush1.bf16.msra.mxu0 %v5677_v34  ;;  %v5731_v34 = vld [vmem:[%s7082_s13 + $0xe8] sm:$0xff]  }
 0x9ed   : > { %2322 = vmatprep.subr.bf16.mxu0 %v5685_v40  ;;  %v5737_v40 = vld [vmem:[%s7082_s13 + $0xb0] sm:$0xff]  }
 0x9f0   : > { %2323 = vmatpush1.bf16.msra.mxu0 %v5683_v42  ;;  %v5739_v42 = vld [vmem:[%s7082_s13 + $0xf8] sm:$0xff]  }
 0x9f1   : > { %2324 = vmatprep.subr.bf16.mxu0 %v5691_v47  ;;  %v2109_v47 = vsub.s32 3, %v6254_v53 }
 0x9f4   : > { %2325 = vmatpush1.bf16.msra.mxu0 %v5689_v46  ;;  %v2093_v46 = vld [vmem:[%s7081_s12] sm:$0xf] }
 0x9f5   : > { %2326 = vmatprep.subr.bf16.mxu0 %v5697_v49  ;;  %v2098_v48 = vrot.slane %v2093_v46, %v6267_v58  ;;  %v2106_v49 = vrot.slane %v2093_v46, %v6263_v56  ;;  %v2102_v50 = vrot.slane %v2093_v46, %v6257_v54 }
 0x9f8   : > { %2327 = vmatpush1.bf16.msra.mxu0 %v5695_v51  ;;  %v2110_v51 = vrot.slane %v2093_v46, %v2109_v47 }
 0x9f9   : > { %2328 = vmatprep.subr.bf16.mxu0 %v5703_v55 }
 0x9fc   : > { %2329 = vmatpush1.bf16.msra.mxu0 %v5701_v59 }
 0x9fd   : > { %2330 = vmatprep.subr.bf16.mxu0 %v5709_v61 }
 0xa00   : > { %2331 = vmatpush1.bf16.msra.mxu0 %v5707_v63 }
 0xa01   : > { %5222 = vmatprep.subr.bf16.mxu0 %v5711_v13 }
 0xa71   : > { %v2036_v35 = vpop.xlane.xlu0 %2035 }
 0xa72   : > { %v2037_v37 = vmul.f32 0.0078125, %v2036_v35  ;;  %v5732_v35 = vld [vmem:[%s7082_s13 + $0x28] sm:$0xff]  }
 0xa74   : > { %v2038_v38 = vsub.f32 %v6383_v23, %v2037_v37  ;;  %v5733_v37 = vld [vmem:[%s7082_s13 + $0xa8] sm:$0xff]  }
 0xa76   : > { %v2039_v39 = vmul.f32 %v2038_v38, %v2038_v38 }
 0xa78   : > { %2040 = vadd.xlane.f32.xlu1 %v2039_v39  ;;  %v5735_v39 = vld [vmem:[%s7082_s13 + $0xf0] sm:$0xff]  }
 0xb05   : > { %v2041_v0 = vpop.xlane.xlu1 %2040 }
 0xb06   : > { %v2042_v1 = vmul.f32 0.0078125, %v2041_v0 }
 0xb08   : > { %v2043_v2 = vadd.f32 1e-06, %v2042_v1 }
 0xb0a   : > { %5888 = vrsqrt.f32 %v2043_v2 }
 0xb14   : > { %v5889_v3 = vpop.eup %5888 }
 0xb15   : > { %v2045_v5 = vmul.f32 %v5889_v3, %v2038_v38  ;;  %v5734_v38 = vld [vmem:[%s7082_s13 + $0x70] sm:$0xff]  }
 0xb17   : > { %v2052_v7 = vmul.f32 %v4790_v4, %v2045_v5 }
 0xb19   : > { %v2059_v8 = vadd.f32 %v4791_v6, %v2052_v7 }
 0xb1b   : > { %v2060_v9 = vpack.c.bf16 %v2059_v8, %v2059_v8 }
 0xb1d   : > { %2308 = vmatmul.mubr.bf16.vlgmr.msra.gmra.mrb[32].mxu1 %v2060_v9  ;;  %2349 = vmatmul.mubr.bf16.vlgmr.msra.gmra.mrb[24].mxu0 %v2060_v9 }
 0xb1e   : > { %5201 = vmatpush3.bf16.msra.mxu1 %v5712_v15  ;;  %5223 = vmatpush3.bf16.msra.mxu0 %v5713_v16 }
 0xb1f   : > { %5202 = vmatprep.subr.bf16.mxu1 %v5714_v17  ;;  %5224 = vmatprep.subr.bf16.mxu0 %v5715_v19 }
 0xb22   : > { %5203 = vmatpush3.bf16.msra.mxu1 %v5716_v20  ;;  %5225 = vmatpush3.bf16.msra.mxu0 %v5717_v21 }
 0xb23   : > { %5204 = vmatprep.subr.bf16.mxu1 %v5718_v22  ;;  %5226 = vmatprep.subr.bf16.mxu0 %v5719_v44 }
 0xb26   : > { %5205 = vmatpush3.bf16.msra.mxu1 %v5720_v24  ;;  %5227 = vmatpush3.bf16.msra.mxu0 %v5721_v25 }
 0xb27   : > { %5206 = vmatprep.subr.bf16.mxu1 %v5722_v26  ;;  %5228 = vmatprep.subr.bf16.mxu0 %v5723_v11 }
 0xb2a   : > { %5207 = vmatpush3.bf16.msra.mxu1 %v5724_v27  ;;  %5229 = vmatpush3.bf16.msra.mxu0 %v5725_v28 }
 0xb2b   : > { %5208 = vmatprep.subr.bf16.mxu1 %v5726_v29  ;;  %5230 = vmatprep.subr.bf16.mxu0 %v5727_v30 }
 0xb2e   : > { %5209 = vmatpush3.bf16.msra.mxu1 %v5728_v31  ;;  %5231 = vmatpush3.bf16.msra.mxu0 %v5729_v32 }
 0xb2f   : > { %5210 = vmatprep.subr.bf16.mxu1 %v5730_v33  ;;  %5232 = vmatprep.subr.bf16.mxu0 %v5731_v34 }
 0xb32   : > { %5211 = vmatpush3.bf16.msra.mxu1 %v5732_v35  ;;  %5233 = vmatpush3.bf16.msra.mxu0 %v5733_v37 }
 0xb33   : > { %5212 = vmatprep.subr.bf16.mxu1 %v5734_v38  ;;  %5234 = vmatprep.subr.bf16.mxu0 %v5735_v39 }
 0xb36   : > { %5213 = vmatpush3.bf16.msra.mxu1 %v5736_v10  ;;  %5235 = vmatpush3.bf16.msra.mxu0 %v5737_v40 }
 0xb37   : > { %5214 = vmatprep.subr.bf16.mxu1 %v5738_v41  ;;  %5236 = vmatprep.subr.bf16.mxu0 %v5739_v42 }
 0xb3a   : > { %5215 = vmatpush3.bf16.msra.mxu1 %v5740_v43  ;;  %5237 = vmatpush3.bf16.msra.mxu0 %v5741_v45 }
 0xb3b   : > { %5419 = vmatprep.subr.bf16.mxu0 %v6022_v14 }
 0xbf0   : > { %v2309_v52 = vpop.f32.mrb[32].mxu1  ;;  %v2350_v55 = vpop.f32.mrb[24].mxu0 }
 0xbf1   : > { %v6595_v57 = vadd.f32 %v2309_v52, %v2098_v48  ;;  %v6597_v59 = vadd.f32 %v2350_v55, %v2106_v49  ;;  %v2311_v60 = vpop.f32.mrb[33].mxu1  ;;  %v2352_v61 = vpop.f32.mrb[25].mxu0 }
 0xbf2   : > { %v6599_v62 = vadd.f32 %v2311_v60, %v2102_v50  ;;  %v6601_v63 = vadd.f32 %v2352_v61, %v2110_v51  ;;  %v2313_v0 = vpop.f32.mrb[34].mxu1  ;;  %v2354_v1 = vpop.f32.mrb[26].mxu0 }
 0xbf3   : > { %v6604_v2 = vmul.f32 0.70710677, %v6595_v57  ;;  %v6607_v3 = vmul.f32 0.70710677, %v6597_v59  ;;  %v2314_v15 = vpop.f32.mrb[35].mxu1  ;;  %v2355_v16 = vpop.f32.mrb[27].mxu0 }
 0xbf4   : > { %v6610_v4 = vmul.f32 0.70710677, %v6599_v62  ;;  %v6613_v5 = vmul.f32 0.70710677, %v6601_v63 }
 0xbf5   : > { %v2365_v6 = vand.u32 2147483647, %v6604_v2  ;;  %v2367_v7 = vand.u32 2147483647, %v6607_v3  ;;  %vm2445_vm7 = vcmp.lt.f32.partialorder %v6604_v2, 0.0  ;;  %vm2447_vm8 = vcmp.lt.f32.partialorder %v6607_v3, 0.0 }
 0xbf6   : > { %v2366_v8 = vand.u32 2147483647, %v6610_v4  ;;  %v2368_v9 = vand.u32 2147483647, %v6613_v5  ;;  %vm2446_vm9 = vcmp.lt.f32.partialorder %v6610_v4, 0.0  ;;  %vm2448_vm10 = vcmp.lt.f32.partialorder %v6613_v5, 0.0 }
 0xbf7   : > { %v2369_v12 = vmul.f32 0.3275911, %v2365_v6  ;;  %v2371_v13 = vmul.f32 0.3275911, %v2367_v7  ;;  %v2421_v24 = vmul.f32 %v2365_v6, %v2365_v6  ;;  %v2423_v25 = vmul.f32 %v2367_v7, %v2367_v7 }
 0xbf8   : > { %v2370_v17 = vmul.f32 0.3275911, %v2366_v8  ;;  %v2372_v21 = vmul.f32 0.3275911, %v2368_v9  ;;  %v2422_v27 = vmul.f32 %v2366_v8, %v2366_v8  ;;  %v2424_v32 = vmul.f32 %v2368_v9, %v2368_v9 }
 0xbf9   : > { %v2373_v19 = vadd.f32 1.0, %v2369_v12  ;;  %v2375_v20 = vadd.f32 1.0, %v2371_v13  ;;  %v2425_v11 = vsub.f32 0.0, %v2421_v24  ;;  %v2427_v30 = vsub.f32 0.0, %v2423_v25 }
 0xbfa   : > { %v2374_v22 = vadd.f32 1.0, %v2370_v17  ;;  %v2376_v44 = vadd.f32 1.0, %v2372_v21  ;;  %v2426_v38 = vsub.f32 0.0, %v2422_v27  ;;  %v2428_v43 = vsub.f32 0.0, %v2424_v32 }
 0xbfb   : > { %5890 = vrcp.f32 %v2373_v19  ;;  %v2429_v35 = vmul.f32 1.442695, %v2425_v11  ;;  %v2433_v10 = vmul.f32 1.442695, %v2427_v30  ;;  %v2359_v3 = vmul.f32 0.5, %v6597_v59 }
 0xbfc   : > { %5892 = vrcp.f32 %v2375_v20  ;;  %v2431_v50 = vmul.f32 1.442695, %v2426_v38  ;;  %v2435_v61 = vmul.f32 1.442695, %v2428_v43 }
 0xbfd   : > { %5894 = vrcp.f32 %v2374_v22 }
 0xbfe   : > { %5896 = vrcp.f32 %v2376_v44 }
 0xbff   : > { %5898 = vpow2.f32 %v2429_v35 }
 0xc00   : > { %5900 = vpow2.f32 %v2433_v10 }
 0xc01   : > { %5902 = vpow2.f32 %v2431_v50 }
 0xc02   : > { %5904 = vpow2.f32 %v2435_v61  ;;  %v2360_v61 = vmul.f32 0.5, %v6601_v63 }
 0xc05   : > { %v5891_v26 = vpop.eup %5890 }
 0xc06   : > { %v5893_v28 = vpop.eup %5892  ;;  %v2385_v29 = vmul.f32 1.0614054, %v5891_v26 }
 0xc07   : > { %v2387_v31 = vmul.f32 1.0614054, %v5893_v28  ;;  %v5895_v34 = vpop.eup %5894 }
 0xc08   : > { %v2389_v33 = vadd.f32 -1.4531521, %v2385_v29  ;;  %v2386_v40 = vmul.f32 1.0614054, %v5895_v34  ;;  %v5897_v41 = vpop.eup %5896 }
 0xc09   : > { %v2391_v37 = vadd.f32 -1.4531521, %v2387_v31  ;;  %v2388_v48 = vmul.f32 1.0614054, %v5897_v41  ;;  %v5899_v44 = vpop.eup %5898 }
 0xc0a   : > { %v2393_v39 = vmul.f32 %v5891_v26, %v2389_v33  ;;  %v2390_v46 = vadd.f32 -1.4531521, %v2386_v40  ;;  %v5901_v25 = vpop.eup %5900 }
 0xc0b   : > { %v2395_v42 = vmul.f32 %v5893_v28, %v2391_v37  ;;  %v2392_v55 = vadd.f32 -1.4531521, %v2388_v48  ;;  %v5903_v35 = vpop.eup %5902 }
 0xc0c   : > { %v2397_v45 = vadd.f32 1.4214138, %v2393_v39  ;;  %v2394_v52 = vmul.f32 %v5895_v34, %v2390_v46  ;;  %v5905_v40 = vpop.eup %5904 }
 0xc0d   : > { %v2399_v49 = vadd.f32 1.4214138, %v2395_v42  ;;  %v2396_v6 = vmul.f32 %v5897_v41, %v2392_v55 }
 0xc0e   : > { %v2401_v51 = vmul.f32 %v5891_v26, %v2397_v45  ;;  %v2398_v1 = vadd.f32 1.4214138, %v2394_v52  ;;  %v2358_v52 = vmul.f32 0.5, %v6599_v62  ;;  %v4824_v62 = vld [vmem:[%s7083_s14] ss:$0 sm:$0xff] }
 0xc0f   : > { %v2403_v60 = vmul.f32 %v5893_v28, %v2399_v49  ;;  %v2400_v12 = vadd.f32 1.4214138, %v2396_v6 }
 0xc10   : > { %v2405_v0 = vadd.f32 -0.28449672, %v2401_v51  ;;  %v2402_v9 = vmul.f32 %v5895_v34, %v2398_v1 }
 0xc11   : > { %v2407_v7 = vadd.f32 -0.28449672, %v2403_v60  ;;  %v2404_v17 = vmul.f32 %v5897_v41, %v2400_v12 }
 0xc12   : > { %v2409_v8 = vmul.f32 %v5891_v26, %v2405_v0  ;;  %v2406_v16 = vadd.f32 -0.28449672, %v2402_v9 }
 0xc13   : > { %v2411_v13 = vmul.f32 %v5893_v28, %v2407_v7  ;;  %v2408_v22 = vadd.f32 -0.28449672, %v2404_v17 }
 0xc14   : > { %v2413_v15 = vadd.f32 0.2548296, %v2409_v8  ;;  %v2410_v21 = vmul.f32 %v5895_v34, %v2406_v16 }
 0xc15   : > { %v2415_v19 = vadd.f32 0.2548296, %v2411_v13  ;;  %v2412_v29 = vmul.f32 %v5897_v41, %v2408_v22 }
 0xc16   : > { %v2417_v20 = vmul.f32 %v5891_v26, %v2413_v15  ;;  %v2414_v27 = vadd.f32 0.2548296, %v2410_v21 }
 0xc17   : > { %v2419_v24 = vmul.f32 %v5893_v28, %v2415_v19  ;;  %v2416_v33 = vadd.f32 0.2548296, %v2412_v29  ;;  %v5749_v29 = vld [vmem:[#allocation4 + $0xe0] ss:$12 sps:$4 sm:$0xff]  }
 0xc18   : > { %v2437_v11 = vmul.f32 %v5899_v44, %v2417_v20  ;;  %v2418_v32 = vmul.f32 %v5895_v34, %v2414_v27  ;;  %v2357_v34 = vmul.f32 0.5, %v6595_v57  ;;  %v5748_v27 = vld [vmem:[#allocation4 + $0xdc] ss:$12 sps:$4 sm:$0xff]  }
 0xc19   : > { %v2439_v30 = vmul.f32 %v5901_v25, %v2419_v24  ;;  %v2420_v10 = vmul.f32 %v5897_v41, %v2416_v33  ;;  %v5742_v24 = vld [vmem:[#allocation4 + $0xc0] ss:$12 sps:$4 sm:$0xff]   ;;  %v5744_v25 = vld [vmem:[#allocation4 + $0xc4] ss:$12 sps:$4 sm:$0xff]  }
 0xc1a   : > { %v2441_v31 = vsub.f32 1.0, %v2437_v11  ;;  %v2438_v39 = vmul.f32 %v5903_v35, %v2418_v32  ;;  %v5745_v11 = vld [vmem:[#allocation4 + $0xc8] ss:$12 sps:$4 sm:$0xff]   ;;  %3022 = vmatprep.subr.bf16.mxu1 %v5744_v25  ;;  %v5750_v32 = vld [vmem:[#allocation4 + $0xf0] ss:$12 sps:$4 sm:$0xff]  }
 0xc1b   : > { %v2443_v37 = vsub.f32 1.0, %v2439_v30  ;;  %v2440_v43 = vmul.f32 %v5905_v40, %v2420_v10  ;;  %v5746_v30 = vld [vmem:[#allocation4 + $0xd8] ss:$12 sps:$4 sm:$0xff]   ;;  %v5754_v10 = vld [vmem:[#allocation4 + $0x108] ss:$12 sps:$4 sm:$0xff]  }
 0xc1c   : > { %v2449_v38 = vsub.f32 0.0, %v2441_v31  ;;  %v2442_v28 = vsub.f32 1.0, %v2438_v39  ;;  %v5756_v39 = vld [vmem:[#allocation4 + $0x10c] ss:$12 sps:$4 sm:$0xff]   ;;  %v5757_v40 = vld [vmem:[#allocation4 + $0x110] ss:$12 sps:$4 sm:$0xff]  }
 0xc1d   : > { %v2451_v26 = vsub.f32 0.0, %v2443_v37  ;;  %v2444_v49 = vsub.f32 1.0, %v2440_v43  ;;  %v5764_v43 = vld [vmem:[#allocation4 + $0x13c] ss:$12 sps:$4 sm:$0xff]  }
 0xc1e   : > { %v2453_v42 = vsel %vm2445_vm7, %v2449_v38, %v2441_v31  ;;  %v2450_v48 = vsub.f32 0.0, %v2442_v28  ;;  %v5752_v31 = vld [vmem:[#allocation4 + $0xf4] ss:$12 sps:$4 sm:$0xff]   ;;  %v5753_v38 = vld [vmem:[#allocation4 + $0xf8] ss:$12 sps:$4 sm:$0xff]  }
 0xc1f   : > { %v2455_v45 = vsel %vm2447_vm8, %v2451_v26, %v2443_v37  ;;  %v2457_v46 = vadd.f32 1.0, %v2453_v42  ;;  %v2452_v41 = vsub.f32 0.0, %v2444_v49  ;;  %v5760_v26 = vld [vmem:[#allocation4 + $0x124] ss:$12 sps:$4 sm:$0xff]   ;;  %v5758_v42 = vld [vmem:[#allocation4 + $0x120] ss:$12 sps:$4 sm:$0xff]  }
 0xc20   : > { %v2459_v50 = vadd.f32 1.0, %v2455_v45  ;;  %v2454_v51 = vsel %vm2446_vm9, %v2450_v48, %v2442_v28  ;;  %v5761_v28 = vld [vmem:[#allocation4 + $0x128] ss:$12 sps:$4 sm:$0xff]   ;;  %v5762_v45 = vld [vmem:[#allocation4 + $0x138] ss:$12 sps:$4 sm:$0xff]  }
 0xc21   : > { %v2458_v2 = vadd.f32 1.0, %v2454_v51  ;;  %v2461_v55 = vmul.f32 %v2457_v46, %v2357_v34  ;;  %v2456_v60 = vsel %vm2448_vm10, %v2452_v41, %v2444_v49  ;;  %v5765_v46 = vld [vmem:[#allocation4 + $0x140] ss:$12 sps:$4 sm:$0xff]   ;;  %v5766_v49 = vld [vmem:[#allocation4 + $0x150] ss:$12 sps:$4 sm:$0xff]  }
 0xc22   : > { %v2460_v1 = vadd.f32 1.0, %v2456_v60  ;;  %v2463_v6 = vmul.f32 %v2459_v50, %v2359_v3  ;;  %v5768_v48 = vld [vmem:[#allocation4 + $0x154] ss:$12 sps:$4 sm:$0xff]   ;;  %v5769_v34 = vld [vmem:[#allocation4 + $0x158] ss:$12 sps:$4 sm:$0xff]  }
 0xc23   : > { %v2462_v0 = vmul.f32 %v2458_v2, %v2358_v52  ;;  %v2465_v57 = vpack.c.bf16 %v2461_v55, %v2461_v55  ;;  %v5772_v50 = vld [vmem:[#allocation4 + $0x16c] ss:$12 sps:$4 sm:$0xff]   ;;  %v5770_v51 = vld [vmem:[#allocation4 + $0x168] ss:$12 sps:$4 sm:$0xff]   ;;  %v5773_v41 = vld [vmem:[#allocation4 + $0x170] ss:$12 sps:$4 sm:$0xff]  }
 0xc24   : > { %v2464_v7 = vmul.f32 %v2460_v1, %v2360_v61  ;;  %v2467_v9 = vpack.c.bf16 %v2463_v6, %v2463_v6  ;;  %v4859_v60 = vld [vmem:[%s7111_s20 + $0x1] ss:$0 sm:$0xff] }
 0xc25   : > { %v2466_v4 = vpack.c.bf16 %v2462_v0, %v2462_v0  ;;  %v4860_v0 = vld [vmem:[%s7073_s4 + $0x1] ss:$0 sm:$0xff] }
 0xc26   : > { %v2468_v8 = vpack.c.bf16 %v2464_v7, %v2464_v7  ;;  %v4861_v7 = vld [vmem:[%s7075_s6 + $0x3] sm:$0x7] }
 0xc27   : > { %2764 = vmatprep.mubr.bf16.mxu1 %v2466_v4 }
 0xc28   : > { %2765 = vmatmul.mubr.bf16.vlgmr.msra.gmra.mrb[36].mxu1 %v2465_v57  ;;  %2804 = vmatprep.mubr.bf16.mxu0 %v2468_v8  ;;  %v2886_v57 = vrot.slane %v4861_v7, %v6257_v54 }
 0xc29   : > { %3054 = vmatprep.mubr.bf16.mxu1 %v6023_v36  ;;  %2805 = vmatmul.mubr.bf16.vlgmr.msra.gmra.mrb[28].mxu0 %v2467_v9 }
 0xc2a   : > { %5435 = vmatprep.mubr.msk.bf16.mxu0 %vm6024_vm0, %v6022_v14  ;;  %5420 = vmatpush3.bf16.msra.mxu0 %v5745_v11 }
 0xc2b   : > { %3023 = vmatpush1.bf16.msra.mxu1 %v5742_v24  ;;  %5421 = vmatprep.subr.bf16.mxu0 %v6022_v14 }
 0xc2c   : > { %3024 = vmatprep.subr.bf16.mxu1 %v5748_v27 }
 0xc2e   : > { %5422 = vmatpush3.bf16.msra.mxu0 %v5749_v29 }
 0xc2f   : > { %3025 = vmatpush1.bf16.msra.mxu1 %v5746_v30  ;;  %5423 = vmatprep.subr.bf16.mxu0 %v6022_v14 }
 0xc30   : > { %3026 = vmatprep.subr.bf16.mxu1 %v5752_v31 }
 0xc32   : > { %5424 = vmatpush3.bf16.msra.mxu0 %v5753_v38 }
 0xc33   : > { %3027 = vmatpush1.bf16.msra.mxu1 %v5750_v32  ;;  %5425 = vmatprep.subr.bf16.mxu0 %v6022_v14 }
 0xc34   : > { %3028 = vmatprep.subr.bf16.mxu1 %v5756_v39 }
 0xc36   : > { %5426 = vmatpush3.bf16.msra.mxu0 %v5757_v40 }
 0xc37   : > { %3029 = vmatpush1.bf16.msra.mxu1 %v5754_v10  ;;  %5427 = vmatprep.subr.bf16.mxu0 %v6022_v14 }
 0xc38   : > { %3030 = vmatprep.subr.bf16.mxu1 %v5760_v26 }
 0xc3a   : > { %5428 = vmatpush3.bf16.msra.mxu0 %v5761_v28 }
 0xc3b   : > { %3031 = vmatpush1.bf16.msra.mxu1 %v5758_v42  ;;  %5429 = vmatprep.subr.bf16.mxu0 %v6022_v14 }
 0xc3c   : > { %3032 = vmatprep.subr.bf16.mxu1 %v5764_v43 }
 0xc3e   : > { %5430 = vmatpush3.bf16.msra.mxu0 %v5765_v46 }
 0xc3f   : > { %3033 = vmatpush1.bf16.msra.mxu1 %v5762_v45  ;;  %5431 = vmatprep.subr.bf16.mxu0 %v6022_v14 }
 0xc40   : > { %3034 = vmatprep.subr.bf16.mxu1 %v5768_v48 }
 0xc42   : > { %5432 = vmatpush3.bf16.msra.mxu0 %v5769_v34 }
 0xc43   : > { %3035 = vmatpush1.bf16.msra.mxu1 %v5766_v49  ;;  %5433 = vmatprep.subr.bf16.mxu0 %v6022_v14 }
 0xc44   : > { %3036 = vmatprep.subr.bf16.mxu1 %v5772_v50 }
 0xc46   : > { %5434 = vmatpush3.bf16.msra.mxu0 %v5773_v41 }
 0xc47   : > { %3037 = vmatpush1.bf16.msra.mxu1 %v5770_v51  ;;  %5463 = vmatprep.subr.bf16.mxu0 %v6022_v14 }
 0xc48   : > { %5439 = vmatprep.subr.bf16.mxu1 %v6022_v14 }
 0xcfb   : > { %v5216_v59 = vpop.f32.mrb[36].mxu1 }
 0xcfc   : > { %v5217_v63 = vpop.f32.mrb[37].mxu1  ;;  %v5238_v5 = vpop.f32.mrb[28].mxu0 }
 0xcfd   : > { %v5218_v12 = vadd.f32 %v5217_v63, %v5216_v59  ;;  %v5219_v13 = vpop.f32.mrb[38].mxu1  ;;  %v5239_v15 = vpop.f32.mrb[29].mxu0  ;;  %v2890_v63 = vrot.slane %v4861_v7, %v6263_v56 }
 0xcfe   : > { %v5220_v16 = vpop.f32.mrb[39].mxu1  ;;  %v5240_v19 = vadd.f32 %v5239_v15, %v5238_v5  ;;  %v5241_v20 = vpop.f32.mrb[30].mxu0 }
 0xcff   : > { %v2767_v17 = vadd.f32 %v5218_v12, %v4824_v62  ;;  %v5242_v21 = vpop.f32.mrb[31].mxu0 }
 0xd01   : > { %v2807_v22 = vadd.f32 %v5240_v19, %v2767_v17  ;;  %v2882_v17 = vrot.slane %v4861_v7, %v6267_v58 }
 0xd03   : > { %v6634_v44 = vadd.f32 %v2807_v22, %v6383_v23 }
 0xd05   : > { %2817 = vadd.xlane.f32.xlu0 %v6634_v44 }
 0xd92   : > { %v2818_v23 = vpop.xlane.xlu0 %2817 }
 0xd93   : > { %v2819_v33 = vmul.f32 0.0078125, %v2818_v23 }
 0xd95   : > { %v2820_v35 = vsub.f32 %v6634_v44, %v2819_v33 }
 0xd97   : > { %v2821_v37 = vmul.f32 %v2820_v35, %v2820_v35 }
 0xd99   : > { %2822 = vadd.xlane.f32.xlu0 %v2821_v37 }
 0xe26   : > { %v2823_v52 = vpop.xlane.xlu0 %2822 }
 0xe27   : > { %v2824_v2 = vmul.f32 0.0078125, %v2823_v52 }
 0xe29   : > { %v2825_v55 = vadd.f32 1e-06, %v2824_v2 }
 0xe2b   : > { %5906 = vrsqrt.f32 %v2825_v55 }
 0xe35   : > { %v5907_v3 = vpop.eup %5906 }
 0xe36   : > { %v2827_v61 = vmul.f32 %v5907_v3, %v2820_v35 }
 0xe38   : > { %v2834_v1 = vmul.f32 %v4859_v60, %v2827_v61 }
 0xe3a   : > { %v2841_v6 = vadd.f32 %v4860_v0, %v2834_v1 }
 0xe3c   : > { %v2842_v4 = vpack.c.bf16 %v2841_v6, %v2841_v6 }
 0xe3e   : > { %3055 = vmatmul.mubr.bf16.vlgmr.msra.gmra.mrb[40].mxu1 %v2842_v4  ;;  %5436 = vmatmul.mubr.bf16.vlgmr.msra.gmra.mrb[32].mxu0 %v2842_v4 }
 0xe3f   : > { %5441 = vmatprep.mubr.msk.bf16.mxu1 %vm6024_vm0, %v6022_v14  ;;  %5465 = vmatprep.mubr.msk.bf16.mxu0 %vm6024_vm0, %v6022_v14 }
 0xf11   : > { %v3056_v8 = vpop.f32.mrb[40].mxu1  ;;  %v3097_v9 = vpop.f32.mrb[32].mxu0 }
 0xf12   : > { %v3058_v59 = vpop.f32.mrb[41].mxu1  ;;  %v5437_v62 = vpop.f32.mrb[33].mxu0  ;;  %v3098_v20 = vadd.f32 %v3097_v9, %v2890_v63  ;;  %v3057_v22 = vadd.f32 %v3056_v8, %v2882_v17 }
 0xf13   : > { %v3059_v5 = vadd.f32 %v3058_v59, %v2886_v57  ;;  %v3060_v12 = vpop.f32.mrb[42].mxu1  ;;  %v3100_v13 = vpop.f32.mrb[34].mxu0 }
 0xf14   : > { %v3061_v15 = vpop.f32.mrb[43].mxu1  ;;  %v5438_v16 = vpop.f32.mrb[35].mxu0  ;;  %v6665_v24 = vpack.c.bf16 %v3098_v20, %v3098_v20  ;;  %v3103_v25 = vpack.c.bf16 %v3057_v22, %v3057_v22 }
 0xf15   : > { %v3104_v19 = vpack.c.bf16 %v3059_v5, %v3059_v5 }
 0xf16   : > { %v3170_v11 = vsel %vm1520_vm2, %v6665_v24, 0 }
 0xf17   : > { %v3110_v21 = vsel %vm1455_vm1, %v3104_v19, 0 }
 0xf18   : > { %5440 = vmatpush3.bf16.xpose.msra.mxu1 %v3110_v21 }
 0xf19   : > { %5445 = vmatprep.subr.bf16.mxu1 %v6022_v14 }
 0xf1f   : > { %5442 = vmatmul.mubr.msk.bf16.vlgmr.msra.gmra.mrb[44].mxu1 %vm1455_vm1, %v3103_v25 }
 0xf20   : > { %5446 = vmatpush3.bf16.msra.mxu1 %v3170_v11  ;;  %5447 = vmatprep.mubr.msk.bf16.mxu1 %vm6024_vm0, %v6022_v14 }
 0xf21   : > { %5451 = vmatprep.subr.bf16.mxu1 %v6022_v14 }
 0xff2   : > { %v3146_v27 = vpop.f32.mrb[44].mxu1 }
 0xff3   : > { %v3152_v29 = vmul.f32 0.17677669, %v3146_v27  ;;  %v5443_v30 = vpop.f32.mrb[45].mxu1 }
 0xff4   : > { %v3149_v31 = vpop.f32.mrb[46].mxu1 }
 0xff5   : > { %v5444_v32 = vpop.f32.mrb[47].mxu1  ;;  %v3153_v23 = vadd.f32 %v3152_v29, %v6283_v18 }
 0xff7   : > { %v3154_v33 = vsel %vm1504_vm4, %v3153_v23, -inf }
 0xff8   : > { %3155 = vmax.xlane.f32.xlu0 %v3154_v33 }
0x100e   : > { %3216 = vrot.lane.b32.xlu0 %v3104_v19, %s6025_s1 }
0x1012   : > { %3441 = vrot.lane.b32.xlu0 %v3104_v19, %s6026_s2 }
0x1085   : > { %v3156_v35 = vpop.xlane.xlu0 %3155 }
0x1086   : > { %v3157_v37 = vsub.f32 %v3153_v23, %v3156_v35 }
0x1088   : > { %v3158_v38 = vmul.f32 1.442695, %v3157_v37 }
0x1089   : > { %v3217_v42 = vpop.permute.xlu0 %3216 }
0x108a   : > { %5908 = vpow2.f32 %v3158_v38  ;;  %v3222_v34 = vsel %vm1455_vm1, %v3217_v42, 0 }
0x108d   : > { %v3442_v48 = vpop.permute.xlu0 %3441 }
0x108e   : > { %v3447_v51 = vsel %vm1455_vm1, %v3442_v48, 0 }
0x1094   : > { %v5909_v39 = vpop.eup %5908 }
0x1095   : > { %v3160_v10 = vsel %vm1504_vm4, %v5909_v39, 0.0 }
0x1096   : > { %3161 = vadd.xlane.f32.xlu1 %v3160_v10 }
0x10a7   : > { %3213 = vrot.lane.b32.xlu1 %v3103_v25, %s6025_s1 }
0x10ab   : > { %3329 = vrot.lane.b32.xlu1 %v3104_v19, %s6028_s23 }
0x10af   : > { %3327 = vrot.lane.b32.xlu1 %v3103_v25, %s6028_s23 }
0x10b3   : > { %3439 = vrot.lane.b32.xlu1 %v3103_v25, %s6026_s2 }
0x1123   : > { %v3162_v40 = vpop.xlane.xlu1 %3161 }
0x1124   : > { %5910 = vrcp.f32 %v3162_v40 }
0x1127   : > { %v3214_v26 = vpop.permute.xlu1 %3213 }
0x112b   : > { %v3330_v28 = vpop.permute.xlu1 %3329 }
0x112c   : > { %v3335_v43 = vsel %vm1455_vm1, %v3330_v28, 0 }
0x112d   : > { %5464 = vmatpush3.bf16.xpose.msra.mxu0 %v3335_v43 }
0x112e   : > { %v5911_v45 = vpop.eup %5910  ;;  %5475 = vmatprep.subr.bf16.mxu0 %v6022_v14 }
0x112f   : > { %v3164_v46 = vmul.f32 %v5911_v45, %v5909_v39  ;;  %v3328_v50 = vpop.permute.xlu1 %3327 }
0x1131   : > { %v3165_v49 = vpack.c.bf16 %v3164_v46, %v3164_v46 }
0x1133   : > { %5448 = vmatmul.mubr.msk.bf16.vlgmr.msra.gmra.mrb[48].mxu1 %vm1504_vm4, %v3165_v49  ;;  %v3440_v41 = vpop.permute.xlu1 %3439 }
0x1134   : > { %5452 = vmatpush3.bf16.xpose.msra.mxu1 %v3222_v34  ;;  %5466 = vmatmul.mubr.msk.bf16.vlgmr.msra.gmra.mrb[36].mxu0 %vm1455_vm1, %v3328_v50 }
0x1135   : > { %5476 = vmatpush3.bf16.xpose.msra.mxu0 %v3447_v51  ;;  %5453 = vmatprep.mubr.msk.bf16.mxu1 %vm6024_vm0, %v6022_v14 }
0x1136   : > { %5477 = vmatprep.mubr.msk.bf16.mxu0 %vm6024_vm0, %v6022_v14  ;;  %5457 = vmatprep.subr.bf16.mxu1 %v6022_v14 }
0x1137   : > { %5487 = vmatprep.subr.bf16.mxu0 %v6022_v14 }
0x113b   : > { %5454 = vmatmul.mubr.msk.bf16.vlgmr.msra.gmra.mrb[52].mxu1 %vm1455_vm1, %v3214_v26 }
0x113c   : > { %5478 = vmatmul.mubr.msk.bf16.vlgmr.msra.gmra.mrb[40].mxu0 %vm1455_vm1, %v3440_v41  ;;  %5459 = vmatprep.mubr.msk.bf16.mxu1 %vm6024_vm0, %v6022_v14 }
0x113d   : > { %5503 = vmatprep.mubr.msk.bf16.mxu0 %vm6024_vm0, %v6022_v14 }
0x1206   : > { %v6700_v52 = vpop.f32.mrb[48].mxu1 }
0x1207   : > { %v5449_v2 = vpop.f32.mrb[49].mxu1  ;;  %v3371_v55 = vpop.f32.mrb[36].mxu0 }
0x1208   : > { %v3377_v3 = vmul.f32 0.17677669, %v3371_v55  ;;  %v3209_v60 = vpop.f32.mrb[50].mxu1  ;;  %v5467_v61 = vpop.f32.mrb[37].mxu0 }
0x1209   : > { %v5450_v0 = vpop.f32.mrb[51].mxu1  ;;  %v3374_v1 = vpop.f32.mrb[38].mxu0  ;;  %v5775_v60 = vld [vmem:[%s7076_s7 + $0x48] sm:$0xff]   ;;  %v5776_v61 = vld [vmem:[%s7076_s7 + $0x50] sm:$0xff]  }
0x120a   : > { %v5468_v6 = vpop.f32.mrb[39].mxu0  ;;  %v3378_v4 = vadd.f32 %v3377_v3, %v6283_v18  ;;  %v5774_v3 = vld [vmem:[%s7076_s7 + $0x40] sm:$0xff]   ;;  %v5777_v0 = vld [vmem:[%s7076_s7 + $0x58] sm:$0xff]  }
0x120b   : > { %5488 = vmatpush3.bf16.msra.mxu0 %v5774_v3  ;;  %v5778_v1 = vld [vmem:[%s7076_s7 + $0x60] sm:$0xff]   ;;  %v5779_v6 = vld [vmem:[%s7076_s7 + $0x68] sm:$0xff]  }
0x120c   : > { %v3379_v7 = vsel %vm1504_vm4, %v3378_v4, -inf  ;;  %5489 = vmatprep.subr.bf16.mxu0 %v6022_v14  ;;  %v5814_v3 = vld [vmem:[%s7080_s11 + $0x1a4] ss:$16 sps:$4 sm:$0xff]  }
0x120d   : > { %3380 = vmax.xlane.f32.xlu1 %v3379_v7 }
0x120e   : > { %v3258_v57 = vpop.f32.mrb[52].mxu1 }
0x120f   : > { %v3264_v8 = vmul.f32 0.17677669, %v3258_v57  ;;  %v5455_v9 = vpop.f32.mrb[53].mxu1  ;;  %v3483_v59 = vpop.f32.mrb[40].mxu0  ;;  %5490 = vmatpush3.bf16.msra.mxu0 %v5775_v60  ;;  %v5817_v60 = vld [vmem:[%s7080_s11 + $0x1ac] ss:$16 sps:$4 sm:$0xff]  }
0x1210   : > { %v3489_v62 = vmul.f32 0.17677669, %v3483_v59  ;;  %v3261_v63 = vpop.f32.mrb[54].mxu1  ;;  %v5479_v5 = vpop.f32.mrb[41].mxu0  ;;  %5491 = vmatprep.subr.bf16.mxu0 %v6022_v14  ;;  %v5781_v59 = vld [vmem:[%s7076_s7 + $0x78] sm:$0xff]  }
0x1211   : > { %v5456_v12 = vpop.f32.mrb[55].mxu1  ;;  %v3486_v13 = vpop.f32.mrb[42].mxu0  ;;  %v3265_v15 = vadd.f32 %v3264_v8, %v6283_v18 }
0x1212   : > { %v5480_v16 = vpop.f32.mrb[43].mxu0  ;;  %v3490_v19 = vadd.f32 %v3489_v62, %v6283_v18 }
0x1213   : > { %v3266_v17 = vsel %vm1504_vm4, %v3265_v15, -inf  ;;  %5492 = vmatpush3.bf16.msra.mxu0 %v5776_v61  ;;  %v5812_v61 = vld [vmem:[%s7080_s11 + $0x1a0] ss:$16 sps:$4 sm:$0xff]  }
0x1214   : > { %3267 = vmax.xlane.f32.xlu0 %v3266_v17  ;;  %v3491_v20 = vsel %vm1504_vm4, %v3490_v19, -inf  ;;  %5493 = vmatprep.subr.bf16.mxu0 %v6022_v14 }
0x1217   : > { %5494 = vmatpush3.bf16.msra.mxu0 %v5777_v0  ;;  %v5815_v0 = vld [vmem:[%s7080_s11 + $0x1a8] ss:$16 sps:$4 sm:$0xff]  }
0x1218   : > { %3492 = vmax.xlane.f32.xlu0 %v3491_v20  ;;  %5495 = vmatprep.subr.bf16.mxu0 %v6022_v14 }
0x121b   : > { %5496 = vmatpush3.bf16.msra.mxu0 %v5778_v1  ;;  %v5818_v1 = vld [vmem:[%s7080_s11 + $0x1c0] ss:$16 sps:$4 sm:$0xff]  }
0x121c   : > { %5497 = vmatprep.subr.bf16.mxu0 %v6022_v14 }
0x121f   : > { %5498 = vmatpush3.bf16.msra.mxu0 %v5779_v6  ;;  %v5820_v6 = vld [vmem:[%s7080_s11 + $0x1c4] ss:$16 sps:$4 sm:$0xff]  }
0x1220   : > { %5499 = vmatprep.subr.bf16.mxu0 %v6022_v14 }
0x129a   : > { %v3381_v21 = vpop.xlane.xlu1 %3380 }
0x129b   : > { %v3382_v22 = vsub.f32 %v3378_v4, %v3381_v21  ;;  %v5780_v4 = vld [vmem:[%s7076_s7 + $0x70] sm:$0xff]  }
0x129c   : > { %5500 = vmatpush3.bf16.msra.mxu0 %v5780_v4  ;;  %v5821_v4 = vld [vmem:[%s7080_s11 + $0x1c8] ss:$16 sps:$4 sm:$0xff]  }
0x129d   : > { %v3383_v25 = vmul.f32 1.442695, %v3382_v22  ;;  %5501 = vmatprep.subr.bf16.mxu0 %v6022_v14 }
0x129f   : > { %5912 = vpow2.f32 %v3383_v25 }
0x12a0   : > { %5502 = vmatpush3.bf16.msra.mxu0 %v5781_v59  ;;  %v5827_v59 = vld [vmem:[%s7080_s11 + $0x1e8] ss:$16 sps:$4 sm:$0xff]  }
0x12a1   : > { %v3268_v11 = vpop.xlane.xlu0 %3267 }
0x12a2   : > { %v3269_v27 = vsub.f32 %v3265_v15, %v3268_v11 }
0x12a4   : > { %v3270_v29 = vmul.f32 1.442695, %v3269_v27 }
0x12a5   : > { %v3493_v30 = vpop.xlane.xlu0 %3492 }
0x12a6   : > { %5914 = vpow2.f32 %v3270_v29  ;;  %v3494_v31 = vsub.f32 %v3490_v19, %v3493_v30  ;;  %v4911_v29 = vld [vmem:[%s7077_s8 + $0x1] ss:$0 sm:$0xff] }
0x12a8   : > { %v3495_v32 = vmul.f32 1.442695, %v3494_v31 }
0x12a9   : > { %v5913_v23 = vpop.eup %5912 }
0x12aa   : > { %5916 = vpow2.f32 %v3495_v32  ;;  %v3385_v33 = vsel %vm1504_vm4, %v5913_v23, 0.0 }
0x12ab   : > { %3386 = vadd.xlane.f32.xlu0 %v3385_v33 }
0x12b0   : > { %v5915_v18 = vpop.eup %5914 }
0x12b1   : > { %v3272_v35 = vsel %vm1504_vm4, %v5915_v18, 0.0 }
0x12b2   : > { %3273 = vadd.xlane.f32.xlu0 %v3272_v35  ;;  %v5785_v35 = vld [vmem:[%s7080_s11 + $0x108] ss:$16 sps:$4 sm:$0xff]  }
0x12b4   : > { %v5917_v37 = vpop.eup %5916 }
0x12b5   : > { %v3497_v38 = vsel %vm1504_vm4, %v5917_v37, 0.0 }
0x12b6   : > { %3498 = vadd.xlane.f32.xlu1 %v3497_v38  ;;  %v5793_v38 = vld [vmem:[%s7080_s11 + $0x12c] ss:$16 sps:$4 sm:$0xff]  }
0x12c7   : > { %3391 = vrot.lane.b32.xlu1 %v6665_v24, %s6028_s23 }
0x12c8   : > { %3279 = vrot.lane.b32.xlu0 %v6665_v24, %s6025_s1 }
0x12cb   : > { %3503 = vrot.lane.b32.xlu1 %v6665_v24, %s6026_s2 }
0x1338   : > { %v3387_v39 = vpop.xlane.xlu0 %3386 }
0x133f   : > { %v3274_v10 = vpop.xlane.xlu0 %3273 }
0x1340   : > { %5918 = vrcp.f32 %v3274_v10  ;;  %v5791_v10 = vld [vmem:[%s7080_s11 + $0x128] ss:$16 sps:$4 sm:$0xff]  }
0x1341   : > { %5920 = vrcp.f32 %v3387_v39  ;;  %v5788_v39 = vld [vmem:[%s7080_s11 + $0x120] ss:$16 sps:$4 sm:$0xff]  }
0x1343   : > { %v3280_v40 = vpop.permute.xlu0 %3279  ;;  %v3499_v42 = vpop.xlane.xlu1 %3498 }
0x1344   : > { %v3285_v26 = vsel %vm1520_vm2, %v3280_v40, 0  ;;  %5922 = vrcp.f32 %v3499_v42  ;;  %v5796_v40 = vld [vmem:[%s7080_s11 + $0x144] ss:$16 sps:$4 sm:$0xff]   ;;  %v5794_v42 = vld [vmem:[%s7080_s11 + $0x140] ss:$16 sps:$4 sm:$0xff]  }
0x1345   : > { %5458 = vmatpush3.bf16.msra.mxu1 %v3285_v26  ;;  %v5799_v26 = vld [vmem:[%s7080_s11 + $0x14c] ss:$16 sps:$4 sm:$0xff]  }
0x1346   : > { %5469 = vmatprep.subr.bf16.mxu1 %v6022_v14 }
0x1347   : > { %v3392_v45 = vpop.permute.xlu1 %3391 }
0x1348   : > { %v3397_v49 = vsel %vm1520_vm2, %v3392_v45, 0 }
0x134a   : > { %v5919_v28 = vpop.eup %5918 }
0x134b   : > { %v3276_v43 = vmul.f32 %v5919_v28, %v5915_v18  ;;  %v5921_v48 = vpop.eup %5920  ;;  %v3504_v34 = vpop.permute.xlu1 %3503  ;;  %v5782_v18 = vld [vmem:[%s7080_s11 + $0x100] ss:$16 sps:$4 sm:$0xff]   ;;  %v5797_v28 = vld [vmem:[%s7080_s11 + $0x148] ss:$16 sps:$4 sm:$0xff]  }
0x134c   : > { %v3389_v24 = vmul.f32 %v5921_v48, %v5913_v23  ;;  %v3509_v41 = vsel %vm1520_vm2, %v3504_v34, 0  ;;  %v5800_v34 = vld [vmem:[%s7080_s11 + $0x160] ss:$16 sps:$4 sm:$0xff]  }
0x134d   : > { %v3277_v46 = vpack.c.bf16 %v3276_v43, %v3276_v43 }
0x134e   : > { %v3390_v50 = vpack.c.bf16 %v3389_v24, %v3389_v24  ;;  %v5923_v51 = vpop.eup %5922  ;;  %v5805_v24 = vld [vmem:[%s7080_s11 + $0x16c] ss:$16 sps:$4 sm:$0xff]  }
0x134f   : > { %5460 = vmatmul.mubr.msk.bf16.vlgmr.msra.gmra.mrb[56].mxu1 %vm1504_vm4, %v3277_v46  ;;  %v3501_v2 = vmul.f32 %v5923_v51, %v5917_v37  ;;  %v5790_v37 = vld [vmem:[%s7080_s11 + $0x124] ss:$16 sps:$4 sm:$0xff]  }
0x1350   : > { %5470 = vmatpush3.bf16.msra.mxu1 %v3397_v49  ;;  %5471 = vmatprep.mubr.msk.bf16.mxu1 %vm6024_vm0, %v6022_v14  ;;  %v5802_v49 = vld [vmem:[%s7080_s11 + $0x164] ss:$16 sps:$4 sm:$0xff]  }
0x1351   : > { %5481 = vmatprep.subr.bf16.mxu1 %v6022_v14  ;;  %v3502_v55 = vpack.c.bf16 %v3501_v2, %v3501_v2  ;;  %v5808_v51 = vld [vmem:[%s7080_s11 + $0x184] ss:$16 sps:$4 sm:$0xff]   ;;  %v5806_v2 = vld [vmem:[%s7080_s11 + $0x180] ss:$16 sps:$4 sm:$0xff]  }
0x1357   : > { %5472 = vmatmul.mubr.msk.bf16.vlgmr.msra.gmra.mrb[60].mxu1 %vm1504_vm4, %v3390_v50  ;;  %v5803_v50 = vld [vmem:[%s7080_s11 + $0x168] ss:$16 sps:$4 sm:$0xff]  }
0x1358   : > { %5482 = vmatpush3.bf16.msra.mxu1 %v3509_v41  ;;  %5483 = vmatprep.mubr.msk.bf16.mxu1 %vm6024_vm0, %v6022_v14  ;;  %v5811_v41 = vld [vmem:[%s7080_s11 + $0x18c] ss:$16 sps:$4 sm:$0xff]  }
0x135f   : > { %5484 = vmatmul.mubr.msk.bf16.vlgmr.msra.gmra.mrb[64].mxu1 %vm1504_vm4, %v3502_v55  ;;  %v5809_v55 = vld [vmem:[%s7080_s11 + $0x188] ss:$16 sps:$4 sm:$0xff]  }
0x1360   : > { %3959 = vmatprep.mubr.bf16.mxu1 %v6023_v36 }
0x1422   : > { %v3321_v7 = vpop.f32.mrb[56].mxu1 }
0x1423   : > { %3552 = vrot.lane.b32.xlu1 %v3321_v7, %s6026_s2  ;;  %v5461_v57 = vpop.f32.mrb[57].mxu1  ;;  %v5823_v7 = vld [vmem:[%s7080_s11 + $0x1cc] ss:$16 sps:$4 sm:$0xff]  }
0x1424   : > { %v3324_v8 = vpop.f32.mrb[58].mxu1  ;;  %v5826_v57 = vld [vmem:[%s7080_s11 + $0x1e4] ss:$16 sps:$4 sm:$0xff]  }
0x1425   : > { %v5462_v9 = vpop.f32.mrb[59].mxu1  ;;  %v5829_v8 = vld [vmem:[%s7080_s11 + $0x1ec] ss:$16 sps:$4 sm:$0xff]  }
0x1426   : > { %v5824_v9 = vld [vmem:[%s7080_s11 + $0x1e0] ss:$16 sps:$4 sm:$0xff]  }
0x142a   : > { %v3433_v62 = vpop.f32.mrb[60].mxu1 }
0x142b   : > { %3556 = vrot.lane.b32.xlu0 %v3433_v62, %s6028_s23  ;;  %v5473_v63 = vpop.f32.mrb[61].mxu1 }
0x142c   : > { %v3436_v5 = vpop.f32.mrb[62].mxu1 }
0x142d   : > { %v5474_v12 = vpop.f32.mrb[63].mxu1 }
0x1432   : > { %v3545_v13 = vpop.f32.mrb[64].mxu1 }
0x1433   : > { %3560 = vrot.lane.b32.xlu1 %v3545_v13, %s6025_s1  ;;  %v5485_v15 = vpop.f32.mrb[65].mxu1  ;;  %v4922_v13 = vld [vmem:[%s7078_s9 + $0x1] ss:$0 sm:$0xff] }
0x1434   : > { %v3548_v16 = vpop.f32.mrb[66].mxu1 }
0x1435   : > { %v5486_v17 = vpop.f32.mrb[67].mxu1  ;;  %v4923_v16 = vld [vmem:[%s7079_s10 + $0x1] ss:$0 sm:$0xff] }
0x1495   : > { %v3553_v19 = vpop.permute.xlu1 %3552 }
0x1496   : > { %v3563_v21 = vsel %vm1455_vm1, %v6700_v52, %v3553_v19 }
0x149d   : > { %v3557_v20 = vpop.permute.xlu0 %3556 }
0x149e   : > { %v3564_v22 = vsel %vm1916_vm5, %v3563_v21, %v3557_v20  ;;  %v5830_v21 = vld [vmem:[%s7082_s13 + $0x140] sm:$0xff]  }
0x14a5   : > { %v3561_v25 = vpop.permute.xlu1 %3560 }
0x14a6   : > { %v3565_v11 = vsel %vm1918_vm6, %v3564_v22, %v3561_v25  ;;  %v5831_v22 = vld [vmem:[%s7082_s13 + $0x1c0] sm:$0xff]  }
0x14a7   : > { %v3566_v27 = vpack.c.bf16 %v3565_v11, %v3565_v11  ;;  %v5832_v25 = vld [vmem:[%s7082_s13 + $0x100] sm:$0xff]  }
0x14a8   : > { %v5833_v11 = vld [vmem:[%s7082_s13 + $0x180] sm:$0xff]  }
0x14a9   : > { %5504 = vmatmul.mubr.bf16.vlgmr.msra.gmra.mrb[44].mxu0 %v3566_v27  ;;  %v5834_v27 = vld [vmem:[%s7082_s13 + $0x148] sm:$0xff]  }
0x14aa   : > { %4000 = vmatprep.mubr.bf16.mxu0 %v6023_v36  ;;  %v5784_v36 = vld [vmem:[%s7080_s11 + $0x104] ss:$16 sps:$4 sm:$0xff]  }
0x14ab   : > { %3927 = vmatprep.subr.bf16.mxu1 %v5784_v36  ;;  %v5842_v36 = vld [vmem:[%s7082_s13 + $0x158] sm:$0xff]  }
0x14ac   : > { %3928 = vmatpush1.bf16.msra.mxu1 %v5782_v18  ;;  %v5841_v18 = vld [vmem:[%s7082_s13 + $0x190] sm:$0xff]  }
0x14ad   : > { %3929 = vmatprep.subr.bf16.mxu1 %v5790_v37  ;;  %v5845_v37 = vld [vmem:[%s7082_s13 + $0x198] sm:$0xff]  }
0x14b0   : > { %3930 = vmatpush1.bf16.msra.mxu1 %v5788_v39  ;;  %v5847_v39 = vld [vmem:[%s7082_s13 + $0x1e0] sm:$0xff]  }
0x14b1   : > { %3931 = vmatprep.subr.bf16.mxu1 %v5796_v40  ;;  %v5849_v40 = vld [vmem:[%s7082_s13 + $0x1a0] sm:$0xff]  }
0x14b4   : > { %3932 = vmatpush1.bf16.msra.mxu1 %v5794_v42  ;;  %v5851_v42 = vld [vmem:[%s7082_s13 + $0x1e8] sm:$0xff]  }
0x14b5   : > { %3933 = vmatprep.subr.bf16.mxu1 %v5802_v49  ;;  %v5857_v49 = vld [vmem:[%s7082_s13 + $0x1b0] sm:$0xff]  }
0x14b8   : > { %3934 = vmatpush1.bf16.msra.mxu1 %v5800_v34  ;;  %v5859_v34 = vld [vmem:[%s7082_s13 + $0x1f8] sm:$0xff]  }
0x14b9   : > { %3935 = vmatprep.subr.bf16.mxu1 %v5808_v51  ;;  %v5861_v51 = vld [vmem:[%s7082_s13 + $0x1b8] sm:$0xff]  }
0x14bc   : > { %3936 = vmatpush1.bf16.msra.mxu1 %v5806_v2 }
0x14bd   : > { %3937 = vmatprep.subr.bf16.mxu1 %v5814_v3 }
0x14c0   : > { %3938 = vmatpush1.bf16.msra.mxu1 %v5812_v61 }
0x14c1   : > { %3939 = vmatprep.subr.bf16.mxu1 %v5820_v6 }
0x14c4   : > { %3940 = vmatpush1.bf16.msra.mxu1 %v5818_v1 }
0x14c5   : > { %3941 = vmatprep.subr.bf16.mxu1 %v5826_v57 }
0x14c8   : > { %3942 = vmatpush1.bf16.msra.mxu1 %v5824_v9 }
0x14c9   : > { %5278 = vmatprep.subr.bf16.mxu1 %v5830_v21 }
0x157c   : > { %v3674_v30 = vpop.f32.mrb[44].mxu0 }
0x157d   : > { %v3675_v31 = vadd.f32 %v4911_v29, %v3674_v30  ;;  %v5505_v32 = vpop.f32.mrb[45].mxu0  ;;  %v5835_v29 = vld [vmem:[%s7082_s13 + $0x1c8] sm:$0xff]  }
0x157e   : > { %v3677_v23 = vpop.f32.mrb[46].mxu0  ;;  %v5836_v30 = vld [vmem:[%s7082_s13 + $0x108] sm:$0xff]   ;;  %v5838_v32 = vld [vmem:[%s7082_s13 + $0x150] sm:$0xff]  }
0x157f   : > { %v6773_v33 = vadd.f32 %v3675_v31, %v6634_v44  ;;  %v5506_v52 = vpop.f32.mrb[47].mxu0  ;;  %v5787_v44 = vld [vmem:[%s7080_s11 + $0x10c] ss:$16 sps:$4 sm:$0xff]   ;;  %v5839_v23 = vld [vmem:[%s7082_s13 + $0x1d0] sm:$0xff]  }
0x1580   : > { %3968 = vmatprep.subr.bf16.mxu0 %v5787_v44  ;;  %v5837_v31 = vld [vmem:[%s7082_s13 + $0x188] sm:$0xff]   ;;  %v5840_v52 = vld [vmem:[%s7082_s13 + $0x110] sm:$0xff]   ;;  %v5844_v44 = vld [vmem:[%s7082_s13 + $0x118] sm:$0xff]  }
0x1581   : > { %3685 = vadd.xlane.f32.xlu0 %v6773_v33  ;;  %3969 = vmatpush1.bf16.msra.mxu0 %v5785_v35  ;;  %v5843_v35 = vld [vmem:[%s7082_s13 + $0x1d8] sm:$0xff]  }
0x1582   : > { %3970 = vmatprep.subr.bf16.mxu0 %v5793_v38  ;;  %v5846_v38 = vld [vmem:[%s7082_s13 + $0x160] sm:$0xff]  }
0x1585   : > { %3971 = vmatpush1.bf16.msra.mxu0 %v5791_v10  ;;  %v5848_v10 = vld [vmem:[%s7082_s13 + $0x120] sm:$0xff]  }
0x1586   : > { %3972 = vmatprep.subr.bf16.mxu0 %v5799_v26  ;;  %v5850_v26 = vld [vmem:[%s7082_s13 + $0x168] sm:$0xff]  }
0x1589   : > { %3973 = vmatpush1.bf16.msra.mxu0 %v5797_v28  ;;  %v5852_v28 = vld [vmem:[%s7082_s13 + $0x128] sm:$0xff]  }
0x158a   : > { %3974 = vmatprep.subr.bf16.mxu0 %v5805_v24  ;;  %v5858_v24 = vld [vmem:[%s7082_s13 + $0x178] sm:$0xff]  }
0x158d   : > { %3975 = vmatpush1.bf16.msra.mxu0 %v5803_v50  ;;  %v5860_v50 = vld [vmem:[%s7082_s13 + $0x138] sm:$0xff]  }
0x158e   : > { %3976 = vmatprep.subr.bf16.mxu0 %v5811_v41  ;;  %v4956_v41 = vld [vmem:[%s7081_s12 + $0x4] sm:$0xf] }
0x158f   : > { %v3750_v2 = vrot.slane %v4956_v41, %v6267_v58  ;;  %v3754_v3 = vrot.slane %v4956_v41, %v6257_v54 }
0x1591   : > { %3977 = vmatpush1.bf16.msra.mxu0 %v5809_v55  ;;  %v3758_v55 = vrot.slane %v4956_v41, %v6263_v56 }
0x1592   : > { %3978 = vmatprep.subr.bf16.mxu0 %v5817_v60  ;;  %v3762_v60 = vrot.slane %v4956_v41, %v2109_v47 }
0x1595   : > { %3979 = vmatpush1.bf16.msra.mxu0 %v5815_v0 }
0x1596   : > { %3980 = vmatprep.subr.bf16.mxu0 %v5823_v7 }
0x1599   : > { %3981 = vmatpush1.bf16.msra.mxu0 %v5821_v4 }
0x159a   : > { %3982 = vmatprep.subr.bf16.mxu0 %v5829_v8 }
0x159d   : > { %3983 = vmatpush1.bf16.msra.mxu0 %v5827_v59 }
0x159e   : > { %5300 = vmatprep.subr.bf16.mxu0 %v5831_v22 }
0x160e   : > { %v3686_v43 = vpop.xlane.xlu0 %3685 }
0x160f   : > { %v3687_v45 = vmul.f32 0.0078125, %v3686_v43  ;;  %v5853_v43 = vld [vmem:[%s7082_s13 + $0x1a8] sm:$0xff]  }
0x1611   : > { %v3688_v46 = vsub.f32 %v6773_v33, %v3687_v45  ;;  %v5854_v45 = vld [vmem:[%s7082_s13 + $0x170] sm:$0xff]  }
0x1613   : > { %v3689_v48 = vmul.f32 %v3688_v46, %v3688_v46 }
0x1615   : > { %3690 = vadd.xlane.f32.xlu1 %v3689_v48  ;;  %v5856_v48 = vld [vmem:[%s7082_s13 + $0x130] sm:$0xff]  }
0x16a2   : > { %v3691_v62 = vpop.xlane.xlu1 %3690 }
0x16a3   : > { %v3692_v63 = vmul.f32 0.0078125, %v3691_v62 }
0x16a5   : > { %v3693_v5 = vadd.f32 1e-06, %v3692_v63 }
0x16a7   : > { %5924 = vrsqrt.f32 %v3693_v5 }
0x16b1   : > { %v5925_v12 = vpop.eup %5924 }
0x16b2   : > { %v3695_v15 = vmul.f32 %v5925_v12, %v3688_v46  ;;  %v5855_v46 = vld [vmem:[%s7082_s13 + $0x1f0] sm:$0xff]  }
0x16b4   : > { %v3702_v17 = vmul.f32 %v4922_v13, %v3695_v15 }
0x16b6   : > { %v3709_v19 = vadd.f32 %v4923_v16, %v3702_v17 }
0x16b8   : > { %v3710_v20 = vpack.c.bf16 %v3709_v19, %v3709_v19 }
0x16ba   : > { %3960 = vmatmul.mubr.bf16.vlgmr.msra.gmra.mrb[68].mxu1 %v3710_v20  ;;  %4001 = vmatmul.mubr.bf16.vlgmr.msra.gmra.mrb[48].mxu0 %v3710_v20 }
0x16bb   : > { %5279 = vmatpush3.bf16.msra.mxu1 %v5832_v25  ;;  %5301 = vmatpush3.bf16.msra.mxu0 %v5833_v11 }
0x16bc   : > { %5280 = vmatprep.subr.bf16.mxu1 %v5834_v27  ;;  %5302 = vmatprep.subr.bf16.mxu0 %v5835_v29 }
0x16bf   : > { %5281 = vmatpush3.bf16.msra.mxu1 %v5836_v30  ;;  %5303 = vmatpush3.bf16.msra.mxu0 %v5837_v31 }
0x16c0   : > { %5282 = vmatprep.subr.bf16.mxu1 %v5838_v32  ;;  %5304 = vmatprep.subr.bf16.mxu0 %v5839_v23 }
0x16c3   : > { %5283 = vmatpush3.bf16.msra.mxu1 %v5840_v52  ;;  %5305 = vmatpush3.bf16.msra.mxu0 %v5841_v18 }
0x16c4   : > { %5284 = vmatprep.subr.bf16.mxu1 %v5842_v36  ;;  %5306 = vmatprep.subr.bf16.mxu0 %v5843_v35 }
0x16c7   : > { %5285 = vmatpush3.bf16.msra.mxu1 %v5844_v44  ;;  %5307 = vmatpush3.bf16.msra.mxu0 %v5845_v37 }
0x16c8   : > { %5286 = vmatprep.subr.bf16.mxu1 %v5846_v38  ;;  %5308 = vmatprep.subr.bf16.mxu0 %v5847_v39 }
0x16cb   : > { %5287 = vmatpush3.bf16.msra.mxu1 %v5848_v10  ;;  %5309 = vmatpush3.bf16.msra.mxu0 %v5849_v40 }
0x16cc   : > { %5288 = vmatprep.subr.bf16.mxu1 %v5850_v26  ;;  %5310 = vmatprep.subr.bf16.mxu0 %v5851_v42 }
0x16cf   : > { %5289 = vmatpush3.bf16.msra.mxu1 %v5852_v28  ;;  %5311 = vmatpush3.bf16.msra.mxu0 %v5853_v43 }
0x16d0   : > { %5290 = vmatprep.subr.bf16.mxu1 %v5854_v45  ;;  %5312 = vmatprep.subr.bf16.mxu0 %v5855_v46 }
0x16d3   : > { %5291 = vmatpush3.bf16.msra.mxu1 %v5856_v48  ;;  %5313 = vmatpush3.bf16.msra.mxu0 %v5857_v49 }
0x16d4   : > { %5292 = vmatprep.subr.bf16.mxu1 %v5858_v24  ;;  %5314 = vmatprep.subr.bf16.mxu0 %v5859_v34 }
0x16d7   : > { %5293 = vmatpush3.bf16.msra.mxu1 %v5860_v50  ;;  %5315 = vmatpush3.bf16.msra.mxu0 %v5861_v51 }
0x16d8   : > { %5507 = vmatprep.subr.bf16.mxu1 %v6022_v14 }
0x178d   : > { %v3961_v61 = vpop.f32.mrb[68].mxu1  ;;  %v4002_v0 = vpop.f32.mrb[48].mxu0 }
0x178e   : > { %v6984_v1 = vadd.f32 %v3961_v61, %v3750_v2  ;;  %v6986_v6 = vadd.f32 %v4002_v0, %v3758_v55  ;;  %v3963_v4 = vpop.f32.mrb[69].mxu1  ;;  %v4004_v7 = vpop.f32.mrb[49].mxu0 }
0x178f   : > { %v6988_v57 = vadd.f32 %v3963_v4, %v3754_v3  ;;  %v6990_v8 = vadd.f32 %v4004_v7, %v3762_v60  ;;  %v3965_v58 = vpop.f32.mrb[70].mxu1  ;;  %v4006_v9 = vpop.f32.mrb[50].mxu0 }
0x1790   : > { %v6993_v56 = vmul.f32 0.70710677, %v6984_v1  ;;  %v6996_v53 = vmul.f32 0.70710677, %v6986_v6  ;;  %v3966_v15 = vpop.f32.mrb[71].mxu1  ;;  %v4007_v16 = vpop.f32.mrb[51].mxu0 }
0x1791   : > { %v6999_v54 = vmul.f32 0.70710677, %v6988_v57  ;;  %v7002_v47 = vmul.f32 0.70710677, %v6990_v8 }
0x1792   : > { %v4017_v59 = vand.u32 2147483647, %v6993_v56  ;;  %v4019_v62 = vand.u32 2147483647, %v6996_v53  ;;  %vm4097_vm11 = vcmp.lt.f32.partialorder %v6993_v56, 0.0  ;;  %vm4099_vm12 = vcmp.lt.f32.partialorder %v6996_v53, 0.0 }
0x1793   : > { %v4018_v63 = vand.u32 2147483647, %v6999_v54  ;;  %v4020_v5 = vand.u32 2147483647, %v7002_v47  ;;  %vm4098_vm13 = vcmp.lt.f32.partialorder %v6999_v54, 0.0  ;;  %vm4100_vm14 = vcmp.lt.f32.partialorder %v7002_v47, 0.0 }
0x1794   : > { %v4021_v12 = vmul.f32 0.3275911, %v4017_v59  ;;  %v4023_v13 = vmul.f32 0.3275911, %v4019_v62  ;;  %v4073_v11 = vmul.f32 %v4017_v59, %v4017_v59  ;;  %v4075_v27 = vmul.f32 %v4019_v62, %v4019_v62 }
0x1795   : > { %v4022_v17 = vmul.f32 0.3275911, %v4018_v63  ;;  %v4024_v21 = vmul.f32 0.3275911, %v4020_v5  ;;  %v4074_v31 = vmul.f32 %v4018_v63, %v4018_v63  ;;  %v4076_v36 = vmul.f32 %v4020_v5, %v4020_v5 }
0x1796   : > { %v4025_v19 = vadd.f32 1.0, %v4021_v12  ;;  %v4027_v20 = vadd.f32 1.0, %v4023_v13  ;;  %v4077_v30 = vsub.f32 0.0, %v4073_v11  ;;  %v4079_v52 = vsub.f32 0.0, %v4075_v27 }
0x1797   : > { %v4026_v22 = vadd.f32 1.0, %v4022_v17  ;;  %v4028_v25 = vadd.f32 1.0, %v4024_v21  ;;  %v4078_v39 = vsub.f32 0.0, %v4074_v31  ;;  %v4080_v43 = vsub.f32 0.0, %v4076_v36 }
0x1798   : > { %5926 = vrcp.f32 %v4025_v19  ;;  %v4081_v37 = vmul.f32 1.442695, %v4077_v30  ;;  %v4085_v40 = vmul.f32 1.442695, %v4079_v52  ;;  %v4011_v53 = vmul.f32 0.5, %v6986_v6 }
0x1799   : > { %5928 = vrcp.f32 %v4027_v20  ;;  %v4083_v24 = vmul.f32 1.442695, %v4078_v39  ;;  %v4087_v2 = vmul.f32 1.442695, %v4080_v43  ;;  %v4010_v43 = vmul.f32 0.5, %v6988_v57 }
0x179a   : > { %5930 = vrcp.f32 %v4026_v22  ;;  %v5054_v6 = vld [vmem:[%s7083_s14 + $0x1] ss:$0 sm:$0xff] }
0x179b   : > { %5932 = vrcp.f32 %v4028_v25 }
0x179c   : > { %5934 = vpow2.f32 %v4081_v37 }
0x179d   : > { %5936 = vpow2.f32 %v4085_v40 }
0x179e   : > { %5938 = vpow2.f32 %v4083_v24 }
0x179f   : > { %5940 = vpow2.f32 %v4087_v2 }
0x17a2   : > { %v5927_v29 = vpop.eup %5926 }
0x17a3   : > { %v5929_v32 = vpop.eup %5928  ;;  %v4037_v23 = vmul.f32 1.0614054, %v5927_v29 }
0x17a4   : > { %v4039_v18 = vmul.f32 1.0614054, %v5929_v32  ;;  %v5931_v44 = vpop.eup %5930 }
0x17a5   : > { %v4041_v35 = vadd.f32 -1.4531521, %v4037_v23  ;;  %v4038_v26 = vmul.f32 1.0614054, %v5931_v44  ;;  %v5933_v42 = vpop.eup %5932 }
0x17a6   : > { %v4043_v38 = vadd.f32 -1.4531521, %v4039_v18  ;;  %v4040_v48 = vmul.f32 1.0614054, %v5933_v42  ;;  %v5935_v15 = vpop.eup %5934 }
0x17a7   : > { %v4045_v10 = vmul.f32 %v5927_v29, %v4041_v35  ;;  %v4042_v46 = vadd.f32 -1.4531521, %v4038_v26  ;;  %v5937_v17 = vpop.eup %5936 }
0x17a8   : > { %v4047_v28 = vmul.f32 %v5929_v32, %v4043_v38  ;;  %v4044_v51 = vadd.f32 -1.4531521, %v4040_v48  ;;  %v5939_v30 = vpop.eup %5938  ;;  %v4012_v48 = vmul.f32 0.5, %v6990_v8 }
0x17a9   : > { %v4049_v45 = vadd.f32 1.4214138, %v4045_v10  ;;  %v4046_v50 = vmul.f32 %v5931_v44, %v4042_v46  ;;  %v5941_v36 = vpop.eup %5940 }
0x17aa   : > { %v4051_v49 = vadd.f32 1.4214138, %v4047_v28  ;;  %v4048_v60 = vmul.f32 %v5933_v42, %v4044_v51 }
0x17ab   : > { %v4053_v34 = vmul.f32 %v5927_v29, %v4049_v45  ;;  %v4050_v3 = vadd.f32 1.4214138, %v4046_v50 }
0x17ac   : > { %v4055_v41 = vmul.f32 %v5929_v32, %v4051_v49  ;;  %v4052_v7 = vadd.f32 1.4214138, %v4048_v60 }
0x17ad   : > { %v4057_v55 = vadd.f32 -0.28449672, %v4053_v34  ;;  %v4054_v4 = vmul.f32 %v5931_v44, %v4050_v3 }
0x17ae   : > { %v4059_v61 = vadd.f32 -0.28449672, %v4055_v41  ;;  %v4056_v62 = vmul.f32 %v5933_v42, %v4052_v7 }
0x17af   : > { %v4061_v0 = vmul.f32 %v5927_v29, %v4057_v55  ;;  %v4058_v59 = vadd.f32 -0.28449672, %v4054_v4 }
0x17b0   : > { %v4063_v58 = vmul.f32 %v5929_v32, %v4059_v61  ;;  %v4060_v13 = vadd.f32 -0.28449672, %v4056_v62  ;;  %v5863_v62 = vld [vmem:[%s7086_s17 + $0x8] sm:$0xff]  }
0x17b1   : > { %v4065_v9 = vadd.f32 0.2548296, %v4061_v0  ;;  %v4062_v12 = vmul.f32 %v5931_v44, %v4058_v59  ;;  %v5862_v59 = vld [vmem:[%s7086_s17] sm:$0xff]  }
0x17b2   : > { %v4067_v63 = vadd.f32 0.2548296, %v4063_v58  ;;  %v4064_v21 = vmul.f32 %v5933_v42, %v4060_v13 }
0x17b3   : > { %v4069_v5 = vmul.f32 %v5927_v29, %v4065_v9  ;;  %v4066_v20 = vadd.f32 0.2548296, %v4062_v12 }
0x17b4   : > { %v4071_v16 = vmul.f32 %v5929_v32, %v4067_v63  ;;  %v4068_v27 = vadd.f32 0.2548296, %v4064_v21 }
0x17b5   : > { %v4089_v19 = vmul.f32 %v5935_v15, %v4069_v5  ;;  %v4070_v11 = vmul.f32 %v5931_v44, %v4066_v20  ;;  %v4009_v44 = vmul.f32 0.5, %v6984_v1  ;;  %v5865_v15 = vld [vmem:[%s7086_s17 + $0x18] sm:$0xff]  }
0x17b6   : > { %v4091_v22 = vmul.f32 %v5937_v17, %v4071_v16  ;;  %v4072_v18 = vmul.f32 %v5933_v42, %v4068_v27  ;;  %v5866_v16 = vld [vmem:[%s7086_s17 + $0x20] sm:$0xff]   ;;  %v5867_v17 = vld [vmem:[%s7086_s17 + $0x28] sm:$0xff]   ;;  %v5869_v20 = vld [vmem:[%s7086_s17 + $0x38] sm:$0xff]  }
0x17b7   : > { %v4093_v25 = vsub.f32 1.0, %v4089_v19  ;;  %v4090_v52 = vmul.f32 %v5939_v30, %v4070_v11  ;;  %v5868_v19 = vld [vmem:[%s7086_s17 + $0x30] sm:$0xff]   ;;  %v5087_v27 = vld [vmem:[%s7084_s15] ss:$0 sm:$0xff] }
0x17b8   : > { %v4095_v31 = vsub.f32 1.0, %v4091_v22  ;;  %v4092_v37 = vmul.f32 %v5941_v36, %v4072_v18 }
0x17b9   : > { %v4101_v23 = vsub.f32 0.0, %v4093_v25  ;;  %v4094_v32 = vsub.f32 1.0, %v4090_v52 }
0x17ba   : > { %v4103_v29 = vsub.f32 0.0, %v4095_v31  ;;  %v4096_v40 = vsub.f32 1.0, %v4092_v37 }
0x17bb   : > { %v4105_v35 = vsel %vm4097_vm11, %v4101_v23, %v4093_v25  ;;  %v4102_v10 = vsub.f32 0.0, %v4094_v32 }
0x17bc   : > { %v4107_v38 = vsel %vm4099_vm12, %v4103_v29, %v4095_v31  ;;  %v4109_v39 = vadd.f32 1.0, %v4105_v35  ;;  %v4104_v42 = vsub.f32 0.0, %v4096_v40  ;;  %v5088_v31 = vld [vmem:[%s7085_s16] ss:$0 sm:$0xff] }
0x17bd   : > { %v4111_v26 = vadd.f32 1.0, %v4107_v38  ;;  %v4106_v28 = vsel %vm4098_vm13, %v4102_v10, %v4094_v32 }
0x17be   : > { %v4110_v56 = vadd.f32 1.0, %v4106_v28  ;;  %v4113_v45 = vmul.f32 %v4109_v39, %v4009_v44  ;;  %v4108_v46 = vsel %vm4100_vm14, %v4104_v42, %v4096_v40 }
0x17bf   : > { %v4112_v24 = vadd.f32 1.0, %v4108_v46  ;;  %v4115_v34 = vmul.f32 %v4111_v26, %v4011_v53 }
0x17c0   : > { %v4114_v49 = vmul.f32 %v4110_v56, %v4010_v43  ;;  %v4117_v1 = vpack.c.bf16 %v4113_v45, %v4113_v45 }
0x17c1   : > { %v4116_v50 = vmul.f32 %v4112_v24, %v4012_v48  ;;  %v4119_v41 = vpack.c.bf16 %v4115_v34, %v4115_v34 }
0x17c2   : > { %v4118_v54 = vpack.c.bf16 %v4114_v49, %v4114_v49 }
0x17c3   : > { %v4120_v51 = vpack.c.bf16 %v4116_v50, %v4116_v50 }
0x17c4   : > { %4418 = vmatprep.mubr.bf16.mxu1 %v4118_v54 }
0x17c5   : > { %4419 = vmatmul.mubr.bf16.vlgmr.msra.gmra.mrb[72].mxu1 %v4117_v1  ;;  %4458 = vmatprep.mubr.bf16.mxu0 %v4120_v51 }
0x17c6   : > { %5523 = vmatprep.mubr.msk.bf16.mxu1 %vm6024_vm0, %v6022_v14  ;;  %4459 = vmatmul.mubr.bf16.vlgmr.msra.gmra.mrb[52].mxu0 %v4119_v41 }
0x17c7   : > { %5508 = vmatpush3.bf16.msra.mxu1 %v5862_v59 }
0x17c8   : > { %5509 = vmatprep.subr.bf16.mxu1 %v6022_v14 }
0x17cb   : > { %5510 = vmatpush3.bf16.msra.mxu1 %v5863_v62 }
0x17cc   : > { %5511 = vmatprep.subr.bf16.mxu1 %v6022_v14 }
0x1898   : > { %v5294_v57 = vpop.f32.mrb[72].mxu1 }
0x1899   : > { %v5295_v8 = vpop.f32.mrb[73].mxu1  ;;  %v5316_v47 = vpop.f32.mrb[52].mxu0 }
0x189a   : > { %v5296_v2 = vadd.f32 %v5295_v8, %v5294_v57  ;;  %v5297_v55 = vpop.f32.mrb[74].mxu1  ;;  %v5317_v3 = vpop.f32.mrb[53].mxu0 }
0x189b   : > { %v5298_v60 = vpop.f32.mrb[75].mxu1  ;;  %v5318_v0 = vadd.f32 %v5317_v3, %v5316_v47  ;;  %v5319_v4 = vpop.f32.mrb[54].mxu0 }
0x189c   : > { %v4421_v61 = vadd.f32 %v5296_v2, %v5054_v6  ;;  %v5320_v7 = vpop.f32.mrb[55].mxu0 }
0x189e   : > { %v4461_v58 = vadd.f32 %v5318_v0, %v4421_v61 }
0x18a0   : > { %v4466_v9 = vadd.f32 %v4461_v58, %v6773_v33  ;;  %v5864_v33 = vld [vmem:[%s7086_s17 + $0x10] sm:$0xff]  }
0x18a1   : > { %5512 = vmatpush3.bf16.msra.mxu1 %v5864_v33 }
0x18a2   : > { %4469 = vadd.xlane.f32.xlu0 %v4466_v9  ;;  %5513 = vmatprep.subr.bf16.mxu1 %v6022_v14 }
0x18a5   : > { %5514 = vmatpush3.bf16.msra.mxu1 %v5865_v15 }
0x18a6   : > { %5515 = vmatprep.subr.bf16.mxu1 %v6022_v14 }
0x18a9   : > { %5516 = vmatpush3.bf16.msra.mxu1 %v5866_v16 }
0x18aa   : > { %5517 = vmatprep.subr.bf16.mxu1 %v6022_v14 }
0x18ad   : > { %5518 = vmatpush3.bf16.msra.mxu1 %v5867_v17 }
0x18ae   : > { %5519 = vmatprep.subr.bf16.mxu1 %v6022_v14 }
0x18b1   : > { %5520 = vmatpush3.bf16.msra.mxu1 %v5868_v19 }
0x18b2   : > { %5521 = vmatprep.subr.bf16.mxu1 %v6022_v14  ;;  %v5089_v14 = vld [vmem:[%s7112_s29] ss:$0 sm:$0xff] }
0x18b5   : > { %5522 = vmatpush3.bf16.msra.mxu1 %v5869_v20 }
0x192f   : > { %v4470_v63 = vpop.xlane.xlu0 %4469 }
0x1930   : > { %v4471_v5 = vmul.f32 0.0078125, %v4470_v63 }
0x1932   : > { %v4472_v12 = vsub.f32 %v4466_v9, %v4471_v5 }
0x1934   : > { %v4473_v13 = vmul.f32 %v4472_v12, %v4472_v12 }
0x1936   : > { %4474 = vadd.xlane.f32.xlu0 %v4473_v13 }
0x19c3   : > { %v4475_v21 = vpop.xlane.xlu0 %4474 }
0x19c4   : > { %v4476_v22 = vmul.f32 0.0078125, %v4475_v21 }
0x19c6   : > { %v4477_v25 = vadd.f32 1e-06, %v4476_v22 }
0x19c8   : > { %5942 = vrsqrt.f32 %v4477_v25 }
0x19d2   : > { %v5943_v11 = vpop.eup %5942 }
0x19d3   : > { %v4479_v30 = vmul.f32 %v5943_v11, %v4472_v12 }
0x19d5   : > { %v4486_v23 = vmul.f32 %v5087_v27, %v4479_v30 }
0x19d7   : > { %v4493_v52 = vadd.f32 %v5088_v31, %v4486_v23 }
0x19d9   : > { %v4494_v18 = vpack.c.bf16 %v4493_v52, %v4493_v52 }
0x19db   : > { %5524 = vmatmul.mubr.bf16.vlgmr.msra.gmra.mrb[76].mxu1 %v4494_v18 }
0x1aae   : > { %v4600_v36 = vpop.f32.mrb[76].mxu1 }
0x1aaf   : > { %v4601_v29 = vadd.f32 %v5089_v14, %v4600_v36  ;;  %v5525_v35 = vpop.f32.mrb[77].mxu1 }
0x1ab0   : > { %v4603_v32 = vpop.f32.mrb[78].mxu1 }
0x1ab1   : > { %4606 = vst [vmem:[%s630_s19] sm:$0xff] %v4601_v29  ;;  %v5526_v37 = vpop.f32.mrb[79].mxu1 }
0x1ab2 PF: > { %s7114_s0 = sld [smem:[#allocation8_spill]] }
0x1ab8   : > { %s31_s0 = sadd.s32 1, %s7114_s0  }
0x1ab9   : > { %p28_p9 = scmp.ge.s32.totalorder %s31_s0, 4  }
0x1abb   :  { %30 = sbr.rel (!%p28_p9) target bundleno = 9 (0x9), region = 147 }
0x1ac2   :  { %4626 = vsyncpa [#allocation3], 1 }
0x1ac3   :  { %4628 = vsyncpa [#allocation3 + $0x1], 1 }
0x1ac4   :  { %4629 = vsyncpa [#allocation5], 1 }

</bundles_post_ra>
